<compile_context>
chip_gen: v5e
topology: v5e:2x2
jax: 0.10.0
libtpu: 0.0.40
codegen_flags: <defaults>
</compile_context>

<pallas_src>
import numpy as np
import jax
import jax.numpy as jnp
from jax import lax
from jax.experimental import pallas as pl
from jax.experimental.pallas import tpu as pltpu

K = 64  # fixed by the module (`k = 64`)


# ----------------------------------------------------------------------------
# Fused Pallas kernel
# ----------------------------------------------------------------------------

def _make_fi_kernel(n_fa, H, W):
    """Build the fused FIModule kernel for a given number of x_fa inputs."""
    M = H * W

    def shift_dx(a, dx, fill):
        # S[:, y*W+x] = a[:, y*W + (x+dx)] if 0 <= x+dx < W else `fill`.
        if dx == 0:
            return a
        c = a.shape[0]
        fill_col = jnp.full((c, abs(dx)), fill, a.dtype)
        if dx > 0:
            s = jnp.concatenate([a[:, dx:], fill_col], axis=1)
        else:
            s = jnp.concatenate([fill_col, a[:, :dx]], axis=1)
        x_pos = lax.broadcasted_iota(jnp.int32, (c, M), 1) % W
        oob = (x_pos >= (W - dx)) if dx > 0 else (x_pos < (-dx))
        return jnp.where(oob, fill, s)

    def shift_dy(a, dy, fill):
        # S[:, y*W+x] = a[:, (y+dy)*W + x] if 0 <= y+dy < H else `fill`.
        if dy == 0:
            return a
        c = a.shape[0]
        k = abs(dy) * W
        fill_rows = jnp.full((c, k), fill, a.dtype)
        if dy > 0:
            return jnp.concatenate([a[:, k:], fill_rows], axis=1)
        return jnp.concatenate([fill_rows, a[:, :-k]], axis=1)

    def conv3x3_relu(a, w_flat_ref, b_ref):
        # a: (Cin, M); w_flat: (Cout, 9*Cin) tap-major; b: (Cout, 1).
        shifted = []
        for dy in (-1, 0, 1):
            ay = shift_dy(a, dy, 0.0)
            for dx in (-1, 0, 1):
                shifted.append(shift_dx(ay, dx, 0.0))
        patch = jnp.concatenate(shifted, axis=0)          # (9*Cin, M), sublane concat
        z = jnp.dot(w_flat_ref[...], patch,
                    preferred_element_type=jnp.float32) + b_ref[...]
        return jnp.maximum(z, 0.0)

    def maxpool3x3(a):
        neg = float("-inf")
        m = jnp.maximum(a, shift_dx(a, 1, neg))            # separable: W pass
        m = jnp.maximum(m, shift_dx(a, -1, neg))
        out = jnp.maximum(m, shift_dy(m, 1, neg))          # then H pass
        return jnp.maximum(out, shift_dy(m, -1, neg))

    def kernel(*args):
        x_cm_ref = args[0]
        fa_refs = args[1:1 + n_fa]
        (wm_ref, bm_ref, w4_ref, b4_ref,
         wb2_ref, bb2_ref, wb3a_ref, bb3a_ref,
         wb3b_ref, bb3b_ref, out_ref) = args[1 + n_fa:]

        # Fused input sum (VPU), channels-first (C, M).
        x = x_cm_ref[0]
        for r in fa_refs:
            x = x + r[0]

        # Merged branch-head 1x1 convs: one lane-dense (64,64)@(64,M) matmul.
        t_all = jnp.maximum(
            jnp.dot(wm_ref[...], x, preferred_element_type=jnp.float32)
            + bm_ref[...], 0.0)
        b1 = t_all[0:K // 4]                   # branch1 output        (16, M)
        t2 = t_all[K // 4:K // 4 + K // 2]     # branch2 intermediate  (32, M)
        t3 = t_all[K // 4 + K // 2:]           # branch3 intermediate  (16, M)

        b2 = conv3x3_relu(t2, wb2_ref, bb2_ref)
        t3 = conv3x3_relu(t3, wb3a_ref, bb3a_ref)
        b3 = conv3x3_relu(t3, wb3b_ref, bb3b_ref)

        mp = maxpool3x3(x)
        b4 = jnp.maximum(
            jnp.dot(w4_ref[...], mp, preferred_element_type=jnp.float32)
            + b4_ref[...], 0.0)

        # Channel concat on the (8-aligned) sublane axis; single lane-dense store.
        out_ref[0] = jnp.concatenate([b1, b2, b3, b4], axis=0).astype(out_ref.dtype)

    return kernel


# ----------------------------------------------------------------------------
# Weight re-packing helpers (tiny, host/XLA side)
# ----------------------------------------------------------------------------

def _to_cm_1x1(wb):
    # HWIO (1,1,Cin,Cout), (Cout,)  ->  (Cout, Cin), (Cout, 1)
    w, b = wb
    return jnp.transpose(w[0, 0]), b.reshape(-1, 1)


def _to_cm_3x3(wb):
    # HWIO (3,3,Cin,Cout), (Cout,)  ->  (Cout, 9*Cin) tap-major, (Cout, 1)
    w, b = wb
    cout = w.shape[-1]
    w_flat = jnp.transpose(w, (3, 0, 1, 2)).reshape(cout, -1)
    return w_flat, b.reshape(-1, 1)


# ----------------------------------------------------------------------------
# FIModule forward (NCHW in / NCHW out, matching the PyTorch module)
# ----------------------------------------------------------------------------

def fi_module_forward(params, x_cm_nchw, x_fa_nchw):
    N, C, H, W_ = x_cm_nchw.shape
    assert C == K
    M = H * W_

    # NCHW -> (N, C, H*W): pure reshape, no transpose / extra HBM pass.
    x_cm = x_cm_nchw.reshape(N, C, M)
    x_fa = [t.reshape(N, C, M) for t in x_fa_nchw]
    n_fa = len(x_fa)

    w1, b1 = _to_cm_1x1(params["b1_c1"])
    w2, b2 = _to_cm_1x1(params["b2_c1"])
    w3, b3 = _to_cm_1x1(params["b3_c1"])
    wm = jnp.concatenate([w1, w2, w3], axis=0)   # (64, 64) merged 1x1 weights
    bm = jnp.concatenate([b1, b2, b3], axis=0)   # (64, 1)
    w4, b4 = _to_cm_1x1(params["b4_c1"])
    wb2, bb2 = _to_cm_3x3(params["b2_c2"])
    wb3a, bb3a = _to_cm_3x3(params["b3_c2"])
    wb3b, bb3b = _to_cm_3x3(params["b3_c3"])

    weights = (wm, bm, w4, b4, wb2, bb2, wb3a, bb3a, wb3b, bb3b)

    act_spec = pl.BlockSpec((1, C, M), lambda n: (n, 0, 0))

    def full_spec(arr):
        zeros = (0,) * arr.ndim
        return pl.BlockSpec(arr.shape, lambda n: zeros)

    in_specs = [act_spec] * (1 + n_fa) + [full_spec(w) for w in weights]

    out = pl.pallas_call(
        _make_fi_kernel(n_fa, H, W_),
        out_shape=jax.ShapeDtypeStruct((N, C, M), x_cm.dtype),
        grid=(N,),
        in_specs=in_specs,
        out_specs=pl.BlockSpec((1, C, M), lambda n: (n, 0, 0)),
        compiler_params=pltpu.CompilerParams(
            dimension_semantics=("parallel",)),   # v7x: shard batch over 2 TCs
    )(x_cm, *x_fa, *weights)
    # TODO(synk): if the downstream consumer accepts (N, C, H*W) / NHWC, skip
    # this reshape-back entirely; it is free here (no transpose) anyway.
    return out.reshape(N, C, H, W_)


# ----------------------------------------------------------------------------
# Parameters (deterministic, PyTorch-Conv2d-style uniform init; HWIO layout)
# ----------------------------------------------------------------------------

def init_params(key):
    def conv_wb(k, kh, kw, cin, cout):
        bound = float((cin * kh * kw) ** -0.5)
        kw_, kb_ = jax.random.split(k)
        w = jax.random.uniform(kw_, (kh, kw, cin, cout), jnp.float32, -bound, bound)
        b = jax.random.uniform(kb_, (cout,), jnp.float32, -bound, bound)
        return w, b

    keys = jax.random.split(key, 7)
    return {
        "b1_c1": conv_wb(keys[0], 1, 1, K, K // 4),
        "b2_c1": conv_wb(keys[1], 1, 1, K, K // 2),
        "b2_c2": conv_wb(keys[2], 3, 3, K // 2, K // 4),
        "b3_c1": conv_wb(keys[3], 1, 1, K, K // 4),
        "b3_c2": conv_wb(keys[4], 3, 3, K // 4, K // 4),
        "b3_c3": conv_wb(keys[5], 3, 3, K // 4, K // 4),
        "b4_c1": conv_wb(keys[6], 1, 1, K, K // 4),
    }


# ----------------------------------------------------------------------------
# Pure-JAX reference (for correctness check)
# ----------------------------------------------------------------------------

def ref_forward(params, x_cm_nchw, x_fa_nchw):
    x = x_cm_nchw
    for t in x_fa_nchw:
        x = x + t
    x = jnp.transpose(x, (0, 2, 3, 1))
    dn = ("NHWC", "HWIO", "NHWC")

    def conv(z, wb, pad):
        w, b = wb
        y = lax.conv_general_dilated(z, w, (1, 1), pad, dimension_numbers=dn)
        return jax.nn.relu(y + b)

    b1 = conv(x, params["b1_c1"], "VALID")
    b2 = conv(conv(x, params["b2_c1"], "VALID"), params["b2_c2"], "SAME")
    b3 = conv(conv(conv(x, params["b3_c1"], "VALID"),
                   params["b3_c2"], "SAME"), params["b3_c3"], "SAME")
    mp = lax.reduce_window(x, -jnp.inf, lax.max, (1, 3, 3, 1), (1, 1, 1, 1),
                           ((0, 0), (1, 1), (1, 1), (0, 0)))
    b4 = conv(mp, params["b4_c1"], "VALID")
    cat = jnp.concatenate([b1, b2, b3, b4], axis=-1)
    return jnp.transpose(cat, (0, 3, 1, 2))


# ----------------------------------------------------------------------------

if __name__ == "__main__":
    key = jax.random.PRNGKey(0)
    kx, kf1, kf2 = jax.random.split(key, 3)
    N, H, W_ = 2, 16, 16

    x_cm = jax.random.normal(kx, (N, K, H, W_), jnp.float32)
    x_fa = [jax.random.normal(kf1, (N, K, H, W_), jnp.float32),
            jax.random.normal(kf2, (N, K, H, W_), jnp.float32)]

    params = init_params(jax.random.PRNGKey(42))

    fwd = jax.jit(fi_module_forward)
    out = jax.block_until_ready(fwd(params, x_cm, x_fa))
    assert out.shape == (N, K, H, W_), out.shape

    ref = ref_forward(params, x_cm, x_fa)
    np.testing.assert_allclose(np.asarray(out), np.asarray(ref),
                               atol=2e-4, rtol=2e-4)
    print("KERNEL_OK")
</pallas_src>

<mosaic_0001>
module attributes {stable_mosaic.version = 11 : i64} {
  func.func @kernel(%arg0: i32, %arg1: memref<1x64x256xf32, #tpu.memory_space<vmem>>, %arg2: memref<1x64x256xf32, #tpu.memory_space<vmem>>, %arg3: memref<1x64x256xf32, #tpu.memory_space<vmem>>, %arg4: memref<64x64xf32, #tpu.memory_space<vmem>>, %arg5: memref<64x1xf32, #tpu.memory_space<vmem>>, %arg6: memref<16x64xf32, #tpu.memory_space<vmem>>, %arg7: memref<16x1xf32, #tpu.memory_space<vmem>>, %arg8: memref<16x288xf32, #tpu.memory_space<vmem>>, %arg9: memref<16x1xf32, #tpu.memory_space<vmem>>, %arg10: memref<16x144xf32, #tpu.memory_space<vmem>>, %arg11: memref<16x1xf32, #tpu.memory_space<vmem>>, %arg12: memref<16x144xf32, #tpu.memory_space<vmem>>, %arg13: memref<16x1xf32, #tpu.memory_space<vmem>>, %arg14: memref<1x64x256xf32, #tpu.memory_space<vmem>>) attributes {dimension_semantics = [#tpu.dimension_semantics<parallel>], iteration_bounds = array<i64: 2>, scalar_prefetch = 0 : i64, scratch_operands = 0 : i64, tpu.core_type = #tpu.core_type<tc>, window_params = [{transform_indices = @transform_0, window_bounds = array<i64: 1, 64, 256>}, {transform_indices = @transform_1, window_bounds = array<i64: 1, 64, 256>}, {transform_indices = @transform_2, window_bounds = array<i64: 1, 64, 256>}, {pipeline_mode = #tpu.pipeline_mode<synchronous>, transform_indices = @transform_3, window_bounds = array<i64: 64, 64>}, {pipeline_mode = #tpu.pipeline_mode<synchronous>, transform_indices = @transform_4, window_bounds = array<i64: 64, 1>}, {pipeline_mode = #tpu.pipeline_mode<synchronous>, transform_indices = @transform_5, window_bounds = array<i64: 16, 64>}, {pipeline_mode = #tpu.pipeline_mode<synchronous>, transform_indices = @transform_6, window_bounds = array<i64: 16, 1>}, {pipeline_mode = #tpu.pipeline_mode<synchronous>, transform_indices = @transform_7, window_bounds = array<i64: 16, 288>}, {pipeline_mode = #tpu.pipeline_mode<synchronous>, transform_indices = @transform_8, window_bounds = array<i64: 16, 1>}, {pipeline_mode = #tpu.pipeline_mode<synchronous>, transform_indices = @transform_9, window_bounds = array<i64: 16, 144>}, {pipeline_mode = #tpu.pipeline_mode<synchronous>, transform_indices = @transform_10, window_bounds = array<i64: 16, 1>}, {pipeline_mode = #tpu.pipeline_mode<synchronous>, transform_indices = @transform_11, window_bounds = array<i64: 16, 144>}, {pipeline_mode = #tpu.pipeline_mode<synchronous>, transform_indices = @transform_12, window_bounds = array<i64: 16, 1>}, {transform_indices = @transform_13, window_bounds = array<i64: 1, 64, 256>}]} {
    %c0 = arith.constant 0 : index
    %c0_0 = arith.constant 0 : index
    %c0_1 = arith.constant 0 : index
    %0 = vector.load %arg1[%c0, %c0_0, %c0_1] : memref<1x64x256xf32, #tpu.memory_space<vmem>>, vector<1x64x256xf32>
    %1 = vector.shape_cast %0 : vector<1x64x256xf32> to vector<64x256xf32>
    %c0_2 = arith.constant 0 : index
    %c0_3 = arith.constant 0 : index
    %c0_4 = arith.constant 0 : index
    %2 = vector.load %arg2[%c0_2, %c0_3, %c0_4] : memref<1x64x256xf32, #tpu.memory_space<vmem>>, vector<1x64x256xf32>
    %3 = vector.shape_cast %2 : vector<1x64x256xf32> to vector<64x256xf32>
    %4 = arith.addf %1, %3 : vector<64x256xf32>
    %c0_5 = arith.constant 0 : index
    %c0_6 = arith.constant 0 : index
    %c0_7 = arith.constant 0 : index
    %5 = vector.load %arg3[%c0_5, %c0_6, %c0_7] : memref<1x64x256xf32, #tpu.memory_space<vmem>>, vector<1x64x256xf32>
    %6 = vector.shape_cast %5 : vector<1x64x256xf32> to vector<64x256xf32>
    %7 = arith.addf %4, %6 : vector<64x256xf32>
    %c0_8 = arith.constant 0 : index
    %c0_9 = arith.constant 0 : index
    %8 = vector.load %arg4[%c0_8, %c0_9] : memref<64x64xf32, #tpu.memory_space<vmem>>, vector<64x64xf32>
    %cst = arith.constant dense<0.000000e+00> : vector<64x256xf32>
    %9 = tpu.matmul %8, %7, %cst {dimension_numbers = #tpu.dot_dimension_numbers<[1], [0], [0], [1], [0, 0, 1, 1], [], []>} : vector<64x64xf32>, vector<64x256xf32>, vector<64x256xf32> -> vector<64x256xf32>
    %c0_10 = arith.constant 0 : index
    %c0_11 = arith.constant 0 : index
    %10 = vector.load %arg5[%c0_10, %c0_11] : memref<64x1xf32, #tpu.memory_space<vmem>>, vector<64x1xf32>
    %11 = vector.broadcast %10 : vector<64x1xf32> to vector<64x256xf32>
    %12 = arith.addf %9, %11 : vector<64x256xf32>
    %cst_12 = arith.constant 0.000000e+00 : f32
    %13 = vector.broadcast %cst_12 : f32 to vector<64x256xf32>
    %14 = arith.maximumf %12, %13 : vector<64x256xf32>
    %15 = vector.extract_strided_slice %14 {offsets = [0, 0], sizes = [16, 256], strides = [1, 1]} : vector<64x256xf32> to vector<16x256xf32>
    %16 = vector.extract_strided_slice %14 {offsets = [16, 0], sizes = [32, 256], strides = [1, 1]} : vector<64x256xf32> to vector<32x256xf32>
    %17 = vector.extract_strided_slice %14 {offsets = [48, 0], sizes = [16, 256], strides = [1, 1]} : vector<64x256xf32> to vector<16x256xf32>
    %cst_13 = arith.constant 0.000000e+00 : f32
    %18 = vector.broadcast %cst_13 : f32 to vector<32x16xf32>
    %19 = vector.extract_strided_slice %16 {offsets = [0, 0], sizes = [32, 240], strides = [1, 1]} : vector<32x256xf32> to vector<32x240xf32>
    %20 = tpu.concatenate %18, %19 in 1 : vector<32x16xf32>, vector<32x240xf32> -> vector<32x256xf32>
    %cst_14 = arith.constant 0.000000e+00 : f32
    %21 = vector.broadcast %cst_14 : f32 to vector<32x1xf32>
    %22 = vector.extract_strided_slice %20 {offsets = [0, 0], sizes = [32, 255], strides = [1, 1]} : vector<32x256xf32> to vector<32x255xf32>
    %23 = tpu.concatenate %21, %22 in 1 : vector<32x1xf32>, vector<32x255xf32> -> vector<32x256xf32>
    %24 = tpu.iota {dimensions = array<i32: 1>} : vector<32x256xi32>
    %c16_i32 = arith.constant 16 : i32
    %c0_i32 = arith.constant 0 : i32
    %25 = arith.cmpi eq, %c16_i32, %c0_i32 : i32
    %c1_i32 = arith.constant 1 : i32
    %26 = arith.select %25, %c1_i32, %c16_i32 : i32
    %27 = vector.broadcast %26 : i32 to vector<32x256xi32>
    %28 = arith.remsi %24, %27 : vector<32x256xi32>
    %c0_i32_15 = arith.constant 0 : i32
    %29 = vector.broadcast %c0_i32_15 : i32 to vector<32x256xi32>
    %30 = arith.cmpi ne, %28, %29 : vector<32x256xi32>
    %c0_i32_16 = arith.constant 0 : i32
    %31 = vector.broadcast %c0_i32_16 : i32 to vector<32x256xi32>
    %32 = arith.cmpi slt, %28, %31 : vector<32x256xi32>
    %c0_i32_17 = arith.constant 0 : i32
    %33 = arith.cmpi slt, %26, %c0_i32_17 : i32
    %34 = vector.broadcast %33 : i1 to vector<32x256xi1>
    %35 = vector.broadcast %34 : vector<32x256xi1> to vector<32x256xi1>
    %36 = arith.xori %32, %35 : vector<32x256xi1>
    %37 = arith.andi %36, %30 : vector<32x256xi1>
    %38 = vector.broadcast %26 : i32 to vector<32x256xi32>
    %39 = arith.addi %28, %38 : vector<32x256xi32>
    %40 = arith.select %37, %39, %28 : vector<32x256xi1>, vector<32x256xi32>
    %c1_i32_18 = arith.constant 1 : i32
    %41 = vector.broadcast %c1_i32_18 : i32 to vector<32x256xi32>
    %42 = arith.cmpi slt, %40, %41 : vector<32x256xi32>
    %cst_19 = arith.constant 0.000000e+00 : f32
    %43 = vector.broadcast %cst_19 : f32 to vector<32x256xf32>
    %44 = arith.select %42, %43, %23 : vector<32x256xi1>, vector<32x256xf32>
    %cst_20 = arith.constant 0.000000e+00 : f32
    %45 = vector.broadcast %cst_20 : f32 to vector<32x1xf32>
    %46 = vector.extract_strided_slice %20 {offsets = [0, 1], sizes = [32, 255], strides = [1, 1]} : vector<32x256xf32> to vector<32x255xf32>
    %47 = tpu.concatenate %46, %45 in 1 : vector<32x255xf32>, vector<32x1xf32> -> vector<32x256xf32>
    %48 = tpu.iota {dimensions = array<i32: 1>} : vector<32x256xi32>
    %c16_i32_21 = arith.constant 16 : i32
    %c0_i32_22 = arith.constant 0 : i32
    %49 = arith.cmpi eq, %c16_i32_21, %c0_i32_22 : i32
    %c1_i32_23 = arith.constant 1 : i32
    %50 = arith.select %49, %c1_i32_23, %c16_i32_21 : i32
    %51 = vector.broadcast %50 : i32 to vector<32x256xi32>
    %52 = arith.remsi %48, %51 : vector<32x256xi32>
    %c0_i32_24 = arith.constant 0 : i32
    %53 = vector.broadcast %c0_i32_24 : i32 to vector<32x256xi32>
    %54 = arith.cmpi ne, %52, %53 : vector<32x256xi32>
    %c0_i32_25 = arith.constant 0 : i32
    %55 = vector.broadcast %c0_i32_25 : i32 to vector<32x256xi32>
    %56 = arith.cmpi slt, %52, %55 : vector<32x256xi32>
    %c0_i32_26 = arith.constant 0 : i32
    %57 = arith.cmpi slt, %50, %c0_i32_26 : i32
    %58 = vector.broadcast %57 : i1 to vector<32x256xi1>
    %59 = vector.broadcast %58 : vector<32x256xi1> to vector<32x256xi1>
    %60 = arith.xori %56, %59 : vector<32x256xi1>
    %61 = arith.andi %60, %54 : vector<32x256xi1>
    %62 = vector.broadcast %50 : i32 to vector<32x256xi32>
    %63 = arith.addi %52, %62 : vector<32x256xi32>
    %64 = arith.select %61, %63, %52 : vector<32x256xi1>, vector<32x256xi32>
    %c15_i32 = arith.constant 15 : i32
    %65 = vector.broadcast %c15_i32 : i32 to vector<32x256xi32>
    %66 = arith.cmpi sge, %64, %65 : vector<32x256xi32>
    %cst_27 = arith.constant 0.000000e+00 : f32
    %67 = vector.broadcast %cst_27 : f32 to vector<32x256xf32>
    %68 = arith.select %66, %67, %47 : vector<32x256xi1>, vector<32x256xf32>
    %cst_28 = arith.constant 0.000000e+00 : f32
    %69 = vector.broadcast %cst_28 : f32 to vector<32x1xf32>
    %70 = vector.extract_strided_slice %16 {offsets = [0, 0], sizes = [32, 255], strides = [1, 1]} : vector<32x256xf32> to vector<32x255xf32>
    %71 = tpu.concatenate %69, %70 in 1 : vector<32x1xf32>, vector<32x255xf32> -> vector<32x256xf32>
    %72 = tpu.iota {dimensions = array<i32: 1>} : vector<32x256xi32>
    %c16_i32_29 = arith.constant 16 : i32
    %c0_i32_30 = arith.constant 0 : i32
    %73 = arith.cmpi eq, %c16_i32_29, %c0_i32_30 : i32
    %c1_i32_31 = arith.constant 1 : i32
    %74 = arith.select %73, %c1_i32_31, %c16_i32_29 : i32
    %75 = vector.broadcast %74 : i32 to vector<32x256xi32>
    %76 = arith.remsi %72, %75 : vector<32x256xi32>
    %c0_i32_32 = arith.constant 0 : i32
    %77 = vector.broadcast %c0_i32_32 : i32 to vector<32x256xi32>
    %78 = arith.cmpi ne, %76, %77 : vector<32x256xi32>
    %c0_i32_33 = arith.constant 0 : i32
    %79 = vector.broadcast %c0_i32_33 : i32 to vector<32x256xi32>
    %80 = arith.cmpi slt, %76, %79 : vector<32x256xi32>
    %c0_i32_34 = arith.constant 0 : i32
    %81 = arith.cmpi slt, %74, %c0_i32_34 : i32
    %82 = vector.broadcast %81 : i1 to vector<32x256xi1>
    %83 = vector.broadcast %82 : vector<32x256xi1> to vector<32x256xi1>
    %84 = arith.xori %80, %83 : vector<32x256xi1>
    %85 = arith.andi %84, %78 : vector<32x256xi1>
    %86 = vector.broadcast %74 : i32 to vector<32x256xi32>
    %87 = arith.addi %76, %86 : vector<32x256xi32>
    %88 = arith.select %85, %87, %76 : vector<32x256xi1>, vector<32x256xi32>
    %c1_i32_35 = arith.constant 1 : i32
    %89 = vector.broadcast %c1_i32_35 : i32 to vector<32x256xi32>
    %90 = arith.cmpi slt, %88, %89 : vector<32x256xi32>
    %cst_36 = arith.constant 0.000000e+00 : f32
    %91 = vector.broadcast %cst_36 : f32 to vector<32x256xf32>
    %92 = arith.select %90, %91, %71 : vector<32x256xi1>, vector<32x256xf32>
    %cst_37 = arith.constant 0.000000e+00 : f32
    %93 = vector.broadcast %cst_37 : f32 to vector<32x1xf32>
    %94 = vector.extract_strided_slice %16 {offsets = [0, 1], sizes = [32, 255], strides = [1, 1]} : vector<32x256xf32> to vector<32x255xf32>
    %95 = tpu.concatenate %94, %93 in 1 : vector<32x255xf32>, vector<32x1xf32> -> vector<32x256xf32>
    %96 = tpu.iota {dimensions = array<i32: 1>} : vector<32x256xi32>
    %c16_i32_38 = arith.constant 16 : i32
    %c0_i32_39 = arith.constant 0 : i32
    %97 = arith.cmpi eq, %c16_i32_38, %c0_i32_39 : i32
    %c1_i32_40 = arith.constant 1 : i32
    %98 = arith.select %97, %c1_i32_40, %c16_i32_38 : i32
    %99 = vector.broadcast %98 : i32 to vector<32x256xi32>
    %100 = arith.remsi %96, %99 : vector<32x256xi32>
    %c0_i32_41 = arith.constant 0 : i32
    %101 = vector.broadcast %c0_i32_41 : i32 to vector<32x256xi32>
    %102 = arith.cmpi ne, %100, %101 : vector<32x256xi32>
    %c0_i32_42 = arith.constant 0 : i32
    %103 = vector.broadcast %c0_i32_42 : i32 to vector<32x256xi32>
    %104 = arith.cmpi slt, %100, %103 : vector<32x256xi32>
    %c0_i32_43 = arith.constant 0 : i32
    %105 = arith.cmpi slt, %98, %c0_i32_43 : i32
    %106 = vector.broadcast %105 : i1 to vector<32x256xi1>
    %107 = vector.broadcast %106 : vector<32x256xi1> to vector<32x256xi1>
    %108 = arith.xori %104, %107 : vector<32x256xi1>
    %109 = arith.andi %108, %102 : vector<32x256xi1>
    %110 = vector.broadcast %98 : i32 to vector<32x256xi32>
    %111 = arith.addi %100, %110 : vector<32x256xi32>
    %112 = arith.select %109, %111, %100 : vector<32x256xi1>, vector<32x256xi32>
    %c15_i32_44 = arith.constant 15 : i32
    %113 = vector.broadcast %c15_i32_44 : i32 to vector<32x256xi32>
    %114 = arith.cmpi sge, %112, %113 : vector<32x256xi32>
    %cst_45 = arith.constant 0.000000e+00 : f32
    %115 = vector.broadcast %cst_45 : f32 to vector<32x256xf32>
    %116 = arith.select %114, %115, %95 : vector<32x256xi1>, vector<32x256xf32>
    %cst_46 = arith.constant 0.000000e+00 : f32
    %117 = vector.broadcast %cst_46 : f32 to vector<32x16xf32>
    %118 = vector.extract_strided_slice %16 {offsets = [0, 16], sizes = [32, 240], strides = [1, 1]} : vector<32x256xf32> to vector<32x240xf32>
    %119 = tpu.concatenate %118, %117 in 1 : vector<32x240xf32>, vector<32x16xf32> -> vector<32x256xf32>
    %cst_47 = arith.constant 0.000000e+00 : f32
    %120 = vector.broadcast %cst_47 : f32 to vector<32x1xf32>
    %121 = vector.extract_strided_slice %119 {offsets = [0, 0], sizes = [32, 255], strides = [1, 1]} : vector<32x256xf32> to vector<32x255xf32>
    %122 = tpu.concatenate %120, %121 in 1 : vector<32x1xf32>, vector<32x255xf32> -> vector<32x256xf32>
    %123 = tpu.iota {dimensions = array<i32: 1>} : vector<32x256xi32>
    %c16_i32_48 = arith.constant 16 : i32
    %c0_i32_49 = arith.constant 0 : i32
    %124 = arith.cmpi eq, %c16_i32_48, %c0_i32_49 : i32
    %c1_i32_50 = arith.constant 1 : i32
    %125 = arith.select %124, %c1_i32_50, %c16_i32_48 : i32
    %126 = vector.broadcast %125 : i32 to vector<32x256xi32>
    %127 = arith.remsi %123, %126 : vector<32x256xi32>
    %c0_i32_51 = arith.constant 0 : i32
    %128 = vector.broadcast %c0_i32_51 : i32 to vector<32x256xi32>
    %129 = arith.cmpi ne, %127, %128 : vector<32x256xi32>
    %c0_i32_52 = arith.constant 0 : i32
    %130 = vector.broadcast %c0_i32_52 : i32 to vector<32x256xi32>
    %131 = arith.cmpi slt, %127, %130 : vector<32x256xi32>
    %c0_i32_53 = arith.constant 0 : i32
    %132 = arith.cmpi slt, %125, %c0_i32_53 : i32
    %133 = vector.broadcast %132 : i1 to vector<32x256xi1>
    %134 = vector.broadcast %133 : vector<32x256xi1> to vector<32x256xi1>
    %135 = arith.xori %131, %134 : vector<32x256xi1>
    %136 = arith.andi %135, %129 : vector<32x256xi1>
    %137 = vector.broadcast %125 : i32 to vector<32x256xi32>
    %138 = arith.addi %127, %137 : vector<32x256xi32>
    %139 = arith.select %136, %138, %127 : vector<32x256xi1>, vector<32x256xi32>
    %c1_i32_54 = arith.constant 1 : i32
    %140 = vector.broadcast %c1_i32_54 : i32 to vector<32x256xi32>
    %141 = arith.cmpi slt, %139, %140 : vector<32x256xi32>
    %cst_55 = arith.constant 0.000000e+00 : f32
    %142 = vector.broadcast %cst_55 : f32 to vector<32x256xf32>
    %143 = arith.select %141, %142, %122 : vector<32x256xi1>, vector<32x256xf32>
    %cst_56 = arith.constant 0.000000e+00 : f32
    %144 = vector.broadcast %cst_56 : f32 to vector<32x1xf32>
    %145 = vector.extract_strided_slice %119 {offsets = [0, 1], sizes = [32, 255], strides = [1, 1]} : vector<32x256xf32> to vector<32x255xf32>
    %146 = tpu.concatenate %145, %144 in 1 : vector<32x255xf32>, vector<32x1xf32> -> vector<32x256xf32>
    %147 = tpu.iota {dimensions = array<i32: 1>} : vector<32x256xi32>
    %c16_i32_57 = arith.constant 16 : i32
    %c0_i32_58 = arith.constant 0 : i32
    %148 = arith.cmpi eq, %c16_i32_57, %c0_i32_58 : i32
    %c1_i32_59 = arith.constant 1 : i32
    %149 = arith.select %148, %c1_i32_59, %c16_i32_57 : i32
    %150 = vector.broadcast %149 : i32 to vector<32x256xi32>
    %151 = arith.remsi %147, %150 : vector<32x256xi32>
    %c0_i32_60 = arith.constant 0 : i32
    %152 = vector.broadcast %c0_i32_60 : i32 to vector<32x256xi32>
    %153 = arith.cmpi ne, %151, %152 : vector<32x256xi32>
    %c0_i32_61 = arith.constant 0 : i32
    %154 = vector.broadcast %c0_i32_61 : i32 to vector<32x256xi32>
    %155 = arith.cmpi slt, %151, %154 : vector<32x256xi32>
    %c0_i32_62 = arith.constant 0 : i32
    %156 = arith.cmpi slt, %149, %c0_i32_62 : i32
    %157 = vector.broadcast %156 : i1 to vector<32x256xi1>
    %158 = vector.broadcast %157 : vector<32x256xi1> to vector<32x256xi1>
    %159 = arith.xori %155, %158 : vector<32x256xi1>
    %160 = arith.andi %159, %153 : vector<32x256xi1>
    %161 = vector.broadcast %149 : i32 to vector<32x256xi32>
    %162 = arith.addi %151, %161 : vector<32x256xi32>
    %163 = arith.select %160, %162, %151 : vector<32x256xi1>, vector<32x256xi32>
    %c15_i32_63 = arith.constant 15 : i32
    %164 = vector.broadcast %c15_i32_63 : i32 to vector<32x256xi32>
    %165 = arith.cmpi sge, %163, %164 : vector<32x256xi32>
    %cst_64 = arith.constant 0.000000e+00 : f32
    %166 = vector.broadcast %cst_64 : f32 to vector<32x256xf32>
    %167 = arith.select %165, %166, %146 : vector<32x256xi1>, vector<32x256xf32>
    %168 = tpu.concatenate %44, %20, %68, %92, %16, %116, %143, %119, %167 in 0 : vector<32x256xf32>, vector<32x256xf32>, vector<32x256xf32>, vector<32x256xf32>, vector<32x256xf32>, vector<32x256xf32>, vector<32x256xf32>, vector<32x256xf32>, vector<32x256xf32> -> vector<288x256xf32>
    %c0_65 = arith.constant 0 : index
    %c0_66 = arith.constant 0 : index
    %169 = vector.load %arg8[%c0_65, %c0_66] : memref<16x288xf32, #tpu.memory_space<vmem>>, vector<16x288xf32>
    %cst_67 = arith.constant dense<0.000000e+00> : vector<16x256xf32>
    %170 = tpu.matmul %169, %168, %cst_67 {dimension_numbers = #tpu.dot_dimension_numbers<[1], [0], [0], [1], [0, 0, 1, 1], [], []>} : vector<16x288xf32>, vector<288x256xf32>, vector<16x256xf32> -> vector<16x256xf32>
    %c0_68 = arith.constant 0 : index
    %c0_69 = arith.constant 0 : index
    %171 = vector.load %arg9[%c0_68, %c0_69] : memref<16x1xf32, #tpu.memory_space<vmem>>, vector<16x1xf32>
    %172 = vector.broadcast %171 : vector<16x1xf32> to vector<16x256xf32>
    %173 = arith.addf %170, %172 : vector<16x256xf32>
    %cst_70 = arith.constant 0.000000e+00 : f32
    %174 = vector.broadcast %cst_70 : f32 to vector<16x256xf32>
    %175 = arith.maximumf %173, %174 : vector<16x256xf32>
    %cst_71 = arith.constant 0.000000e+00 : f32
    %176 = vector.broadcast %cst_71 : f32 to vector<16x16xf32>
    %177 = vector.extract_strided_slice %17 {offsets = [0, 0], sizes = [16, 240], strides = [1, 1]} : vector<16x256xf32> to vector<16x240xf32>
    %178 = tpu.concatenate %176, %177 in 1 : vector<16x16xf32>, vector<16x240xf32> -> vector<16x256xf32>
    %cst_72 = arith.constant 0.000000e+00 : f32
    %179 = vector.broadcast %cst_72 : f32 to vector<16x1xf32>
    %180 = vector.extract_strided_slice %178 {offsets = [0, 0], sizes = [16, 255], strides = [1, 1]} : vector<16x256xf32> to vector<16x255xf32>
    %181 = tpu.concatenate %179, %180 in 1 : vector<16x1xf32>, vector<16x255xf32> -> vector<16x256xf32>
    %182 = tpu.iota {dimensions = array<i32: 1>} : vector<16x256xi32>
    %c16_i32_73 = arith.constant 16 : i32
    %c0_i32_74 = arith.constant 0 : i32
    %183 = arith.cmpi eq, %c16_i32_73, %c0_i32_74 : i32
    %c1_i32_75 = arith.constant 1 : i32
    %184 = arith.select %183, %c1_i32_75, %c16_i32_73 : i32
    %185 = vector.broadcast %184 : i32 to vector<16x256xi32>
    %186 = arith.remsi %182, %185 : vector<16x256xi32>
    %c0_i32_76 = arith.constant 0 : i32
    %187 = vector.broadcast %c0_i32_76 : i32 to vector<16x256xi32>
    %188 = arith.cmpi ne, %186, %187 : vector<16x256xi32>
    %c0_i32_77 = arith.constant 0 : i32
    %189 = vector.broadcast %c0_i32_77 : i32 to vector<16x256xi32>
    %190 = arith.cmpi slt, %186, %189 : vector<16x256xi32>
    %c0_i32_78 = arith.constant 0 : i32
    %191 = arith.cmpi slt, %184, %c0_i32_78 : i32
    %192 = vector.broadcast %191 : i1 to vector<16x256xi1>
    %193 = vector.broadcast %192 : vector<16x256xi1> to vector<16x256xi1>
    %194 = arith.xori %190, %193 : vector<16x256xi1>
    %195 = arith.andi %194, %188 : vector<16x256xi1>
    %196 = vector.broadcast %184 : i32 to vector<16x256xi32>
    %197 = arith.addi %186, %196 : vector<16x256xi32>
    %198 = arith.select %195, %197, %186 : vector<16x256xi1>, vector<16x256xi32>
    %c1_i32_79 = arith.constant 1 : i32
    %199 = vector.broadcast %c1_i32_79 : i32 to vector<16x256xi32>
    %200 = arith.cmpi slt, %198, %199 : vector<16x256xi32>
    %cst_80 = arith.constant 0.000000e+00 : f32
    %201 = vector.broadcast %cst_80 : f32 to vector<16x256xf32>
    %202 = arith.select %200, %201, %181 : vector<16x256xi1>, vector<16x256xf32>
    %cst_81 = arith.constant 0.000000e+00 : f32
    %203 = vector.broadcast %cst_81 : f32 to vector<16x1xf32>
    %204 = vector.extract_strided_slice %178 {offsets = [0, 1], sizes = [16, 255], strides = [1, 1]} : vector<16x256xf32> to vector<16x255xf32>
    %205 = tpu.concatenate %204, %203 in 1 : vector<16x255xf32>, vector<16x1xf32> -> vector<16x256xf32>
    %206 = tpu.iota {dimensions = array<i32: 1>} : vector<16x256xi32>
    %c16_i32_82 = arith.constant 16 : i32
    %c0_i32_83 = arith.constant 0 : i32
    %207 = arith.cmpi eq, %c16_i32_82, %c0_i32_83 : i32
    %c1_i32_84 = arith.constant 1 : i32
    %208 = arith.select %207, %c1_i32_84, %c16_i32_82 : i32
    %209 = vector.broadcast %208 : i32 to vector<16x256xi32>
    %210 = arith.remsi %206, %209 : vector<16x256xi32>
    %c0_i32_85 = arith.constant 0 : i32
    %211 = vector.broadcast %c0_i32_85 : i32 to vector<16x256xi32>
    %212 = arith.cmpi ne, %210, %211 : vector<16x256xi32>
    %c0_i32_86 = arith.constant 0 : i32
    %213 = vector.broadcast %c0_i32_86 : i32 to vector<16x256xi32>
    %214 = arith.cmpi slt, %210, %213 : vector<16x256xi32>
    %c0_i32_87 = arith.constant 0 : i32
    %215 = arith.cmpi slt, %208, %c0_i32_87 : i32
    %216 = vector.broadcast %215 : i1 to vector<16x256xi1>
    %217 = vector.broadcast %216 : vector<16x256xi1> to vector<16x256xi1>
    %218 = arith.xori %214, %217 : vector<16x256xi1>
    %219 = arith.andi %218, %212 : vector<16x256xi1>
    %220 = vector.broadcast %208 : i32 to vector<16x256xi32>
    %221 = arith.addi %210, %220 : vector<16x256xi32>
    %222 = arith.select %219, %221, %210 : vector<16x256xi1>, vector<16x256xi32>
    %c15_i32_88 = arith.constant 15 : i32
    %223 = vector.broadcast %c15_i32_88 : i32 to vector<16x256xi32>
    %224 = arith.cmpi sge, %222, %223 : vector<16x256xi32>
    %cst_89 = arith.constant 0.000000e+00 : f32
    %225 = vector.broadcast %cst_89 : f32 to vector<16x256xf32>
    %226 = arith.select %224, %225, %205 : vector<16x256xi1>, vector<16x256xf32>
    %cst_90 = arith.constant 0.000000e+00 : f32
    %227 = vector.broadcast %cst_90 : f32 to vector<16x1xf32>
    %228 = vector.extract_strided_slice %17 {offsets = [0, 0], sizes = [16, 255], strides = [1, 1]} : vector<16x256xf32> to vector<16x255xf32>
    %229 = tpu.concatenate %227, %228 in 1 : vector<16x1xf32>, vector<16x255xf32> -> vector<16x256xf32>
    %230 = tpu.iota {dimensions = array<i32: 1>} : vector<16x256xi32>
    %c16_i32_91 = arith.constant 16 : i32
    %c0_i32_92 = arith.constant 0 : i32
    %231 = arith.cmpi eq, %c16_i32_91, %c0_i32_92 : i32
    %c1_i32_93 = arith.constant 1 : i32
    %232 = arith.select %231, %c1_i32_93, %c16_i32_91 : i32
    %233 = vector.broadcast %232 : i32 to vector<16x256xi32>
    %234 = arith.remsi %230, %233 : vector<16x256xi32>
    %c0_i32_94 = arith.constant 0 : i32
    %235 = vector.broadcast %c0_i32_94 : i32 to vector<16x256xi32>
    %236 = arith.cmpi ne, %234, %235 : vector<16x256xi32>
    %c0_i32_95 = arith.constant 0 : i32
    %237 = vector.broadcast %c0_i32_95 : i32 to vector<16x256xi32>
    %238 = arith.cmpi slt, %234, %237 : vector<16x256xi32>
    %c0_i32_96 = arith.constant 0 : i32
    %239 = arith.cmpi slt, %232, %c0_i32_96 : i32
    %240 = vector.broadcast %239 : i1 to vector<16x256xi1>
    %241 = vector.broadcast %240 : vector<16x256xi1> to vector<16x256xi1>
    %242 = arith.xori %238, %241 : vector<16x256xi1>
    %243 = arith.andi %242, %236 : vector<16x256xi1>
    %244 = vector.broadcast %232 : i32 to vector<16x256xi32>
    %245 = arith.addi %234, %244 : vector<16x256xi32>
    %246 = arith.select %243, %245, %234 : vector<16x256xi1>, vector<16x256xi32>
    %c1_i32_97 = arith.constant 1 : i32
    %247 = vector.broadcast %c1_i32_97 : i32 to vector<16x256xi32>
    %248 = arith.cmpi slt, %246, %247 : vector<16x256xi32>
    %cst_98 = arith.constant 0.000000e+00 : f32
    %249 = vector.broadcast %cst_98 : f32 to vector<16x256xf32>
    %250 = arith.select %248, %249, %229 : vector<16x256xi1>, vector<16x256xf32>
    %cst_99 = arith.constant 0.000000e+00 : f32
    %251 = vector.broadcast %cst_99 : f32 to vector<16x1xf32>
    %252 = vector.extract_strided_slice %17 {offsets = [0, 1], sizes = [16, 255], strides = [1, 1]} : vector<16x256xf32> to vector<16x255xf32>
    %253 = tpu.concatenate %252, %251 in 1 : vector<16x255xf32>, vector<16x1xf32> -> vector<16x256xf32>
    %254 = tpu.iota {dimensions = array<i32: 1>} : vector<16x256xi32>
    %c16_i32_100 = arith.constant 16 : i32
    %c0_i32_101 = arith.constant 0 : i32
    %255 = arith.cmpi eq, %c16_i32_100, %c0_i32_101 : i32
    %c1_i32_102 = arith.constant 1 : i32
    %256 = arith.select %255, %c1_i32_102, %c16_i32_100 : i32
    %257 = vector.broadcast %256 : i32 to vector<16x256xi32>
    %258 = arith.remsi %254, %257 : vector<16x256xi32>
    %c0_i32_103 = arith.constant 0 : i32
    %259 = vector.broadcast %c0_i32_103 : i32 to vector<16x256xi32>
    %260 = arith.cmpi ne, %258, %259 : vector<16x256xi32>
    %c0_i32_104 = arith.constant 0 : i32
    %261 = vector.broadcast %c0_i32_104 : i32 to vector<16x256xi32>
    %262 = arith.cmpi slt, %258, %261 : vector<16x256xi32>
    %c0_i32_105 = arith.constant 0 : i32
    %263 = arith.cmpi slt, %256, %c0_i32_105 : i32
    %264 = vector.broadcast %263 : i1 to vector<16x256xi1>
    %265 = vector.broadcast %264 : vector<16x256xi1> to vector<16x256xi1>
    %266 = arith.xori %262, %265 : vector<16x256xi1>
    %267 = arith.andi %266, %260 : vector<16x256xi1>
    %268 = vector.broadcast %256 : i32 to vector<16x256xi32>
    %269 = arith.addi %258, %268 : vector<16x256xi32>
    %270 = arith.select %267, %269, %258 : vector<16x256xi1>, vector<16x256xi32>
    %c15_i32_106 = arith.constant 15 : i32
    %271 = vector.broadcast %c15_i32_106 : i32 to vector<16x256xi32>
    %272 = arith.cmpi sge, %270, %271 : vector<16x256xi32>
    %cst_107 = arith.constant 0.000000e+00 : f32
    %273 = vector.broadcast %cst_107 : f32 to vector<16x256xf32>
    %274 = arith.select %272, %273, %253 : vector<16x256xi1>, vector<16x256xf32>
    %cst_108 = arith.constant 0.000000e+00 : f32
    %275 = vector.broadcast %cst_108 : f32 to vector<16x16xf32>
    %276 = vector.extract_strided_slice %17 {offsets = [0, 16], sizes = [16, 240], strides = [1, 1]} : vector<16x256xf32> to vector<16x240xf32>
    %277 = tpu.concatenate %276, %275 in 1 : vector<16x240xf32>, vector<16x16xf32> -> vector<16x256xf32>
    %cst_109 = arith.constant 0.000000e+00 : f32
    %278 = vector.broadcast %cst_109 : f32 to vector<16x1xf32>
    %279 = vector.extract_strided_slice %277 {offsets = [0, 0], sizes = [16, 255], strides = [1, 1]} : vector<16x256xf32> to vector<16x255xf32>
    %280 = tpu.concatenate %278, %279 in 1 : vector<16x1xf32>, vector<16x255xf32> -> vector<16x256xf32>
    %281 = tpu.iota {dimensions = array<i32: 1>} : vector<16x256xi32>
    %c16_i32_110 = arith.constant 16 : i32
    %c0_i32_111 = arith.constant 0 : i32
    %282 = arith.cmpi eq, %c16_i32_110, %c0_i32_111 : i32
    %c1_i32_112 = arith.constant 1 : i32
    %283 = arith.select %282, %c1_i32_112, %c16_i32_110 : i32
    %284 = vector.broadcast %283 : i32 to vector<16x256xi32>
    %285 = arith.remsi %281, %284 : vector<16x256xi32>
    %c0_i32_113 = arith.constant 0 : i32
    %286 = vector.broadcast %c0_i32_113 : i32 to vector<16x256xi32>
    %287 = arith.cmpi ne, %285, %286 : vector<16x256xi32>
    %c0_i32_114 = arith.constant 0 : i32
    %288 = vector.broadcast %c0_i32_114 : i32 to vector<16x256xi32>
    %289 = arith.cmpi slt, %285, %288 : vector<16x256xi32>
    %c0_i32_115 = arith.constant 0 : i32
    %290 = arith.cmpi slt, %283, %c0_i32_115 : i32
    %291 = vector.broadcast %290 : i1 to vector<16x256xi1>
    %292 = vector.broadcast %291 : vector<16x256xi1> to vector<16x256xi1>
    %293 = arith.xori %289, %292 : vector<16x256xi1>
    %294 = arith.andi %293, %287 : vector<16x256xi1>
    %295 = vector.broadcast %283 : i32 to vector<16x256xi32>
    %296 = arith.addi %285, %295 : vector<16x256xi32>
    %297 = arith.select %294, %296, %285 : vector<16x256xi1>, vector<16x256xi32>
    %c1_i32_116 = arith.constant 1 : i32
    %298 = vector.broadcast %c1_i32_116 : i32 to vector<16x256xi32>
    %299 = arith.cmpi slt, %297, %298 : vector<16x256xi32>
    %cst_117 = arith.constant 0.000000e+00 : f32
    %300 = vector.broadcast %cst_117 : f32 to vector<16x256xf32>
    %301 = arith.select %299, %300, %280 : vector<16x256xi1>, vector<16x256xf32>
    %cst_118 = arith.constant 0.000000e+00 : f32
    %302 = vector.broadcast %cst_118 : f32 to vector<16x1xf32>
    %303 = vector.extract_strided_slice %277 {offsets = [0, 1], sizes = [16, 255], strides = [1, 1]} : vector<16x256xf32> to vector<16x255xf32>
    %304 = tpu.concatenate %303, %302 in 1 : vector<16x255xf32>, vector<16x1xf32> -> vector<16x256xf32>
    %305 = tpu.iota {dimensions = array<i32: 1>} : vector<16x256xi32>
    %c16_i32_119 = arith.constant 16 : i32
    %c0_i32_120 = arith.constant 0 : i32
    %306 = arith.cmpi eq, %c16_i32_119, %c0_i32_120 : i32
    %c1_i32_121 = arith.constant 1 : i32
    %307 = arith.select %306, %c1_i32_121, %c16_i32_119 : i32
    %308 = vector.broadcast %307 : i32 to vector<16x256xi32>
    %309 = arith.remsi %305, %308 : vector<16x256xi32>
    %c0_i32_122 = arith.constant 0 : i32
    %310 = vector.broadcast %c0_i32_122 : i32 to vector<16x256xi32>
    %311 = arith.cmpi ne, %309, %310 : vector<16x256xi32>
    %c0_i32_123 = arith.constant 0 : i32
    %312 = vector.broadcast %c0_i32_123 : i32 to vector<16x256xi32>
    %313 = arith.cmpi slt, %309, %312 : vector<16x256xi32>
    %c0_i32_124 = arith.constant 0 : i32
    %314 = arith.cmpi slt, %307, %c0_i32_124 : i32
    %315 = vector.broadcast %314 : i1 to vector<16x256xi1>
    %316 = vector.broadcast %315 : vector<16x256xi1> to vector<16x256xi1>
    %317 = arith.xori %313, %316 : vector<16x256xi1>
    %318 = arith.andi %317, %311 : vector<16x256xi1>
    %319 = vector.broadcast %307 : i32 to vector<16x256xi32>
    %320 = arith.addi %309, %319 : vector<16x256xi32>
    %321 = arith.select %318, %320, %309 : vector<16x256xi1>, vector<16x256xi32>
    %c15_i32_125 = arith.constant 15 : i32
    %322 = vector.broadcast %c15_i32_125 : i32 to vector<16x256xi32>
    %323 = arith.cmpi sge, %321, %322 : vector<16x256xi32>
    %cst_126 = arith.constant 0.000000e+00 : f32
    %324 = vector.broadcast %cst_126 : f32 to vector<16x256xf32>
    %325 = arith.select %323, %324, %304 : vector<16x256xi1>, vector<16x256xf32>
    %326 = tpu.concatenate %202, %178, %226, %250, %17, %274, %301, %277, %325 in 0 : vector<16x256xf32>, vector<16x256xf32>, vector<16x256xf32>, vector<16x256xf32>, vector<16x256xf32>, vector<16x256xf32>, vector<16x256xf32>, vector<16x256xf32>, vector<16x256xf32> -> vector<144x256xf32>
    %c0_127 = arith.constant 0 : index
    %c0_128 = arith.constant 0 : index
    %327 = vector.load %arg10[%c0_127, %c0_128] : memref<16x144xf32, #tpu.memory_space<vmem>>, vector<16x144xf32>
    %cst_129 = arith.constant dense<0.000000e+00> : vector<16x256xf32>
    %328 = tpu.matmul %327, %326, %cst_129 {dimension_numbers = #tpu.dot_dimension_numbers<[1], [0], [0], [1], [0, 0, 1, 1], [], []>} : vector<16x144xf32>, vector<144x256xf32>, vector<16x256xf32> -> vector<16x256xf32>
    %c0_130 = arith.constant 0 : index
    %c0_131 = arith.constant 0 : index
    %329 = vector.load %arg11[%c0_130, %c0_131] : memref<16x1xf32, #tpu.memory_space<vmem>>, vector<16x1xf32>
    %330 = vector.broadcast %329 : vector<16x1xf32> to vector<16x256xf32>
    %331 = arith.addf %328, %330 : vector<16x256xf32>
    %cst_132 = arith.constant 0.000000e+00 : f32
    %332 = vector.broadcast %cst_132 : f32 to vector<16x256xf32>
    %333 = arith.maximumf %331, %332 : vector<16x256xf32>
    %cst_133 = arith.constant 0.000000e+00 : f32
    %334 = vector.broadcast %cst_133 : f32 to vector<16x16xf32>
    %335 = vector.extract_strided_slice %333 {offsets = [0, 0], sizes = [16, 240], strides = [1, 1]} : vector<16x256xf32> to vector<16x240xf32>
    %336 = tpu.concatenate %334, %335 in 1 : vector<16x16xf32>, vector<16x240xf32> -> vector<16x256xf32>
    %cst_134 = arith.constant 0.000000e+00 : f32
    %337 = vector.broadcast %cst_134 : f32 to vector<16x1xf32>
    %338 = vector.extract_strided_slice %336 {offsets = [0, 0], sizes = [16, 255], strides = [1, 1]} : vector<16x256xf32> to vector<16x255xf32>
    %339 = tpu.concatenate %337, %338 in 1 : vector<16x1xf32>, vector<16x255xf32> -> vector<16x256xf32>
    %340 = tpu.iota {dimensions = array<i32: 1>} : vector<16x256xi32>
    %c16_i32_135 = arith.constant 16 : i32
    %c0_i32_136 = arith.constant 0 : i32
    %341 = arith.cmpi eq, %c16_i32_135, %c0_i32_136 : i32
    %c1_i32_137 = arith.constant 1 : i32
    %342 = arith.select %341, %c1_i32_137, %c16_i32_135 : i32
    %343 = vector.broadcast %342 : i32 to vector<16x256xi32>
    %344 = arith.remsi %340, %343 : vector<16x256xi32>
    %c0_i32_138 = arith.constant 0 : i32
    %345 = vector.broadcast %c0_i32_138 : i32 to vector<16x256xi32>
    %346 = arith.cmpi ne, %344, %345 : vector<16x256xi32>
    %c0_i32_139 = arith.constant 0 : i32
    %347 = vector.broadcast %c0_i32_139 : i32 to vector<16x256xi32>
    %348 = arith.cmpi slt, %344, %347 : vector<16x256xi32>
    %c0_i32_140 = arith.constant 0 : i32
    %349 = arith.cmpi slt, %342, %c0_i32_140 : i32
    %350 = vector.broadcast %349 : i1 to vector<16x256xi1>
    %351 = vector.broadcast %350 : vector<16x256xi1> to vector<16x256xi1>
    %352 = arith.xori %348, %351 : vector<16x256xi1>
    %353 = arith.andi %352, %346 : vector<16x256xi1>
    %354 = vector.broadcast %342 : i32 to vector<16x256xi32>
    %355 = arith.addi %344, %354 : vector<16x256xi32>
    %356 = arith.select %353, %355, %344 : vector<16x256xi1>, vector<16x256xi32>
    %c1_i32_141 = arith.constant 1 : i32
    %357 = vector.broadcast %c1_i32_141 : i32 to vector<16x256xi32>
    %358 = arith.cmpi slt, %356, %357 : vector<16x256xi32>
    %cst_142 = arith.constant 0.000000e+00 : f32
    %359 = vector.broadcast %cst_142 : f32 to vector<16x256xf32>
    %360 = arith.select %358, %359, %339 : vector<16x256xi1>, vector<16x256xf32>
    %cst_143 = arith.constant 0.000000e+00 : f32
    %361 = vector.broadcast %cst_143 : f32 to vector<16x1xf32>
    %362 = vector.extract_strided_slice %336 {offsets = [0, 1], sizes = [16, 255], strides = [1, 1]} : vector<16x256xf32> to vector<16x255xf32>
    %363 = tpu.concatenate %362, %361 in 1 : vector<16x255xf32>, vector<16x1xf32> -> vector<16x256xf32>
    %364 = tpu.iota {dimensions = array<i32: 1>} : vector<16x256xi32>
    %c16_i32_144 = arith.constant 16 : i32
    %c0_i32_145 = arith.constant 0 : i32
    %365 = arith.cmpi eq, %c16_i32_144, %c0_i32_145 : i32
    %c1_i32_146 = arith.constant 1 : i32
    %366 = arith.select %365, %c1_i32_146, %c16_i32_144 : i32
    %367 = vector.broadcast %366 : i32 to vector<16x256xi32>
    %368 = arith.remsi %364, %367 : vector<16x256xi32>
    %c0_i32_147 = arith.constant 0 : i32
    %369 = vector.broadcast %c0_i32_147 : i32 to vector<16x256xi32>
    %370 = arith.cmpi ne, %368, %369 : vector<16x256xi32>
    %c0_i32_148 = arith.constant 0 : i32
    %371 = vector.broadcast %c0_i32_148 : i32 to vector<16x256xi32>
    %372 = arith.cmpi slt, %368, %371 : vector<16x256xi32>
    %c0_i32_149 = arith.constant 0 : i32
    %373 = arith.cmpi slt, %366, %c0_i32_149 : i32
    %374 = vector.broadcast %373 : i1 to vector<16x256xi1>
    %375 = vector.broadcast %374 : vector<16x256xi1> to vector<16x256xi1>
    %376 = arith.xori %372, %375 : vector<16x256xi1>
    %377 = arith.andi %376, %370 : vector<16x256xi1>
    %378 = vector.broadcast %366 : i32 to vector<16x256xi32>
    %379 = arith.addi %368, %378 : vector<16x256xi32>
    %380 = arith.select %377, %379, %368 : vector<16x256xi1>, vector<16x256xi32>
    %c15_i32_150 = arith.constant 15 : i32
    %381 = vector.broadcast %c15_i32_150 : i32 to vector<16x256xi32>
    %382 = arith.cmpi sge, %380, %381 : vector<16x256xi32>
    %cst_151 = arith.constant 0.000000e+00 : f32
    %383 = vector.broadcast %cst_151 : f32 to vector<16x256xf32>
    %384 = arith.select %382, %383, %363 : vector<16x256xi1>, vector<16x256xf32>
    %cst_152 = arith.constant 0.000000e+00 : f32
    %385 = vector.broadcast %cst_152 : f32 to vector<16x1xf32>
    %386 = vector.extract_strided_slice %333 {offsets = [0, 0], sizes = [16, 255], strides = [1, 1]} : vector<16x256xf32> to vector<16x255xf32>
    %387 = tpu.concatenate %385, %386 in 1 : vector<16x1xf32>, vector<16x255xf32> -> vector<16x256xf32>
    %388 = tpu.iota {dimensions = array<i32: 1>} : vector<16x256xi32>
    %c16_i32_153 = arith.constant 16 : i32
    %c0_i32_154 = arith.constant 0 : i32
    %389 = arith.cmpi eq, %c16_i32_153, %c0_i32_154 : i32
    %c1_i32_155 = arith.constant 1 : i32
    %390 = arith.select %389, %c1_i32_155, %c16_i32_153 : i32
    %391 = vector.broadcast %390 : i32 to vector<16x256xi32>
    %392 = arith.remsi %388, %391 : vector<16x256xi32>
    %c0_i32_156 = arith.constant 0 : i32
    %393 = vector.broadcast %c0_i32_156 : i32 to vector<16x256xi32>
    %394 = arith.cmpi ne, %392, %393 : vector<16x256xi32>
    %c0_i32_157 = arith.constant 0 : i32
    %395 = vector.broadcast %c0_i32_157 : i32 to vector<16x256xi32>
    %396 = arith.cmpi slt, %392, %395 : vector<16x256xi32>
    %c0_i32_158 = arith.constant 0 : i32
    %397 = arith.cmpi slt, %390, %c0_i32_158 : i32
    %398 = vector.broadcast %397 : i1 to vector<16x256xi1>
    %399 = vector.broadcast %398 : vector<16x256xi1> to vector<16x256xi1>
    %400 = arith.xori %396, %399 : vector<16x256xi1>
    %401 = arith.andi %400, %394 : vector<16x256xi1>
    %402 = vector.broadcast %390 : i32 to vector<16x256xi32>
    %403 = arith.addi %392, %402 : vector<16x256xi32>
    %404 = arith.select %401, %403, %392 : vector<16x256xi1>, vector<16x256xi32>
    %c1_i32_159 = arith.constant 1 : i32
    %405 = vector.broadcast %c1_i32_159 : i32 to vector<16x256xi32>
    %406 = arith.cmpi slt, %404, %405 : vector<16x256xi32>
    %cst_160 = arith.constant 0.000000e+00 : f32
    %407 = vector.broadcast %cst_160 : f32 to vector<16x256xf32>
    %408 = arith.select %406, %407, %387 : vector<16x256xi1>, vector<16x256xf32>
    %cst_161 = arith.constant 0.000000e+00 : f32
    %409 = vector.broadcast %cst_161 : f32 to vector<16x1xf32>
    %410 = vector.extract_strided_slice %333 {offsets = [0, 1], sizes = [16, 255], strides = [1, 1]} : vector<16x256xf32> to vector<16x255xf32>
    %411 = tpu.concatenate %410, %409 in 1 : vector<16x255xf32>, vector<16x1xf32> -> vector<16x256xf32>
    %412 = tpu.iota {dimensions = array<i32: 1>} : vector<16x256xi32>
    %c16_i32_162 = arith.constant 16 : i32
    %c0_i32_163 = arith.constant 0 : i32
    %413 = arith.cmpi eq, %c16_i32_162, %c0_i32_163 : i32
    %c1_i32_164 = arith.constant 1 : i32
    %414 = arith.select %413, %c1_i32_164, %c16_i32_162 : i32
    %415 = vector.broadcast %414 : i32 to vector<16x256xi32>
    %416 = arith.remsi %412, %415 : vector<16x256xi32>
    %c0_i32_165 = arith.constant 0 : i32
    %417 = vector.broadcast %c0_i32_165 : i32 to vector<16x256xi32>
    %418 = arith.cmpi ne, %416, %417 : vector<16x256xi32>
    %c0_i32_166 = arith.constant 0 : i32
    %419 = vector.broadcast %c0_i32_166 : i32 to vector<16x256xi32>
    %420 = arith.cmpi slt, %416, %419 : vector<16x256xi32>
    %c0_i32_167 = arith.constant 0 : i32
    %421 = arith.cmpi slt, %414, %c0_i32_167 : i32
    %422 = vector.broadcast %421 : i1 to vector<16x256xi1>
    %423 = vector.broadcast %422 : vector<16x256xi1> to vector<16x256xi1>
    %424 = arith.xori %420, %423 : vector<16x256xi1>
    %425 = arith.andi %424, %418 : vector<16x256xi1>
    %426 = vector.broadcast %414 : i32 to vector<16x256xi32>
    %427 = arith.addi %416, %426 : vector<16x256xi32>
    %428 = arith.select %425, %427, %416 : vector<16x256xi1>, vector<16x256xi32>
    %c15_i32_168 = arith.constant 15 : i32
    %429 = vector.broadcast %c15_i32_168 : i32 to vector<16x256xi32>
    %430 = arith.cmpi sge, %428, %429 : vector<16x256xi32>
    %cst_169 = arith.constant 0.000000e+00 : f32
    %431 = vector.broadcast %cst_169 : f32 to vector<16x256xf32>
    %432 = arith.select %430, %431, %411 : vector<16x256xi1>, vector<16x256xf32>
    %cst_170 = arith.constant 0.000000e+00 : f32
    %433 = vector.broadcast %cst_170 : f32 to vector<16x16xf32>
    %434 = vector.extract_strided_slice %333 {offsets = [0, 16], sizes = [16, 240], strides = [1, 1]} : vector<16x256xf32> to vector<16x240xf32>
    %435 = tpu.concatenate %434, %433 in 1 : vector<16x240xf32>, vector<16x16xf32> -> vector<16x256xf32>
    %cst_171 = arith.constant 0.000000e+00 : f32
    %436 = vector.broadcast %cst_171 : f32 to vector<16x1xf32>
    %437 = vector.extract_strided_slice %435 {offsets = [0, 0], sizes = [16, 255], strides = [1, 1]} : vector<16x256xf32> to vector<16x255xf32>
    %438 = tpu.concatenate %436, %437 in 1 : vector<16x1xf32>, vector<16x255xf32> -> vector<16x256xf32>
    %439 = tpu.iota {dimensions = array<i32: 1>} : vector<16x256xi32>
    %c16_i32_172 = arith.constant 16 : i32
    %c0_i32_173 = arith.constant 0 : i32
    %440 = arith.cmpi eq, %c16_i32_172, %c0_i32_173 : i32
    %c1_i32_174 = arith.constant 1 : i32
    %441 = arith.select %440, %c1_i32_174, %c16_i32_172 : i32
    %442 = vector.broadcast %441 : i32 to vector<16x256xi32>
    %443 = arith.remsi %439, %442 : vector<16x256xi32>
    %c0_i32_175 = arith.constant 0 : i32
    %444 = vector.broadcast %c0_i32_175 : i32 to vector<16x256xi32>
    %445 = arith.cmpi ne, %443, %444 : vector<16x256xi32>
    %c0_i32_176 = arith.constant 0 : i32
    %446 = vector.broadcast %c0_i32_176 : i32 to vector<16x256xi32>
    %447 = arith.cmpi slt, %443, %446 : vector<16x256xi32>
    %c0_i32_177 = arith.constant 0 : i32
    %448 = arith.cmpi slt, %441, %c0_i32_177 : i32
    %449 = vector.broadcast %448 : i1 to vector<16x256xi1>
    %450 = vector.broadcast %449 : vector<16x256xi1> to vector<16x256xi1>
    %451 = arith.xori %447, %450 : vector<16x256xi1>
    %452 = arith.andi %451, %445 : vector<16x256xi1>
    %453 = vector.broadcast %441 : i32 to vector<16x256xi32>
    %454 = arith.addi %443, %453 : vector<16x256xi32>
    %455 = arith.select %452, %454, %443 : vector<16x256xi1>, vector<16x256xi32>
    %c1_i32_178 = arith.constant 1 : i32
    %456 = vector.broadcast %c1_i32_178 : i32 to vector<16x256xi32>
    %457 = arith.cmpi slt, %455, %456 : vector<16x256xi32>
    %cst_179 = arith.constant 0.000000e+00 : f32
    %458 = vector.broadcast %cst_179 : f32 to vector<16x256xf32>
    %459 = arith.select %457, %458, %438 : vector<16x256xi1>, vector<16x256xf32>
    %cst_180 = arith.constant 0.000000e+00 : f32
    %460 = vector.broadcast %cst_180 : f32 to vector<16x1xf32>
    %461 = vector.extract_strided_slice %435 {offsets = [0, 1], sizes = [16, 255], strides = [1, 1]} : vector<16x256xf32> to vector<16x255xf32>
    %462 = tpu.concatenate %461, %460 in 1 : vector<16x255xf32>, vector<16x1xf32> -> vector<16x256xf32>
    %463 = tpu.iota {dimensions = array<i32: 1>} : vector<16x256xi32>
    %c16_i32_181 = arith.constant 16 : i32
    %c0_i32_182 = arith.constant 0 : i32
    %464 = arith.cmpi eq, %c16_i32_181, %c0_i32_182 : i32
    %c1_i32_183 = arith.constant 1 : i32
    %465 = arith.select %464, %c1_i32_183, %c16_i32_181 : i32
    %466 = vector.broadcast %465 : i32 to vector<16x256xi32>
    %467 = arith.remsi %463, %466 : vector<16x256xi32>
    %c0_i32_184 = arith.constant 0 : i32
    %468 = vector.broadcast %c0_i32_184 : i32 to vector<16x256xi32>
    %469 = arith.cmpi ne, %467, %468 : vector<16x256xi32>
    %c0_i32_185 = arith.constant 0 : i32
    %470 = vector.broadcast %c0_i32_185 : i32 to vector<16x256xi32>
    %471 = arith.cmpi slt, %467, %470 : vector<16x256xi32>
    %c0_i32_186 = arith.constant 0 : i32
    %472 = arith.cmpi slt, %465, %c0_i32_186 : i32
    %473 = vector.broadcast %472 : i1 to vector<16x256xi1>
    %474 = vector.broadcast %473 : vector<16x256xi1> to vector<16x256xi1>
    %475 = arith.xori %471, %474 : vector<16x256xi1>
    %476 = arith.andi %475, %469 : vector<16x256xi1>
    %477 = vector.broadcast %465 : i32 to vector<16x256xi32>
    %478 = arith.addi %467, %477 : vector<16x256xi32>
    %479 = arith.select %476, %478, %467 : vector<16x256xi1>, vector<16x256xi32>
    %c15_i32_187 = arith.constant 15 : i32
    %480 = vector.broadcast %c15_i32_187 : i32 to vector<16x256xi32>
    %481 = arith.cmpi sge, %479, %480 : vector<16x256xi32>
    %cst_188 = arith.constant 0.000000e+00 : f32
    %482 = vector.broadcast %cst_188 : f32 to vector<16x256xf32>
    %483 = arith.select %481, %482, %462 : vector<16x256xi1>, vector<16x256xf32>
    %484 = tpu.concatenate %360, %336, %384, %408, %333, %432, %459, %435, %483 in 0 : vector<16x256xf32>, vector<16x256xf32>, vector<16x256xf32>, vector<16x256xf32>, vector<16x256xf32>, vector<16x256xf32>, vector<16x256xf32>, vector<16x256xf32>, vector<16x256xf32> -> vector<144x256xf32>
    %c0_189 = arith.constant 0 : index
    %c0_190 = arith.constant 0 : index
    %485 = vector.load %arg12[%c0_189, %c0_190] : memref<16x144xf32, #tpu.memory_space<vmem>>, vector<16x144xf32>
    %cst_191 = arith.constant dense<0.000000e+00> : vector<16x256xf32>
    %486 = tpu.matmul %485, %484, %cst_191 {dimension_numbers = #tpu.dot_dimension_numbers<[1], [0], [0], [1], [0, 0, 1, 1], [], []>} : vector<16x144xf32>, vector<144x256xf32>, vector<16x256xf32> -> vector<16x256xf32>
    %c0_192 = arith.constant 0 : index
    %c0_193 = arith.constant 0 : index
    %487 = vector.load %arg13[%c0_192, %c0_193] : memref<16x1xf32, #tpu.memory_space<vmem>>, vector<16x1xf32>
    %488 = vector.broadcast %487 : vector<16x1xf32> to vector<16x256xf32>
    %489 = arith.addf %486, %488 : vector<16x256xf32>
    %cst_194 = arith.constant 0.000000e+00 : f32
    %490 = vector.broadcast %cst_194 : f32 to vector<16x256xf32>
    %491 = arith.maximumf %489, %490 : vector<16x256xf32>
    %cst_195 = arith.constant 0xFF800000 : f32
    %492 = vector.broadcast %cst_195 : f32 to vector<64x1xf32>
    %493 = vector.extract_strided_slice %7 {offsets = [0, 1], sizes = [64, 255], strides = [1, 1]} : vector<64x256xf32> to vector<64x255xf32>
    %494 = tpu.concatenate %493, %492 in 1 : vector<64x255xf32>, vector<64x1xf32> -> vector<64x256xf32>
    %495 = tpu.iota {dimensions = array<i32: 1>} : vector<64x256xi32>
    %c16_i32_196 = arith.constant 16 : i32
    %c0_i32_197 = arith.constant 0 : i32
    %496 = arith.cmpi eq, %c16_i32_196, %c0_i32_197 : i32
    %c1_i32_198 = arith.constant 1 : i32
    %497 = arith.select %496, %c1_i32_198, %c16_i32_196 : i32
    %498 = vector.broadcast %497 : i32 to vector<64x256xi32>
    %499 = arith.remsi %495, %498 : vector<64x256xi32>
    %c0_i32_199 = arith.constant 0 : i32
    %500 = vector.broadcast %c0_i32_199 : i32 to vector<64x256xi32>
    %501 = arith.cmpi ne, %499, %500 : vector<64x256xi32>
    %c0_i32_200 = arith.constant 0 : i32
    %502 = vector.broadcast %c0_i32_200 : i32 to vector<64x256xi32>
    %503 = arith.cmpi slt, %499, %502 : vector<64x256xi32>
    %c0_i32_201 = arith.constant 0 : i32
    %504 = arith.cmpi slt, %497, %c0_i32_201 : i32
    %505 = vector.broadcast %504 : i1 to vector<64x256xi1>
    %506 = vector.broadcast %505 : vector<64x256xi1> to vector<64x256xi1>
    %507 = arith.xori %503, %506 : vector<64x256xi1>
    %508 = arith.andi %507, %501 : vector<64x256xi1>
    %509 = vector.broadcast %497 : i32 to vector<64x256xi32>
    %510 = arith.addi %499, %509 : vector<64x256xi32>
    %511 = arith.select %508, %510, %499 : vector<64x256xi1>, vector<64x256xi32>
    %c15_i32_202 = arith.constant 15 : i32
    %512 = vector.broadcast %c15_i32_202 : i32 to vector<64x256xi32>
    %513 = arith.cmpi sge, %511, %512 : vector<64x256xi32>
    %cst_203 = arith.constant 0xFF800000 : f32
    %514 = vector.broadcast %cst_203 : f32 to vector<64x256xf32>
    %515 = arith.select %513, %514, %494 : vector<64x256xi1>, vector<64x256xf32>
    %516 = arith.maximumf %7, %515 : vector<64x256xf32>
    %cst_204 = arith.constant 0xFF800000 : f32
    %517 = vector.broadcast %cst_204 : f32 to vector<64x1xf32>
    %518 = vector.extract_strided_slice %7 {offsets = [0, 0], sizes = [64, 255], strides = [1, 1]} : vector<64x256xf32> to vector<64x255xf32>
    %519 = tpu.concatenate %517, %518 in 1 : vector<64x1xf32>, vector<64x255xf32> -> vector<64x256xf32>
    %520 = tpu.iota {dimensions = array<i32: 1>} : vector<64x256xi32>
    %c16_i32_205 = arith.constant 16 : i32
    %c0_i32_206 = arith.constant 0 : i32
    %521 = arith.cmpi eq, %c16_i32_205, %c0_i32_206 : i32
    %c1_i32_207 = arith.constant 1 : i32
    %522 = arith.select %521, %c1_i32_207, %c16_i32_205 : i32
    %523 = vector.broadcast %522 : i32 to vector<64x256xi32>
    %524 = arith.remsi %520, %523 : vector<64x256xi32>
    %c0_i32_208 = arith.constant 0 : i32
    %525 = vector.broadcast %c0_i32_208 : i32 to vector<64x256xi32>
    %526 = arith.cmpi ne, %524, %525 : vector<64x256xi32>
    %c0_i32_209 = arith.constant 0 : i32
    %527 = vector.broadcast %c0_i32_209 : i32 to vector<64x256xi32>
    %528 = arith.cmpi slt, %524, %527 : vector<64x256xi32>
    %c0_i32_210 = arith.constant 0 : i32
    %529 = arith.cmpi slt, %522, %c0_i32_210 : i32
    %530 = vector.broadcast %529 : i1 to vector<64x256xi1>
    %531 = vector.broadcast %530 : vector<64x256xi1> to vector<64x256xi1>
    %532 = arith.xori %528, %531 : vector<64x256xi1>
    %533 = arith.andi %532, %526 : vector<64x256xi1>
    %534 = vector.broadcast %522 : i32 to vector<64x256xi32>
    %535 = arith.addi %524, %534 : vector<64x256xi32>
    %536 = arith.select %533, %535, %524 : vector<64x256xi1>, vector<64x256xi32>
    %c1_i32_211 = arith.constant 1 : i32
    %537 = vector.broadcast %c1_i32_211 : i32 to vector<64x256xi32>
    %538 = arith.cmpi slt, %536, %537 : vector<64x256xi32>
    %cst_212 = arith.constant 0xFF800000 : f32
    %539 = vector.broadcast %cst_212 : f32 to vector<64x256xf32>
    %540 = arith.select %538, %539, %519 : vector<64x256xi1>, vector<64x256xf32>
    %541 = arith.maximumf %516, %540 : vector<64x256xf32>
    %cst_213 = arith.constant 0xFF800000 : f32
    %542 = vector.broadcast %cst_213 : f32 to vector<64x16xf32>
    %543 = vector.extract_strided_slice %541 {offsets = [0, 16], sizes = [64, 240], strides = [1, 1]} : vector<64x256xf32> to vector<64x240xf32>
    %544 = tpu.concatenate %543, %542 in 1 : vector<64x240xf32>, vector<64x16xf32> -> vector<64x256xf32>
    %545 = arith.maximumf %541, %544 : vector<64x256xf32>
    %cst_214 = arith.constant 0xFF800000 : f32
    %546 = vector.broadcast %cst_214 : f32 to vector<64x16xf32>
    %547 = vector.extract_strided_slice %541 {offsets = [0, 0], sizes = [64, 240], strides = [1, 1]} : vector<64x256xf32> to vector<64x240xf32>
    %548 = tpu.concatenate %546, %547 in 1 : vector<64x16xf32>, vector<64x240xf32> -> vector<64x256xf32>
    %549 = arith.maximumf %545, %548 : vector<64x256xf32>
    %c0_215 = arith.constant 0 : index
    %c0_216 = arith.constant 0 : index
    %550 = vector.load %arg6[%c0_215, %c0_216] : memref<16x64xf32, #tpu.memory_space<vmem>>, vector<16x64xf32>
    %cst_217 = arith.constant dense<0.000000e+00> : vector<16x256xf32>
    %551 = tpu.matmul %550, %549, %cst_217 {dimension_numbers = #tpu.dot_dimension_numbers<[1], [0], [0], [1], [0, 0, 1, 1], [], []>} : vector<16x64xf32>, vector<64x256xf32>, vector<16x256xf32> -> vector<16x256xf32>
    %c0_218 = arith.constant 0 : index
    %c0_219 = arith.constant 0 : index
    %552 = vector.load %arg7[%c0_218, %c0_219] : memref<16x1xf32, #tpu.memory_space<vmem>>, vector<16x1xf32>
    %553 = vector.broadcast %552 : vector<16x1xf32> to vector<16x256xf32>
    %554 = arith.addf %551, %553 : vector<16x256xf32>
    %cst_220 = arith.constant 0.000000e+00 : f32
    %555 = vector.broadcast %cst_220 : f32 to vector<16x256xf32>
    %556 = arith.maximumf %554, %555 : vector<16x256xf32>
    %557 = tpu.concatenate %15, %175, %491, %556 in 0 : vector<16x256xf32>, vector<16x256xf32>, vector<16x256xf32>, vector<16x256xf32> -> vector<64x256xf32>
    %c0_221 = arith.constant 0 : index
    %c0_222 = arith.constant 0 : index
    %c0_223 = arith.constant 0 : index
    %558 = vector.load %arg14[%c0_221, %c0_222, %c0_223] : memref<1x64x256xf32, #tpu.memory_space<vmem>>, vector<1x64x256xf32>
    %559 = vector.shape_cast %558 : vector<1x64x256xf32> to vector<64x256xf32>
    %560 = vector.shape_cast %557 : vector<64x256xf32> to vector<1x64x256xf32>
    tpu.vector_store %arg14[%c0_221, %c0_222, %c0_223], %560 {strides = array<i32>} : memref<1x64x256xf32, #tpu.memory_space<vmem>>, vector<1x64x256xf32>,
    return
  }
  func.func @transform_0(%arg0: i32) -> (i32, i32, i32) {
    %c0_i32 = arith.constant 0 : i32
    %c0_i32_0 = arith.constant 0 : i32
    %c0_i32_1 = arith.constant 0 : i32
    return %arg0, %c0_i32, %c0_i32_0 : i32, i32, i32
  }
  func.func @transform_1(%arg0: i32) -> (i32, i32, i32) {
    %c0_i32 = arith.constant 0 : i32
    %c0_i32_0 = arith.constant 0 : i32
    %c0_i32_1 = arith.constant 0 : i32
    return %arg0, %c0_i32, %c0_i32_0 : i32, i32, i32
  }
  func.func @transform_2(%arg0: i32) -> (i32, i32, i32) {
    %c0_i32 = arith.constant 0 : i32
    %c0_i32_0 = arith.constant 0 : i32
    %c0_i32_1 = arith.constant 0 : i32
    return %arg0, %c0_i32, %c0_i32_0 : i32, i32, i32
  }
  func.func @transform_3(%arg0: i32) -> (i32, i32) {
    %c0_i32 = arith.constant 0 : i32
    %c0_i32_0 = arith.constant 0 : i32
    %c0_i32_1 = arith.constant 0 : i32
    return %c0_i32, %c0_i32_0 : i32, i32
  }
  func.func @transform_4(%arg0: i32) -> (i32, i32) {
    %c0_i32 = arith.constant 0 : i32
    %c0_i32_0 = arith.constant 0 : i32
    %c0_i32_1 = arith.constant 0 : i32
    return %c0_i32, %c0_i32_0 : i32, i32
  }
  func.func @transform_5(%arg0: i32) -> (i32, i32) {
    %c0_i32 = arith.constant 0 : i32
    %c0_i32_0 = arith.constant 0 : i32
    %c0_i32_1 = arith.constant 0 : i32
    return %c0_i32, %c0_i32_0 : i32, i32
  }
  func.func @transform_6(%arg0: i32) -> (i32, i32) {
    %c0_i32 = arith.constant 0 : i32
    %c0_i32_0 = arith.constant 0 : i32
    %c0_i32_1 = arith.constant 0 : i32
    return %c0_i32, %c0_i32_0 : i32, i32
  }
  func.func @transform_7(%arg0: i32) -> (i32, i32) {
    %c0_i32 = arith.constant 0 : i32
    %c0_i32_0 = arith.constant 0 : i32
    %c0_i32_1 = arith.constant 0 : i32
    return %c0_i32, %c0_i32_0 : i32, i32
  }
  func.func @transform_8(%arg0: i32) -> (i32, i32) {
    %c0_i32 = arith.constant 0 : i32
    %c0_i32_0 = arith.constant 0 : i32
    %c0_i32_1 = arith.constant 0 : i32
    return %c0_i32, %c0_i32_0 : i32, i32
  }
  func.func @transform_9(%arg0: i32) -> (i32, i32) {
    %c0_i32 = arith.constant 0 : i32
    %c0_i32_0 = arith.constant 0 : i32
    %c0_i32_1 = arith.constant 0 : i32
    return %c0_i32, %c0_i32_0 : i32, i32
  }
  func.func @transform_10(%arg0: i32) -> (i32, i32) {
    %c0_i32 = arith.constant 0 : i32
    %c0_i32_0 = arith.constant 0 : i32
    %c0_i32_1 = arith.constant 0 : i32
    return %c0_i32, %c0_i32_0 : i32, i32
  }
  func.func @transform_11(%arg0: i32) -> (i32, i32) {
    %c0_i32 = arith.constant 0 : i32
    %c0_i32_0 = arith.constant 0 : i32
    %c0_i32_1 = arith.constant 0 : i32
    return %c0_i32, %c0_i32_0 : i32, i32
  }
  func.func @transform_12(%arg0: i32) -> (i32, i32) {
    %c0_i32 = arith.constant 0 : i32
    %c0_i32_0 = arith.constant 0 : i32
    %c0_i32_1 = arith.constant 0 : i32
    return %c0_i32, %c0_i32_0 : i32, i32
  }
  func.func @transform_13(%arg0: i32) -> (i32, i32, i32) {
    %c0_i32 = arith.constant 0 : i32
    %c0_i32_0 = arith.constant 0 : i32
    %c0_i32_1 = arith.constant 0 : i32
    return %arg0, %c0_i32, %c0_i32_0 : i32, i32, i32
  }
}

</mosaic_0001>

<bundles_post_ra>
// kernel: fi_module_forward.1
= control target key start
LH: loop header
LB: loop body
LE: loop exit
PB: predicated region body
PF: predicated region fallthrough
CT: control target
= control target key end

     0   :  { %s2893_s25 = smov 0   ;;  %s4591_s0 = inlined_call_operand.vmem [shape: f32[2,64,256], index: 0, kind: input, shape index: {}]   ;;  %s4592_s1 = inlined_call_operand.vmem [shape: f32[2,64,256], index: 1, kind: input, shape index: {}]   ;;  %s4593_s2 = inlined_call_operand.vmem [shape: f32[2,64,256], index: 2, kind: input, shape index: {}]   ;;  %s4594_s3 = inlined_call_operand.vmem [shape: f32[64,64], index: 3, kind: input, shape index: {}]   ;;  %s4595_s4 = inlined_call_operand.vmem [shape: f32[64,1], index: 4, kind: input, shape index: {}]   ;;  %s4596_s5 = inlined_call_operand.vmem [shape: f32[16,64], index: 5, kind: input, shape index: {}]   ;;  %s4597_s6 = inlined_call_operand.vmem [shape: f32[16,1], index: 6, kind: input, shape index: {}]   ;;  %s4598_s7 = inlined_call_operand.vmem [shape: f32[16,288], index: 7, kind: input, shape index: {}]   ;;  %s4599_s8 = inlined_call_operand.vmem [shape: f32[16,1], index: 8, kind: input, shape index: {}]   ;;  %s4600_s9 = inlined_call_operand.vmem [shape: f32[16,144], index: 9, kind: input, shape index: {}]   ;;  %s4601_s10 = inlined_call_operand.vmem [shape: f32[16,1], index: 10, kind: input, shape index: {}]   ;;  %s4602_s11 = inlined_call_operand.vmem [shape: f32[16,144], index: 11, kind: input, shape index: {}]   ;;  %s4603_s12 = inlined_call_operand.vmem [shape: f32[16,1], index: 12, kind: input, shape index: {}]   ;;  %s4604_s13 = inlined_call_operand.vmem [shape: f32[2,64,256], index: 13, kind: output, shape index: {}]  }
   0x1 LB: > { %s2367_s26 = sadd.s32 4294967295, %s2816_s25   ;;  %p2371_p0 = scmp.ge.s32.totalorder %s2816_s25, 1  ;;  %s2816_s25 = sphi %s2893_s25, %s23_s25  }
   0x2   : > { %p407_p1 = scmp.lt.s32.totalorder %s2816_s25, 3 }
   0x4   : > { %p408_p2 = pnand %p2371_p0, %p407_p1 }
   0x6   : > { %411 = sbr.rel (%p408_p2) target bundleno = 1180 (0x49c), region = 72 }
   0xb   : > { %p461_p3 = scmp.lt.s32.totalorder %s2367_s26, 1  ;;  %v571_v0 = vld [vmem:[%s4595_s4 + $0x10] sm:$0xff]  ;;  %v569_v1 = vld [vmem:[%s4595_s4] sm:$0xff]  ;;  %v2818_v2 = vmov 0   ;;  %vm617_vm0 = vcmask 523264   ;;  %s2821_s27 = smov 1  }
   0xc   : > { %2648 = vset.pattern.permute.xlu1 %v2818_v2  ;;  %2647 = vset.pattern.permute.xlu0 %v2818_v2  ;;  %s2822_s28 = smov 127   ;;  %vm764_vm1 = vcmask 130048   ;;  %vm994_vm2 = vcmask 916480   ;;  %vm801_vm5 = vcmask 7168   ;;  %vm871_vm6 = vcmask 1039360  }
   0xd   : > { %s4740_s26 = smov (!%p461_p3, %s2367_s26), 1  ;;  %589 = vperm.xlu1 %2648, %v571_v0   ;;  %579 = vperm.xlu0 %2647, %v569_v1   ;;  %vm3576_vm10 = vmneg %vm764_vm1  ;;  %vm1113_vm14 = vcmask 261120  }
   0xe   : > { %s2907_s14 = sshll.u32 %s4740_s26, 7  ;;  %2649 = vset.pattern.permute.xlu2 %v2818_v2  ;;  %s2820_s26 = smov 112  }
   0xf   : > { %s2913_s17 = scalar_lea.vmem %s4591_s0, %s2907_s14  ;;  %s2919_s20 = scalar_lea.vmem %s4592_s1, %s2907_s14 }
  0x10   : > { %s2925_s23 = scalar_lea.vmem %s4593_s2, %s2907_s14  ;;  %v495_v3 = vld [vmem:[%s2913_s17 + $0x70] sm:$0xff]  ;;  %v496_v5 = vld [vmem:[%s2913_s17 + $0x78] sm:$0xff]  ;;  %v493_v11 = vld [vmem:[%s2913_s17 + $0x60] sm:$0xff]  ;;  %s3085_s24 = scalar_lea.vmem %s4604_s13, %s2907_s14 }
  0x11   : > { %v511_v4 = vld [vmem:[%s2919_s20 + $0x70] sm:$0xff]  ;;  %v512_v8 = vld [vmem:[%s2919_s20 + $0x78] sm:$0xff]  ;;  %v509_v12 = vld [vmem:[%s2919_s20 + $0x60] sm:$0xff]  ;;  %s2819_s14 = smov 16  }
  0x12   : > { %v527_v6 = vadd.f32 %v511_v4, %v495_v3  ;;  %v543_v7 = vld [vmem:[%s2925_s23 + $0x70] sm:$0xff]  ;;  %v544_v9 = vld [vmem:[%s2925_s23 + $0x78] sm:$0xff]  ;;  %v528_v10 = vadd.f32 %v512_v8, %v496_v5  ;;  %v541_v13 = vld [vmem:[%s2925_s23 + $0x60] sm:$0xff]  ;;  %v525_v15 = vadd.f32 %v509_v12, %v493_v11 }
  0x13   : > { %v494_v16 = vld [vmem:[%s2913_s17 + $0x68] sm:$0xff]  ;;  %v491_v21 = vld [vmem:[%s2913_s17 + $0x50] sm:$0xff]  ;;  %v492_v26 = vld [vmem:[%s2913_s17 + $0x58] sm:$0xff] }
  0x14   : > { %v2936_v14 = vadd.f32 %v543_v7, %v527_v6  ;;  %v510_v17 = vld [vmem:[%s2919_s20 + $0x68] sm:$0xff]  ;;  %v2941_v19 = vadd.f32 %v544_v9, %v528_v10  ;;  %v507_v22 = vld [vmem:[%s2919_s20 + $0x50] sm:$0xff]  ;;  %v2947_v24 = vadd.f32 %v541_v13, %v525_v15  ;;  %v508_v27 = vld [vmem:[%s2919_s20 + $0x58] sm:$0xff] }
  0x15   : > { %v542_v18 = vld [vmem:[%s2925_s23 + $0x68] sm:$0xff]  ;;  %v526_v20 = vadd.f32 %v510_v17, %v494_v16  ;;  %v539_v23 = vld [vmem:[%s2925_s23 + $0x50] sm:$0xff]  ;;  %v523_v25 = vadd.f32 %v507_v22, %v491_v21  ;;  %v540_v28 = vld [vmem:[%s2925_s23 + $0x58] sm:$0xff]  ;;  %v524_v30 = vadd.f32 %v508_v27, %v492_v26 }
  0x16   : > { %4648 = vst [vmem:[#allocation2_spill] sm:$0xff] %v2936_v14  ;;  %650 = vmatpush.msra.mxu0 %v2936_v14  ;;  %691 = vmatpush.msra.mxu1 %v2941_v19  ;;  %v489_v31 = vld [vmem:[%s2913_s17 + $0x40] sm:$0xff]  ;;  %v490_v36 = vld [vmem:[%s2913_s17 + $0x48] sm:$0xff]  ;;  %v487_v41 = vld [vmem:[%s2913_s17 + $0x30] sm:$0xff] }
  0x17   : > { %4649 = vst [vmem:[#allocation3_spill] sm:$0xff] %v2941_v19  ;;  %v2953_v29 = vadd.f32 %v542_v18, %v526_v20  ;;  %v505_v32 = vld [vmem:[%s2919_s20 + $0x40] sm:$0xff]  ;;  %v2959_v34 = vadd.f32 %v539_v23, %v523_v25  ;;  %v506_v37 = vld [vmem:[%s2919_s20 + $0x48] sm:$0xff]  ;;  %v2965_v39 = vadd.f32 %v540_v28, %v524_v30  ;;  %v503_v42 = vld [vmem:[%s2919_s20 + $0x30] sm:$0xff] }
  0x18   : > { %4650 = vst [vmem:[#allocation4_spill] sm:$0xff] %v2947_v24  ;;  %v537_v33 = vld [vmem:[%s2925_s23 + $0x40] sm:$0xff]  ;;  %651 = vmatpush.msra.mxu0 %v2947_v24  ;;  %v521_v35 = vadd.f32 %v505_v32, %v489_v31  ;;  %v538_v38 = vld [vmem:[%s2925_s23 + $0x48] sm:$0xff]  ;;  %v522_v40 = vadd.f32 %v506_v37, %v490_v36  ;;  %v535_v43 = vld [vmem:[%s2925_s23 + $0x30] sm:$0xff]  ;;  %v519_v45 = vadd.f32 %v503_v42, %v487_v41 }
  0x19   : > { %4651 = vst [vmem:[#allocation5_spill] sm:$0xff] %v2953_v29  ;;  %692 = vmatpush.msra.mxu1 %v2953_v29  ;;  %v488_v46 = vld [vmem:[%s2913_s17 + $0x38] sm:$0xff]  ;;  %v485_v51 = vld [vmem:[%s2913_s17 + $0x20] sm:$0xff]  ;;  %v486_v56 = vld [vmem:[%s2913_s17 + $0x28] sm:$0xff] }
  0x1a   : > { %4652 = vst [vmem:[#allocation6_spill] sm:$0xff] %v2959_v34  ;;  %652 = vmatpush.msra.mxu0 %v2959_v34  ;;  %v2971_v44 = vadd.f32 %v537_v33, %v521_v35  ;;  %v504_v47 = vld [vmem:[%s2919_s20 + $0x38] sm:$0xff]  ;;  %v2977_v49 = vadd.f32 %v538_v38, %v522_v40  ;;  %v501_v52 = vld [vmem:[%s2919_s20 + $0x20] sm:$0xff]  ;;  %v2983_v54 = vadd.f32 %v535_v43, %v519_v45  ;;  %v502_v57 = vld [vmem:[%s2919_s20 + $0x28] sm:$0xff] }
  0x1b   : > { %4653 = vst [vmem:[#allocation7_spill] sm:$0xff] %v2965_v39  ;;  %v536_v48 = vld [vmem:[%s2925_s23 + $0x38] sm:$0xff]  ;;  %693 = vmatpush.msra.mxu1 %v2965_v39  ;;  %v520_v50 = vadd.f32 %v504_v47, %v488_v46  ;;  %v533_v53 = vld [vmem:[%s2925_s23 + $0x20] sm:$0xff]  ;;  %v517_v55 = vadd.f32 %v501_v52, %v485_v51  ;;  %v534_v58 = vld [vmem:[%s2925_s23 + $0x28] sm:$0xff]  ;;  %v518_v60 = vadd.f32 %v502_v57, %v486_v56 }
  0x1c   : > { %653 = vmatpush.msra.mxu0 %v2971_v44  ;;  %4654 = vst [vmem:[#allocation8_spill] sm:$0xff] %v2983_v54  ;;  %v483_v61 = vld [vmem:[%s2913_s17 + $0x10] sm:$0xff]  ;;  %v484_v2 = vld [vmem:[%s2913_s17 + $0x18] sm:$0xff]  ;;  %v481_v7 = vld [vmem:[%s2913_s17] sm:$0xff] }
  0x1d   : > { %694 = vmatpush.msra.mxu1 %v2977_v49  ;;  %v2989_v59 = vadd.f32 %v536_v48, %v520_v50  ;;  %v499_v62 = vld [vmem:[%s2919_s20 + $0x10] sm:$0xff]  ;;  %v2995_v0 = vadd.f32 %v533_v53, %v517_v55  ;;  %v500_v3 = vld [vmem:[%s2919_s20 + $0x18] sm:$0xff]  ;;  %v3001_v5 = vadd.f32 %v534_v58, %v518_v60  ;;  %v497_v8 = vld [vmem:[%s2919_s20] sm:$0xff] }
  0x1e   : > { %v531_v63 = vld [vmem:[%s2925_s23 + $0x10] sm:$0xff]  ;;  %654 = vmatpush.msra.mxu0 %v2983_v54  ;;  %v515_v1 = vadd.f32 %v499_v62, %v483_v61  ;;  %v532_v4 = vld [vmem:[%s2925_s23 + $0x18] sm:$0xff]  ;;  %v516_v6 = vadd.f32 %v500_v3, %v484_v2  ;;  %v529_v9 = vld [vmem:[%s2925_s23] sm:$0xff]  ;;  %v513_v11 = vadd.f32 %v497_v8, %v481_v7 }
  0x1f   : > { %4655 = vst [vmem:[#allocation9_spill] sm:$0xff] %v2989_v59  ;;  %695 = vmatpush.msra.mxu1 %v2989_v59  ;;  %v482_v12 = vld [vmem:[%s2913_s17 + $0x8] sm:$0xff]  ;;  %v572_v18 = vld [vmem:[%s4595_s4 + $0x18] sm:$0xff]  ;;  %v561_v22 = vld [vmem:[%s4594_s3] sm:$0xff] }
  0x20   : > { %4656 = vst [vmem:[#allocation10_spill] sm:$0xff] %v2995_v0  ;;  %655 = vmatpush.msra.mxu0 %v2995_v0  ;;  %v3007_v10 = vadd.f32 %v531_v63, %v515_v1  ;;  %v498_v13 = vld [vmem:[%s2919_s20 + $0x8] sm:$0xff]  ;;  %v3013_v16 = vadd.f32 %v532_v4, %v516_v6  ;;  %v3022_v21 = vadd.f32 %v529_v9, %v513_v11  ;;  %v576_v25 = vld [vmem:[%s4595_s4 + $0x38] sm:$0xff]  ;;  %v563_v27 = vld [vmem:[%s4594_s3 + $0x10] sm:$0xff] }
  0x21   : > { %4657 = vst [vmem:[#allocation11_spill] sm:$0xff] %v3001_v5  ;;  %v530_v15 = vld [vmem:[%s2925_s23 + $0x8] sm:$0xff]  ;;  %696 = vmatpush.msra.mxu1 %v3001_v5  ;;  %v514_v17 = vadd.f32 %v498_v13, %v482_v12  ;;  %594 = vperm.xlu1 %2648, %v572_v18   ;;  %v564_v28 = vld [vmem:[%s4594_s3 + $0x18] sm:$0xff]  ;;  %v573_v30 = vld [vmem:[%s4595_s4 + $0x20] sm:$0xff] }
  0x22   : > { %4658 = vst [vmem:[#allocation12_spill] sm:$0xff] %v3007_v10  ;;  %v570_v20 = vld [vmem:[%s4595_s4 + $0x8] sm:$0xff]  ;;  %656 = vmatpush.msra.mxu0 %v3007_v10  ;;  %v575_v31 = vld [vmem:[%s4595_s4 + $0x30] sm:$0xff]  ;;  %599 = vperm.xlu2 %2649, %v573_v30   ;;  %v565_v32 = vld [vmem:[%s4594_s3 + $0x20] sm:$0xff] }
  0x23   : > { %4659 = vst [vmem:[#allocation13_spill] sm:$0xff] %v3013_v16  ;;  %697 = vmatpush.msra.mxu1 %v3013_v16  ;;  %v3028_v23 = vadd.f32 %v530_v15, %v514_v17  ;;  %584 = vperm.xlu0 %2647, %v570_v20   ;;  %v562_v26 = vld [vmem:[%s4594_s3 + $0x8] sm:$0xff]  ;;  %v567_v36 = vld [vmem:[%s4594_s3 + $0x30] sm:$0xff]  ;;  %v568_v37 = vld [vmem:[%s4594_s3 + $0x38] sm:$0xff]  ;;  %v2660_v16 = vpack.i.bf16 %v2941_v19, %v2936_v14 }
  0x24   : > { %4660 = vst [vmem:[#allocation14_spill] sm:$0xff] %v3022_v21  ;;  %657 = vmatpush.msra.mxu0 %v3022_v21  ;;  %v574_v33 = vld [vmem:[%s4595_s4 + $0x28] sm:$0xff] }
  0x25   : > { %4661 = vst [vmem:[#allocation15_spill] sm:$0xff] %v3028_v23  ;;  %698 = vmatpush.msra.mxu1 %v3028_v23  ;;  %2380 = vmatmul.msk.f32.vlgmr.msra.gmra.mxu0 %vm617_vm0, %v561_v22  ;;  %v566_v35 = vld [vmem:[%s4594_s3 + $0x28] sm:$0xff] }
  0x26   : > { %2388 = vmatmul.msk.f32.vlgmr.msra.gmra.mxu1 %vm617_vm0, %v561_v22 }
  0x29   : > { %614 = vperm.xlu1 %2648, %v576_v25  }
  0x2a   : > { %604 = vperm.xlu2 %2649, %v574_v33  }
  0x2b   : > { %609 = vperm.xlu0 %2647, %v575_v31  }
  0x2d   : > { %2381 = vmatmul.msk.f32.gmra.mxu0 %vm617_vm0, %v562_v26 }
  0x2e   : > { %2389 = vmatmul.msk.f32.gmra.mxu1 %vm617_vm0, %v562_v26 }
  0x35   : > { %2382 = vmatmul.msk.f32.gmra.mxu0 %vm617_vm0, %v563_v27 }
  0x36   : > { %2390 = vmatmul.msk.f32.gmra.mxu1 %vm617_vm0, %v563_v27 }
  0x3d   : > { %2383 = vmatmul.msk.f32.gmra.mxu0 %vm617_vm0, %v564_v28 }
  0x3e   : > { %2391 = vmatmul.msk.f32.gmra.mxu1 %vm617_vm0, %v564_v28 }
  0x45   : > { %2384 = vmatmul.msk.f32.gmra.mxu0 %vm617_vm0, %v565_v32 }
  0x46   : > { %2392 = vmatmul.msk.f32.gmra.mxu1 %vm617_vm0, %v565_v32 }
  0x4d   : > { %2385 = vmatmul.msk.f32.gmra.mxu0 %vm617_vm0, %v566_v35 }
  0x4e   : > { %2393 = vmatmul.msk.f32.gmra.mxu1 %vm617_vm0, %v566_v35 }
  0x55   : > { %2386 = vmatmul.msk.f32.gmra.mxu0 %vm617_vm0, %v567_v36 }
  0x56   : > { %2394 = vmatmul.msk.f32.gmra.mxu1 %vm617_vm0, %v567_v36 }
  0x5d   : > { %2387 = vmatmul.msk.f32.gmra.mxu0 %vm617_vm0, %v568_v37 }
  0x5e   : > { %2395 = vmatmul.msk.f32.gmra.mxu1 %vm617_vm0, %v568_v37 }
  0x7c   : > { %v600_v9 = vpop.permute.xlu2 %599 }
  0x7f   : > { %v580_v38 = vpop.permute.xlu0 %579  ;;  %v590_v56 = vpop.permute.xlu1 %589 }
  0x84   : > { %v605_v20 = vpop.permute.xlu2 %604 }
  0x93   : > { %v595_v3 = vpop.permute.xlu1 %594 }
  0x95   : > { %v585_v47 = vpop.permute.xlu0 %584 }
  0x9d   : > { %v610_v32 = vpop.permute.xlu0 %609 }
  0xa2   : > { %v659_v40 = vpop.f32.mrf.mxu0 }
  0xa3   : > { %v660_v41 = vadd.f32 %v659_v40, %v580_v38  ;;  %v700_v42 = vpop.f32.mrf.mxu1  ;;  %v615_v40 = vpop.permute.xlu1 %614 }
  0xa4   : > { %v701_v43 = vadd.f32 %v700_v42, %v580_v38 }
  0xa5   : > { %v724_v45 = vmax.f32 %v660_v41, 0.0 }
  0xa6   : > { %v725_v46 = vmax.f32 %v701_v43, 0.0 }
  0xa7   : > { %2272 = vst [vmem:[%s3085_s24] sm:$0xff] %v724_v45 }
  0xa8   : > { %2273 = vst [vmem:[%s3085_s24 + $0x8] sm:$0xff] %v725_v46 }
  0xaa   : > { %v662_v48 = vpop.f32.mrf.mxu0 }
  0xab   : > { %v663_v50 = vadd.f32 %v662_v48, %v585_v47  ;;  %v703_v51 = vpop.f32.mrf.mxu1 }
  0xac   : > { %v704_v52 = vadd.f32 %v703_v51, %v585_v47 }
  0xad   : > { %v726_v53 = vmax.f32 %v663_v50, 0.0 }
  0xae   : > { %v727_v55 = vmax.f32 %v704_v52, 0.0 }
  0xaf   : > { %2274 = vst [vmem:[%s3085_s24 + $0x10] sm:$0xff] %v726_v53 }
  0xb0   : > { %2275 = vst [vmem:[%s3085_s24 + $0x18] sm:$0xff] %v727_v55 }
  0xb2   : > { %v665_v57 = vpop.f32.mrf.mxu0 }
  0xb3   : > { %v666_v58 = vadd.f32 %v665_v57, %v590_v56  ;;  %v706_v60 = vpop.f32.mrf.mxu1 }
  0xb4   : > { %v707_v61 = vadd.f32 %v706_v60, %v590_v56 }
  0xb5   : > { %v3091_v62 = vmax.f32 %v666_v58, 0.0 }
  0xb6   : > { %v3093_v63 = vmax.f32 %v707_v61, 0.0 }
  0xb7   : > { %748 = vrot.lane.b32.xlu2 %v3091_v62, %s2819_s14 }
  0xb8   : > { %980 = vrot.lane.b32.xlu1 %v3093_v63, %s2820_s26  ;;  %750 = vrot.lane.b32.xlu0 %v3093_v63, %s2819_s14 }
  0xba   : > { %v668_v2 = vpop.f32.mrf.mxu0 }
  0xbb   : > { %v709_v1 = vpop.f32.mrf.mxu1  ;;  %v669_v6 = vadd.f32 %v668_v2, %v595_v3 }
  0xbc   : > { %v710_v4 = vadd.f32 %v709_v1, %v595_v3 }
  0xbd   : > { %v3109_v8 = vmax.f32 %v669_v6, 0.0 }
  0xbe   : > { %v3107_v7 = vmax.f32 %v710_v4, 0.0 }
  0xbf   : > { %898 = vrot.lane.b32.xlu2 %v3091_v62, %s2821_s27 }
  0xc0   : > { %940 = vrot.lane.b32.xlu1 %v3093_v63, %s2822_s28  ;;  %900 = vrot.lane.b32.xlu0 %v3093_v63, %s2821_s27 }
  0xc2   : > { %v671_v11 = vpop.f32.mrf.mxu0 }
  0xc3   : > { %v672_v12 = vadd.f32 %v671_v11, %v600_v9  ;;  %v712_v15 = vpop.f32.mrf.mxu1 }
  0xc4   : > { %v713_v17 = vadd.f32 %v712_v15, %v600_v9 }
  0xc5   : > { %v3123_v13 = vmax.f32 %v672_v12, 0.0 }
  0xc6   : > { %v3131_v18 = vmax.f32 %v713_v17, 0.0 }
  0xc7   : > { %754 = vrot.lane.b32.xlu2 %v3107_v7, %s2819_s14 }
  0xc8   : > { %752 = vrot.lane.b32.xlu1 %v3109_v8, %s2819_s14  ;;  %978 = vrot.lane.b32.xlu0 %v3091_v62, %s2820_s26 }
  0xca   : > { %v674_v22 = vpop.f32.mrf.mxu0 }
  0xcb   : > { %v715_v25 = vpop.f32.mrf.mxu1  ;;  %v675_v26 = vadd.f32 %v674_v22, %v605_v20 }
  0xcc   : > { %v716_v27 = vadd.f32 %v715_v25, %v605_v20  ;;  %v818_v20 = vlaneseq }
  0xcd   : > { %v3151_v28 = vmax.f32 %v675_v26, 0.0 }
  0xce   : > { %v3153_v30 = vmax.f32 %v716_v27, 0.0 }
  0xcf   : > { %904 = vrot.lane.b32.xlu2 %v3107_v7, %s2821_s27 }
  0xd0   : > { %902 = vrot.lane.b32.xlu1 %v3109_v8, %s2821_s27  ;;  %938 = vrot.lane.b32.xlu0 %v3091_v62, %s2822_s28 }
  0xd2   : > { %v677_v31 = vpop.f32.mrf.mxu0 }
  0xd3   : > { %v718_v33 = vpop.f32.mrf.mxu1  ;;  %v678_v38 = vadd.f32 %v677_v31, %v610_v32  ;;  %v3260_v31 = vand.u32 127, %v818_v20 }
  0xd4   : > { %v719_v35 = vadd.f32 %v718_v33, %v610_v32 }
  0xd5   : > { %v3175_v42 = vmax.f32 %v678_v38, 0.0  ;;  %v4605_v33 = vand.u32 15, %v3260_v31 }
  0xd6   : > { %v3167_v36 = vmax.f32 %v719_v35, 0.0 }
  0xd7   : > { %984 = vrot.lane.b32.xlu2 %v3107_v7, %s2820_s26  ;;  %4663 = vst [vmem:[#allocation17_spill] sm:$0xff] %v3175_v42  ;;  %vm3273_vm3 = vcmp.lt.s32.totalorder %v4605_v33, 1 }
  0xd8   : > { %982 = vrot.lane.b32.xlu1 %v3109_v8, %s2820_s26  ;;  %756 = vrot.lane.b32.xlu0 %v3123_v13, %s2819_s14  ;;  %4662 = vst [vmem:[#allocation16_spill] sm:$0xff] %v3167_v36  ;;  %vm3279_vm4 = vmneg %vm3273_vm3 }
  0xda   : > { %v680_v37 = vpop.f32.mrf.mxu0 }
  0xdb   : > { %v681_v41 = vadd.f32 %v680_v37, %v615_v40  ;;  %v721_v45 = vpop.f32.mrf.mxu1 }
  0xdc   : > { %v722_v46 = vadd.f32 %v721_v45, %v615_v40  ;;  %v4667_v40 = vmov 0 }
  0xdd   : > { %v3177_v43 = vmax.f32 %v681_v41, 0.0  ;;  %v4668_v40 = vsel %vm3273_vm3, 4294967295, %v4667_v40 }
  0xde   : > { %v3187_v48 = vmax.f32 %v722_v46, 0.0  ;;  %4669 = vst [vmem:[#allocation21_spill] sm:$0xff] %v4668_v40 }
  0xdf   : > { %944 = vrot.lane.b32.xlu2 %v3107_v7, %s2822_s28  ;;  %4664 = vst [vmem:[#allocation18_spill] sm:$0xff] %v3177_v43 }
  0xe0   : > { %942 = vrot.lane.b32.xlu1 %v3109_v8, %s2822_s28  ;;  %988 = vrot.lane.b32.xlu0 %v3131_v18, %s2820_s26  ;;  %4665 = vst [vmem:[#allocation19_spill] sm:$0xff] %v3187_v48 }
  0xe7   : > { %986 = vrot.lane.b32.xlu2 %v3123_v13, %s2820_s26 }
  0xe8   : > { %758 = vrot.lane.b32.xlu1 %v3131_v18, %s2819_s14  ;;  %906 = vrot.lane.b32.xlu0 %v3123_v13, %s2821_s27 }
  0xef   : > { %946 = vrot.lane.b32.xlu2 %v3123_v13, %s2822_s28 }
  0xf0   : > { %908 = vrot.lane.b32.xlu1 %v3131_v18, %s2821_s27  ;;  %948 = vrot.lane.b32.xlu0 %v3131_v18, %s2822_s28 }
  0xf7   : > { %760 = vrot.lane.b32.xlu2 %v3151_v28, %s2819_s14 }
  0xf8   : > { %992 = vrot.lane.b32.xlu1 %v3153_v30, %s2820_s26  ;;  %762 = vrot.lane.b32.xlu0 %v3153_v30, %s2819_s14 }
  0xff   : > { %910 = vrot.lane.b32.xlu2 %v3151_v28, %s2821_s27 }
 0x100   : > { %912 = vrot.lane.b32.xlu1 %v3153_v30, %s2821_s27  ;;  %990 = vrot.lane.b32.xlu0 %v3151_v28, %s2820_s26 }
 0x107   : > { %950 = vrot.lane.b32.xlu2 %v3151_v28, %s2822_s28 }
 0x108   : > { %1366 = vrot.lane.b32.xlu1 %v3167_v36, %s2820_s26  ;;  %952 = vrot.lane.b32.xlu0 %v3153_v30, %s2822_s28 }
 0x10f   : > { %1266 = vrot.lane.b32.xlu2 %v3175_v42, %s2819_s14 }
 0x110   : > { %1368 = vrot.lane.b32.xlu1 %v3177_v43, %s2820_s26  ;;  %1364 = vrot.lane.b32.xlu0 %v3175_v42, %s2820_s26 }
 0x111   : > { %v3185_v47 = vpop.permute.xlu2 %748 }
 0x112   : > { %v777_v50 = vsel %vm764_vm1, 0.0, %v3185_v47 }
 0x117   : > { %1370 = vrot.lane.b32.xlu2 %v3187_v48, %s2820_s26 }
 0x118   : > { %1268 = vrot.lane.b32.xlu0 %v3167_v36, %s2819_s14  ;;  %785 = vrot.lane.b32.xlu1 %v777_v50, %s2821_s27 }
 0x119   : > { %v3196_v51 = vpop.permute.xlu2 %898 }
 0x11f   : > { %1270 = vrot.lane.b32.xlu2 %v3177_v43, %s2819_s14 }
 0x120   : > { %1272 = vrot.lane.b32.xlu0 %v3187_v48, %s2819_s14 }
 0x121   : > { %v755_v52 = vpop.permute.xlu2 %754 }
 0x128   : > { %855 = vrot.lane.b32.xlu0 %v777_v50, %s2822_s28 }
 0x129   : > { %v3203_v53 = vpop.permute.xlu2 %904 }
 0x12a   : > { %v3205_v55 = vpop.permute.xlu1 %980  ;;  %v751_v56 = vpop.permute.xlu0 %750 }
 0x12b   : > { %v3209_v57 = vsel %vm764_vm1, %v3185_v47, %v751_v56  ;;  %v3242_v15 = vsel %vm994_vm2, %v3205_v55, 0.0 }
 0x12c   : > { %4666 = vst [vmem:[#allocation20_spill] sm:$0xff] %v3209_v57  ;;  %857 = vrot.lane.b32.xlu1 %v3209_v57, %s2822_s28  ;;  %787 = vrot.lane.b32.xlu2 %v3209_v57, %s2821_s27 }
 0x131   : > { %v3215_v58 = vpop.permute.xlu2 %984 }
 0x132   : > { %v3217_v60 = vpop.permute.xlu1 %940  ;;  %v3219_v61 = vpop.permute.xlu0 %900 }
 0x139   : > { %v3221_v1 = vpop.permute.xlu2 %944 }
 0x13a   : > { %v3223_v2 = vpop.permute.xlu1 %752  ;;  %v979_v3 = vpop.permute.xlu0 %978 }
 0x13b   : > { %v3227_v4 = vsel %vm994_vm2, %v979_v3, %v3205_v55  ;;  %v778_v6 = vsel %vm764_vm1, 0.0, %v3223_v2  ;;  %v3251_v26 = vsel %vm764_vm1, %v3223_v2, %v755_v52  ;;  %v1008_v3 = vsel %vm994_vm2, %v3215_v58, 0.0 }
 0x13c   : > { %1055 = vrot.lane.b32.xlu0 %v3227_v4, %s2822_s28  ;;  %1015 = vrot.lane.b32.xlu1 %v3227_v4, %s2821_s27 }
 0x13d   : > { %859 = vrot.lane.b32.xlu2 %v778_v6, %s2822_s28 }
 0x141   : > { %v987_v9 = vpop.permute.xlu2 %986 }
 0x142   : > { %v3236_v11 = vpop.permute.xlu1 %902  ;;  %v3238_v12 = vpop.permute.xlu0 %938 }
 0x143   : > { %v927_v20 = vsel %vm801_vm5, 0.0, %v3236_v11 }
 0x144   : > { %789 = vrot.lane.b32.xlu0 %v778_v6, %s2821_s27  ;;  %1057 = vrot.lane.b32.xlu1 %v3242_v15, %s2822_s28 }
 0x149   : > { %v947_v17 = vpop.permute.xlu2 %946 }
 0x14a   : > { %v983_v22 = vpop.permute.xlu1 %982  ;;  %v3247_v25 = vpop.permute.xlu0 %756 }
 0x14b   : > { %v779_v27 = vsel %vm764_vm1, 0.0, %v3247_v25  ;;  %v996_v38 = vsel %vm994_vm2, %v983_v22, %v3215_v58  ;;  %v926_v22 = vsel %vm801_vm5, 0.0, %v3196_v51 }
 0x14c   : > { %861 = vrot.lane.b32.xlu0 %v3251_v26, %s2822_s28  ;;  %791 = vrot.lane.b32.xlu1 %v3251_v26, %s2821_s27 }
 0x14d   : > { %793 = vrot.lane.b32.xlu2 %v779_v27, %s2821_s27 }
 0x151   : > { %v3262_v32 = vpop.permute.xlu2 %760 }
 0x152   : > { %v3265_v35 = vpop.permute.xlu1 %942  ;;  %v989_v37 = vpop.permute.xlu0 %988 }
 0x153   : > { %v997_v40 = vsel %vm994_vm2, %v987_v9, %v989_v37 }
 0x154   : > { %1059 = vrot.lane.b32.xlu0 %v996_v38, %s2822_s28  ;;  %1019 = vrot.lane.b32.xlu1 %v996_v38, %s2821_s27 }
 0x159   : > { %v911_v45 = vpop.permute.xlu2 %910 }
 0x15a   : > { %v759_v46 = vpop.permute.xlu1 %758  ;;  %v3283_v50 = vpop.permute.xlu0 %906  ;;  %v929_v52 = vsel %vm801_vm5, 0.0, %v911_v45 }
 0x15b   : > { %v3288_v56 = vsel %vm764_vm1, %v3247_v25, %v759_v46  ;;  %2397 = vmatpush.msk.msra.mxu2 %vm3279_vm4, %v929_v52  ;;  %v928_v6 = vsel %vm801_vm5, 0.0, %v3283_v50 }
 0x15c   : > { %865 = vrot.lane.b32.xlu2 %v3288_v56, %s2822_s28  ;;  %1021 = vrot.lane.b32.xlu0 %v1008_v3, %s2821_s27 }
 0x15d   : > { %1061 = vrot.lane.b32.xlu1 %v1008_v3, %s2822_s28  ;;  %2399 = vmatpush.msk.msra.mxu2 %vm3279_vm4, %v928_v6  ;;  %v1009_v6 = vsel %vm994_vm2, %v989_v37, 0.0 }
 0x15f   : > { %2401 = vmatpush.msk.msra.mxu2 %vm3279_vm4, %v927_v20 }
 0x161   : > { %2403 = vmatpush.msk.msra.mxu2 %vm3279_vm4, %v926_v22  ;;  %v951_v3 = vpop.permute.xlu2 %950 }
 0x162   : > { %v3310_v46 = vpop.permute.xlu1 %908  ;;  %v3312_v52 = vpop.permute.xlu0 %948 }
 0x163   : > { %v3317_v33 = vsel %vm871_vm6, %v947_v17, %v3312_v52 }
 0x164   : > { %1065 = vrot.lane.b32.xlu2 %v1009_v6, %s2822_s28  ;;  %795 = vrot.lane.b32.xlu0 %v3288_v56, %s2821_s27 }
 0x165   : > { %863 = vrot.lane.b32.xlu1 %v779_v27, %s2822_s28 }
 0x169   : > { %v3327_v23 = vpop.permute.xlu2 %1266 }
 0x16a   : > { %v993_v20 = vpop.permute.xlu1 %992  ;;  %v763_v22 = vpop.permute.xlu0 %762  ;;  %4672 = vst [vmem:[#allocation22_spill] sm:$0xff] %v3327_v23 }
 0x16b   : > { %2478 = vmatpush.msk.msrb.mxu0 %vm994_vm2, %v993_v20 }
 0x16c   : > { %1025 = vrot.lane.b32.xlu2 %v1009_v6, %s2821_s27  ;;  %1023 = vrot.lane.b32.xlu0 %v997_v40, %s2821_s27  ;;  %v780_v6 = vsel %vm764_vm1, 0.0, %v3262_v32 }
 0x16d   : > { %1063 = vrot.lane.b32.xlu1 %v997_v40, %s2822_s28  ;;  %2479 = vmatpush.msk.msrb.mxu0 %vm994_vm2, %v989_v37  ;;  %v3344_v37 = vsel %vm764_vm1, %v3262_v32, %v763_v22 }
 0x16f   : > { %2480 = vmatpush.msk.msrb.mxu0 %vm994_vm2, %v3215_v58 }
 0x171   : > { %2481 = vmatpush.msk.msrb.mxu0 %vm994_vm2, %v3205_v55  ;;  %v3349_v55 = vpop.permute.xlu2 %1370 }
 0x172   : > { %v913_v17 = vpop.permute.xlu1 %912  ;;  %v991_v27 = vpop.permute.xlu0 %990  ;;  %4673 = vst [vmem:[#allocation23_spill] sm:$0xff] %v3349_v55 }
 0x173   : > { %v998_v9 = vsel %vm994_vm2, %v991_v27, %v993_v20  ;;  %v3339_v21 = vsel %vm801_vm5, %v911_v45, %v913_v17 }
 0x174   : > { %1143 = vmatpush.msra.mxu3 %v998_v9  ;;  %867 = vrot.lane.b32.xlu0 %v780_v6, %s2822_s28 }
 0x175   : > { %797 = vrot.lane.b32.xlu1 %v780_v6, %s2821_s27  ;;  %799 = vrot.lane.b32.xlu2 %v3344_v37, %s2821_s27 }
 0x176   : > { %1144 = vmatpush.msra.mxu3 %v997_v40 }
 0x178   : > { %1145 = vmatpush.msra.mxu3 %v996_v38 }
 0x179   : > { %v3366_v38 = vpop.permute.xlu2 %1270 }
 0x17a   : > { %v3351_v58 = vpop.permute.xlu1 %1366  ;;  %v3353_v45 = vpop.permute.xlu0 %952  ;;  %1146 = vmatpush.msra.mxu3 %v3227_v4  ;;  %4675 = vst [vmem:[#allocation25_spill] sm:$0xff] %v3366_v38 }
 0x17b   : > { %4674 = vst [vmem:[#allocation24_spill] sm:$0xff] %v3351_v58  ;;  %v3358_v17 = vsel %vm871_vm6, %v951_v3, %v3353_v45 }
 0x17c   : > { %1017 = vrot.lane.b32.xlu0 %v3242_v15, %s2821_s27 }
 0x17d   : > { %869 = vrot.lane.b32.xlu1 %v3344_v37, %s2822_s28  ;;  %1348 = vrot.lane.b32.xlu2 %v3177_v43, %s2822_s28 }
 0x182   : > { %v1369_v40 = vpop.permute.xlu1 %1368  ;;  %v1365_v22 = vpop.permute.xlu0 %1364 }
 0x183   : > { %v1373_v4 = vsel %vm994_vm2, %v1369_v40, %v3349_v55  ;;  %v1372_v3 = vsel %vm994_vm2, %v1365_v22, %v3351_v58  ;;  %v1010_v22 = vsel %vm994_vm2, %v993_v20, 0.0 }
 0x184   : > { %1350 = vrot.lane.b32.xlu0 %v3187_v48, %s2822_s28  ;;  %1444 = vmatpush.msrb.mxu1 %v1373_v4 }
 0x185   : > { %1346 = vrot.lane.b32.xlu1 %v3167_v36, %s2822_s28  ;;  %1344 = vrot.lane.b32.xlu2 %v3175_v42, %s2822_s28 }
 0x186   : > { %1445 = vmatpush.msrb.mxu1 %v1372_v3  ;;  %v788_v15 = vpop.permute.xlu2 %787 }
 0x18a   : > { %v1269_v27 = vpop.permute.xlu0 %1268  ;;  %v3378_v6 = vpop.permute.xlu1 %785 }
 0x18b   : > { %v3382_v40 = vsel %vm801_vm5, %v3378_v6, %v788_v15  ;;  %v3406_v54 = vsel %vm764_vm1, %v3327_v23, %v1269_v27  ;;  %v1280_v27 = vsel %vm764_vm1, 0.0, %v3327_v23 }
 0x18c   : > { %4676 = vst [vmem:[#allocation26_spill] sm:$0xff] %v3382_v40  ;;  %1328 = vrot.lane.b32.xlu0 %v3177_v43, %s2821_s27 }
 0x18d   : > { %1330 = vrot.lane.b32.xlu1 %v3187_v48, %s2821_s27  ;;  %1027 = vrot.lane.b32.xlu2 %v998_v9, %s2821_s27  ;;  %4677 = vst [vmem:[#allocation27_spill] sm:$0xff] %v3406_v54 }
 0x192   : > { %v1273_v59 = vpop.permute.xlu0 %1272 }
 0x193   : > { %v3430_v43 = vsel %vm764_vm1, %v3366_v38, %v1273_v59 }
 0x194   : > { %1069 = vrot.lane.b32.xlu0 %v1010_v22, %s2822_s28  ;;  %4678 = vst [vmem:[#allocation28_spill] sm:$0xff] %v3430_v43 }
 0x195   : > { %1326 = vrot.lane.b32.xlu1 %v3167_v36, %s2821_s27  ;;  %1067 = vrot.lane.b32.xlu2 %v998_v9, %s2822_s28  ;;  %v1378_v9 = vsel %vm994_vm2, %v3351_v58, 0.0 }
 0x197   : > { %v3412_v36 = vpop.permute.xlu2 %859 }
 0x19a   : > { %v856_v15 = vpop.permute.xlu0 %855 }
 0x19c   : > { %1324 = vrot.lane.b32.xlu0 %v3175_v42, %s2821_s27 }
 0x19d   : > { %1382 = vrot.lane.b32.xlu1 %v1372_v3, %s2821_s27  ;;  %1029 = vrot.lane.b32.xlu2 %v1010_v22, %s2821_s27  ;;  %v1379_v22 = vsel %vm994_vm2, %v3349_v55, 0.0 }
 0x19e   : > { %v3398_v48 = vpop.permute.xlu1 %857 }
 0x19f   : > { %v3402_v20 = vsel %vm871_vm6, %v856_v15, %v3398_v48 }
 0x1a4   : > { %1306 = vrot.lane.b32.xlu0 %v3406_v54, %s2822_s28 }
 0x1a5   : > { %1384 = vrot.lane.b32.xlu2 %v1378_v9, %s2821_s27  ;;  %1386 = vrot.lane.b32.xlu1 %v1373_v4, %s2821_s27 }
 0x1a7   : > { %v3424_v15 = vpop.permute.xlu2 %793 }
 0x1ac   : > { %1286 = vrot.lane.b32.xlu0 %v3406_v54, %s2821_s27  ;;  %v1281_v54 = vsel %vm764_vm1, 0.0, %v3366_v38 }
 0x1ad   : > { %1388 = vrot.lane.b32.xlu2 %v1379_v22, %s2821_s27  ;;  %1304 = vrot.lane.b32.xlu1 %v1280_v27, %s2822_s28 }
 0x1ae   : > { %v1056_v42 = vpop.permute.xlu0 %1055  ;;  %v3426_v58 = vpop.permute.xlu1 %1015 }
 0x1b4   : > { %1290 = vrot.lane.b32.xlu0 %v3430_v43, %s2821_s27 }
 0x1b5   : > { %1284 = vrot.lane.b32.xlu2 %v1280_v27, %s2821_s27  ;;  %1308 = vrot.lane.b32.xlu1 %v1281_v54, %s2822_s28 }
 0x1b6   : > { %v3438_v23 = vpop.permute.xlu0 %789  ;;  %v3440_v55 = vpop.permute.xlu1 %1057 }
 0x1b7   : > { %4679 = vst [vmem:[#allocation29_spill] sm:$0xff] %v3440_v55  ;;  %v3442_v40 = vpop.permute.xlu2 %865  ;;  %v3446_v59 = vsel %vm871_vm6, %v1056_v42, %v3440_v55  ;;  %v1102_v42 = vld [vmem:[%s4599_s8 + $0x8] sm:$0xff] }
 0x1bc   : > { %1402 = vrot.lane.b32.xlu0 %v1372_v3, %s2822_s28 }
 0x1bd   : > { %1406 = vrot.lane.b32.xlu1 %v1373_v4, %s2822_s28  ;;  %1310 = vrot.lane.b32.xlu2 %v3430_v43, %s2822_s28 }
 0x1be   : > { %v3452_v27 = vpop.permute.xlu0 %861  ;;  %v792_v38 = vpop.permute.xlu1 %791 }
 0x1bf   : > { %v3454_v5 = vpop.permute.xlu2 %1065  ;;  %v3458_v0 = vsel %vm801_vm5, %v3438_v23, %v792_v38  ;;  %v1426_v38 = vld [vmem:[%s4601_s10] sm:$0xff] }
 0x1c0   : > { %4680 = vst [vmem:[#allocation30_spill] sm:$0xff] %v3458_v0  ;;  %v1101_v0 = vld [vmem:[%s4599_s8] sm:$0xff] }
 0x1c4   : > { %1110 = vperm.xlu0 %2647, %v1102_v42  }
 0x1c5   : > { %1404 = vrot.lane.b32.xlu1 %v1378_v9, %s2822_s28  ;;  %1288 = vrot.lane.b32.xlu2 %v1281_v54, %s2821_s27 }
 0x1c6   : > { %v3465_v4 = vpop.permute.xlu0 %1059  ;;  %v3467_v3 = vpop.permute.xlu1 %1019 }
 0x1c7   : > { %v3469_v43 = vpop.permute.xlu2 %1025 }
 0x1cc   : > { %2661 = vrot.lane.b32.xlu0 %v2660_v16, %s2821_s27 }
 0x1cd   : > { %1430 = vperm.xlu1 %2648, %v1426_v38   ;;  %1408 = vrot.lane.b32.xlu2 %v1379_v22, %s2822_s28  ;;  %v2665_v38 = vpack.i.bf16 %v2965_v39, %v2959_v34 }
 0x1ce   : > { %v3478_v9 = vpop.permute.xlu0 %1021 }
 0x1cf   : > { %v3480_v54 = vpop.permute.xlu1 %1061  ;;  %v3482_v42 = vpop.permute.xlu2 %799 }
 0x1d0   : > { %4681 = vst [vmem:[#allocation31_spill] sm:$0xff] %v3482_v42  ;;  %v1427_v42 = vld [vmem:[%s4601_s10 + $0x8] sm:$0xff] }
 0x1d5   : > { %2651 = vrot.lane.b32.xlu1 %v2660_v16, %s2822_s28  ;;  %1105 = vperm.xlu2 %2649, %v1101_v0  }
 0x1d6   : > { %v796_v14 = vpop.permute.xlu0 %795 }
 0x1d7   : > { %v864_v19 = vpop.permute.xlu1 %863  ;;  %v3488_v10 = vpop.permute.xlu2 %1348  ;;  %v3492_v22 = vsel %vm801_vm5, %v3424_v15, %v796_v14 }
 0x1d8   : > { %4682 = vst [vmem:[#allocation32_spill] sm:$0xff] %v3488_v10  ;;  %v2655_v10 = vpack.i.bf16 %v2953_v29, %v2947_v24  ;;  %v4685_v29 = vand.u32 15, %v3260_v31  ;;  %v1044_v24 = vsel %vm801_vm5, 0.0, %v3467_v3 }
 0x1d9   : > { %4683 = vst [vmem:[#allocation33_spill] sm:$0xff] %v3492_v22 }
 0x1da   : > { %vm3518_vm7 = vcmp.ge.s32.totalorder %v4685_v29, 15 }
 0x1db   : > { %vm3532_vm8 = vmneg %vm3518_vm7 }
 0x1dd   : > { %2666 = vrot.lane.b32.xlu1 %v2665_v38, %s2822_s28  ;;  %1435 = vperm.xlu2 %2649, %v1427_v42  }
 0x1de   : > { %v1024_v16 = vpop.permute.xlu0 %1023 }
 0x1df   : > { %v3500_v0 = vpop.permute.xlu1 %1063  ;;  %v3502_v57 = vpop.permute.xlu2 %1344  ;;  %v1045_v42 = vsel %vm801_vm5, 0.0, %v1024_v16 }
 0x1e0   : > { %4684 = vst [vmem:[#allocation34_spill] sm:$0xff] %v3502_v57  ;;  %v820_v57 = vadd.s32 128, %v3260_v31 }
 0x1e5   : > { %2681 = vrot.lane.b32.xlu1 %v2665_v38, %s2821_s27  ;;  %2656 = vrot.lane.b32.xlu2 %v2655_v10, %s2822_s28  ;;  %v4686_v38 = vmov 0 }
 0x1e6   : > { %v868_v14 = vpop.permute.xlu0 %867  ;;  %v4687_v38 = vsel %vm3518_vm7, 4294967295, %v4686_v38 }
 0x1e7   : > { %v3508_v34 = vpop.permute.xlu1 %797  ;;  %v1028_v39 = vpop.permute.xlu2 %1027  ;;  %4688 = vst [vmem:[#allocation35_spill] sm:$0xff] %v4687_v38  ;;  %v874_v38 = vsel %vm871_vm6, %v864_v19, %v3442_v40 }
 0x1e8   : > { %v1046_v22 = vsel %vm801_vm5, 0.0, %v1028_v39 }
 0x1e9   : > { %2429 = vmatpush.msk.msra.mxu3 %vm3279_vm4, %v1046_v22 }
 0x1eb   : > { %2431 = vmatpush.msk.msra.mxu3 %vm3279_vm4, %v1045_v42  ;;  %v1043_v42 = vsel %vm801_vm5, 0.0, %v3426_v58 }
 0x1ed   : > { %2433 = vmatpush.msk.msra.mxu3 %vm3279_vm4, %v1044_v24  ;;  %2671 = vrot.lane.b32.xlu2 %v2655_v10, %s2821_s27  ;;  %v832_v10 = vand.u32 15, %v820_v57  ;;  %v873_v57 = vsel %vm871_vm6, %v3412_v36, %v3452_v27  ;;  %v954_v36 = vsel %vm871_vm6, %v3238_v12, %v3217_v60 }
 0x1ee   : > { %v1018_v22 = vpop.permute.xlu0 %1017 }
 0x1ef   : > { %v3536_v55 = vpop.permute.xlu1 %869  ;;  %2435 = vmatpush.msk.msra.mxu3 %vm3279_vm4, %v1043_v42  ;;  %v3540_v31 = vpop.permute.xlu2 %1067  ;;  %vm3562_vm9 = vcmp.lt.s32.totalorder %v832_v10, 1  ;;  %vm3608_vm12 = vcmp.ge.s32.totalorder %v832_v10, 15 }
 0x1f0   : > { %v875_v24 = vsel %vm871_vm6, %v868_v14, %v3536_v55  ;;  %v955_v14 = vsel %vm871_vm6, %v3265_v35, %v3221_v1  ;;  %vm3589_vm11 = vmneg %vm3562_vm9 }
 0x1f1   : > { %2405 = vmatpush.msk.msra.mxu2 %vm3532_vm8, %v875_v24  ;;  %2437 = vmatpush.msk.msra.mxu3 %vm3532_vm8, %v3358_v17  ;;  %vm3640_vm13 = vmneg %vm3608_vm12  ;;  %v4703_v24 = vld [vmem:[#allocation31_spill] sm:$0xff] }
 0x1f2   : > { %v805_v10 = vsel %vm801_vm5, %v3508_v34, %v4703_v24  ;;  %v4724_v24 = vld [vmem:[#allocation22_spill] sm:$0xff] }
 0x1f3   : > { %2407 = vmatpush.msk.msra.mxu2 %vm3532_vm8, %v874_v38  ;;  %2439 = vmatpush.msk.msra.mxu3 %vm3532_vm8, %v3317_v33 }
 0x1f5   : > { %2409 = vmatpush.msk.msra.mxu2 %vm3532_vm8, %v873_v57  ;;  %2441 = vmatpush.msk.msra.mxu3 %vm3532_vm8, %v955_v14  ;;  %v4704_v14 = vld [vmem:[#allocation12_spill] sm:$0xff] }
 0x1f6   : > { %v3570_v19 = vpop.permute.xlu0 %1350 }
 0x1f7   : > { %v3580_v35 = vpop.permute.xlu1 %1346  ;;  %2411 = vmatpush.msk.msra.mxu2 %vm3532_vm8, %v3402_v20  ;;  %2443 = vmatpush.msk.msra.mxu3 %vm3532_vm8, %v954_v36  ;;  %v1030_v38 = vpop.permute.xlu2 %1029  ;;  %v1033_v20 = vsel %vm801_vm5, %v1024_v16, %v3469_v43  ;;  %v3626_v43 = vld [vmem:[%s4598_s7 + $0x8] sm:$0xff]  ;;  %v886_v16 = vsel %vm871_vm6, %v3442_v40, 0.0  ;;  %v3744_v40 = vld [vmem:[%s4598_s7 + $0x18] sm:$0xff] }
 0x1f8   : > { %v1034_v12 = vsel %vm801_vm5, %v1028_v39, %v1030_v38  ;;  %v4705_v36 = vld [vmem:[#allocation13_spill] sm:$0xff] }
 0x1f9   : > { %2413 = vmatpush.msk.msra.mxu2 %vm3576_vm10, %v3262_v32  ;;  %1155 = vmatpush.msra.mxu3 %v3151_v28  ;;  %v2705_v38 = vpack.i.bf16 %v4705_v36, %v4704_v14 }
 0x1fa   : > { %2483 = vmatpush.msk.msrb.mxu0 %vm3589_vm11, %v1034_v12 }
 0x1fb   : > { %2415 = vmatpush.msk.msra.mxu2 %vm3576_vm10, %v3247_v25  ;;  %1156 = vmatpush.msra.mxu3 %v3123_v13  ;;  %v1032_v13 = vsel %vm801_vm5, %v3467_v3, %v3478_v9  ;;  %v1099_v9 = vld [vmem:[%s4598_s7 + $0x20] sm:$0xff] }
 0x1fc   : > { %2485 = vmatpush.msk.msrb.mxu0 %vm3589_vm11, %v1033_v20  ;;  %v4706_v20 = vld [vmem:[#allocation10_spill] sm:$0xff] }
 0x1fd   : > { %2417 = vmatpush.msk.msra.mxu2 %vm3576_vm10, %v3223_v2  ;;  %1157 = vmatpush.msra.mxu3 %v3109_v8  ;;  %v1031_v8 = vsel %vm801_vm5, %v3426_v58, %v1018_v22  ;;  %v916_v58 = vsel %vm801_vm5, %v3283_v50, %v3310_v46  ;;  %v915_v50 = vsel %vm801_vm5, %v3236_v11, %v3203_v53  ;;  %v815_v46 = vsel %vm801_vm5, 0.0, %v3438_v23  ;;  %v3688_v53 = vld [vmem:[%s4598_s7] sm:$0xff] }
 0x1fe   : > { %2487 = vmatpush.msk.msrb.mxu0 %vm3589_vm11, %v1032_v13  ;;  %v3621_v28 = vpop.permute.xlu0 %1328  ;;  %v814_v11 = vsel %vm801_vm5, 0.0, %v3378_v6  ;;  %v887_v6 = vsel %vm871_vm6, %v3536_v55, 0.0  ;;  %v1073_v22 = vsel %vm871_vm6, %v3500_v0, %v3454_v5  ;;  %v885_v55 = vsel %vm871_vm6, %v3452_v27, 0.0  ;;  %v4707_v13 = vld [vmem:[#allocation11_spill] sm:$0xff] }
 0x1ff   : > { %v3628_v25 = vpop.permute.xlu1 %1330  ;;  %2419 = vmatpush.msk.msra.mxu2 %vm3576_vm10, %v3185_v47  ;;  %1158 = vmatpush.msra.mxu3 %v3091_v62  ;;  %v3636_v2 = vpop.permute.xlu2 %1384  ;;  %v817_v62 = vsel %vm801_vm5, 0.0, %v3508_v34  ;;  %v969_v47 = vsel %vm871_vm6, %v3353_v45, 0.0  ;;  %v968_v45 = vsel %vm871_vm6, %v3312_v52, 0.0  ;;  %v914_v52 = vsel %vm801_vm5, %v3196_v51, %v3219_v61  ;;  %v4709_v34 = vld [vmem:[#allocation32_spill] sm:$0xff] }
 0x200   : > { %2489 = vmatpush.msk.msrb.mxu0 %vm3589_vm11, %v1031_v8  ;;  %1159 = vmatmul.f32.vlgmr.msra.gmra.mxu3 %v3626_v43  ;;  %v966_v51 = vsel %vm871_vm6, %v3217_v60, 0.0  ;;  %v2675_v60 = vpack.i.bf16 %v2977_v49, %v2971_v44  ;;  %v4708_v8 = vld [vmem:[#allocation33_spill] sm:$0xff] }
 0x201   : > { %2455 = vmatpush.msk.msrb.mxu3 %vm3589_vm11, %v3339_v21  ;;  %2421 = vmatpush.msk.msra.mxu2 %vm3279_vm4, %v817_v62  ;;  %v816_v21 = vsel %vm801_vm5, 0.0, %v3424_v15  ;;  %v967_v15 = vsel %vm871_vm6, %v3221_v1, 0.0  ;;  %v1353_v62 = vsel %vm871_vm6, %v4709_v34, %v3570_v19 }
 0x202   : > { %2491 = vmatpush.msk.msrb.mxu0 %vm3640_vm13, %v969_v47  ;;  %2676 = vrot.lane.b32.xlu0 %v2675_v60, %s2822_s28  ;;  %v4710_v47 = vld [vmem:[#allocation30_spill] sm:$0xff] }
 0x203   : > { %2457 = vmatpush.msk.msrb.mxu3 %vm3589_vm11, %v916_v58  ;;  %2423 = vmatpush.msk.msra.mxu2 %vm3279_vm4, %v816_v21  ;;  %v1100_v58 = vld [vmem:[%s4598_s7 + $0x28] sm:$0xff] }
 0x204   : > { %2493 = vmatpush.msk.msrb.mxu0 %vm3640_vm13, %v968_v45  ;;  %v4711_v45 = vld [vmem:[#allocation34_spill] sm:$0xff] }
 0x205   : > { %2459 = vmatpush.msk.msrb.mxu3 %vm3589_vm11, %v915_v50  ;;  %2425 = vmatpush.msk.msra.mxu2 %vm3279_vm4, %v815_v46  ;;  %v1352_v50 = vsel %vm871_vm6, %v4711_v45, %v3580_v35  ;;  %v4712_v46 = vld [vmem:[#allocation26_spill] sm:$0xff]  ;;  %v4725_v45 = vld [vmem:[#allocation28_spill] sm:$0xff] }
 0x206   : > { %2495 = vmatpush.msk.msrb.mxu0 %vm3640_vm13, %v967_v15  ;;  %v1070_v23 = vpop.permute.xlu0 %1069 }
 0x207   : > { %2461 = vmatpush.msk.msrb.mxu3 %vm3589_vm11, %v914_v52  ;;  %v3696_v1 = vpop.permute.xlu1 %1326  ;;  %2427 = vmatpush.msk.msra.mxu2 %vm3279_vm4, %v814_v11  ;;  %v3702_v61 = vpop.permute.xlu2 %1388  ;;  %v1074_v3 = vsel %vm871_vm6, %v3540_v31, %v1070_v23  ;;  %v1086_v31 = vsel %vm871_vm6, %v1070_v23, 0.0  ;;  %v4713_v23 = vld [vmem:[#allocation23_spill] sm:$0xff]  ;;  %v4714_v11 = vld [vmem:[#allocation18_spill] sm:$0xff] }
 0x208   : > { %2497 = vmatpush.msk.msrb.mxu0 %vm3640_vm13, %v966_v51  ;;  %1136 = vmatmul.f32.vlgmr.msra.gmra.mxu2 %v3688_v53  ;;  %v4715_v51 = vld [vmem:[#allocation24_spill] sm:$0xff] }
 0x209   : > { %2463 = vmatpush.msk.msrb.mxu3 %vm3640_vm13, %v887_v6  ;;  %2445 = vmatpush.msk.msrb.mxu2 %vm3532_vm8, %v1074_v3  ;;  %v4716_v3 = vld [vmem:[#allocation17_spill] sm:$0xff]  ;;  %v1339_v6 = vsel %vm801_vm5, 0.0, %v3621_v28 }
 0x20a   : > { %1224 = vmatpush.msrb.mxu0 %v3153_v30  ;;  %1162 = vmatmul.f32.gmra.mxu3 %v1099_v9  ;;  %v1072_v30 = vsel %vm871_vm6, %v3465_v4, %v3480_v54 }
 0x20b   : > { %2465 = vmatpush.msk.msrb.mxu3 %vm3640_vm13, %v886_v16  ;;  %2447 = vmatpush.msk.msrb.mxu2 %vm3532_vm8, %v1073_v22 }
 0x20c   : > { %1225 = vmatpush.msrb.mxu0 %v3131_v18  ;;  %v884_v18 = vsel %vm871_vm6, %v3398_v48, 0.0  ;;  %2691 = vrot.lane.b32.xlu0 %v2675_v60, %s2821_s27  ;;  %v4701_v48 = vld [vmem:[#allocation29_spill] sm:$0xff] }
 0x20d   : > { %2467 = vmatpush.msk.msrb.mxu3 %vm3640_vm13, %v885_v55  ;;  %2449 = vmatpush.msk.msrb.mxu2 %vm3532_vm8, %v1072_v30  ;;  %v4717_v55 = vld [vmem:[#allocation8_spill] sm:$0xff]  ;;  %v4718_v30 = vld [vmem:[#allocation9_spill] sm:$0xff] }
 0x20e   : > { %1226 = vmatpush.msrb.mxu0 %v3107_v7  ;;  %v3749_v27 = vpop.permute.xlu0 %1324  ;;  %v1085_v7 = vsel %vm871_vm6, %v3454_v5, 0.0  ;;  %v1097_v5 = vld [vmem:[%s4598_s7 + $0x10] sm:$0xff] }
 0x20f   : > { %2469 = vmatpush.msk.msrb.mxu3 %vm3640_vm13, %v884_v18  ;;  %v1383_v4 = vpop.permute.xlu1 %1382  ;;  %2451 = vmatpush.msk.msrb.mxu2 %vm3532_vm8, %v3446_v59  ;;  %v3756_v0 = vpop.permute.xlu2 %1284  ;;  %v4702_v59 = vld [vmem:[#allocation20_spill] sm:$0xff]  ;;  %v2685_v18 = vpack.i.bf16 %v4718_v30, %v4717_v55 }
 0x210   : > { %1227 = vmatpush.msrb.mxu0 %v3093_v63  ;;  %1139 = vmatmul.f32.gmra.mxu2 %v3744_v40  ;;  %v1084_v63 = vsel %vm871_vm6, %v3480_v54, 0.0  ;;  %v1396_v12 = vsel %vm801_vm5, 0.0, %v1383_v4 }
 0x211   : > { %1197 = vmatpush.msrb.mxu3 %v3344_v37  ;;  %2499 = vmatpush.msk.msra.mxu2 %vm3640_vm13, %v1086_v31  ;;  %v1359_v31 = vsel %vm871_vm6, %v3570_v19, 0.0 }
 0x212   : > { %1228 = vmatmul.f32.vlgmr.msrb.gmra.mxu0 %v3626_v43  ;;  %v2695_v43 = vpack.i.bf16 %v4707_v13, %v4706_v20  ;;  %2686 = vrot.lane.b32.xlu2 %v2685_v18, %s2822_s28 }
 0x213   : > { %1198 = vmatpush.msrb.mxu3 %v3288_v56  ;;  %2501 = vmatpush.msk.msra.mxu2 %vm3640_vm13, %v1085_v7  ;;  %v1083_v56 = vsel %vm871_vm6, %v4701_v48, 0.0  ;;  %v1358_v7 = vsel %vm871_vm6, %v3580_v35, 0.0  ;;  %v4721_v35 = vld [vmem:[#allocation19_spill] sm:$0xff]  ;;  %v4722_v48 = vld [vmem:[#allocation25_spill] sm:$0xff] }
 0x214   : > { %2706 = vrot.lane.b32.xlu0 %v2705_v38, %s2822_s28  ;;  %2696 = vrot.lane.b32.xlu1 %v2695_v43, %s2822_s28 }
 0x215   : > { %1199 = vmatpush.msrb.mxu3 %v3251_v26  ;;  %2503 = vmatpush.msk.msra.mxu2 %vm3640_vm13, %v1084_v63  ;;  %v4720_v63 = vld [vmem:[#allocation15_spill] sm:$0xff] }
 0x216   : > { %v3781_v37 = vpop.permute.xlu0 %1306 }
 0x217   : > { %1200 = vmatpush.msrb.mxu3 %v4702_v59  ;;  %2505 = vmatpush.msk.msra.mxu2 %vm3640_vm13, %v1083_v56  ;;  %v1387_v54 = vpop.permute.xlu1 %1386  ;;  %v3786_v26 = vpop.permute.xlu2 %1310  ;;  %v4723_v59 = vld [vmem:[#allocation16_spill] sm:$0xff] }
 0x218   : > { %2452 = vmatmul.msk.f32.vlgmr.msrb.gmra.mxu2 %vm1113_vm14, %v1097_v5  ;;  %v1397_v57 = vsel %vm801_vm5, 0.0, %v1387_v54 }
 0x219   : > { %2471 = vmatpush.msk.msrb.mxu3 %vm3589_vm11, %v805_v10  ;;  %2509 = vmatpush.msk.msrb.mxu1 %vm3279_vm4, %v1397_v57  ;;  %v1333_v57 = vsel %vm801_vm5, %v3621_v28, %v3628_v25  ;;  %v1332_v28 = vsel %vm801_vm5, %v3749_v27, %v3696_v1  ;;  %v1298_v25 = vsel %vm801_vm5, 0.0, %v3756_v0  ;;  %v1318_v1 = vsel %vm871_vm6, %v3781_v37, 0.0 }
 0x21a   : > { %1231 = vmatmul.f32.gmra.mxu0 %v1099_v9  ;;  %v1391_v9 = vsel %vm801_vm5, %v1387_v54, %v3702_v61  ;;  %v1338_v61 = vsel %vm801_vm5, 0.0, %v3749_v27  ;;  %2701 = vrot.lane.b32.xlu2 %v2685_v18, %s2821_s27 }
 0x21b   : > { %2473 = vmatpush.msk.msrb.mxu3 %vm3589_vm11, %v4708_v8  ;;  %2511 = vmatpush.msk.msrb.mxu1 %vm3279_vm4, %v1396_v12  ;;  %v1319_v8 = vsel %vm871_vm6, %v3786_v26, 0.0 }
 0x21c   : > { %2721 = vrot.lane.b32.xlu0 %v2705_v38, %s2821_s27  ;;  %2711 = vrot.lane.b32.xlu1 %v2695_v43, %s2821_s27  ;;  %v1422_v43 = vld [vmem:[%s4600_s9] sm:$0xff] }
 0x21d   : > { %2475 = vmatpush.msk.msrb.mxu3 %vm3589_vm11, %v4710_v47  ;;  %2513 = vmatpush.msk.msrb.mxu1 %vm3532_vm8, %v1353_v62  ;;  %v1423_v47 = vld [vmem:[%s4600_s9 + $0x8] sm:$0xff] }
 0x21e   : > { %v3820_v21 = vpop.permute.xlu0 %1286 }
 0x21f   : > { %2477 = vmatpush.msk.msrb.mxu3 %vm3589_vm11, %v4712_v46  ;;  %v1305_v15 = vpop.permute.xlu1 %1304  ;;  %2515 = vmatpush.msk.msrb.mxu1 %vm3532_vm8, %v1352_v50  ;;  %v3830_v52 = vpop.permute.xlu2 %1288  ;;  %v4726_v50 = vld [vmem:[#allocation27_spill] sm:$0xff] }
 0x220   : > { %1205 = vmatmul.f32.vlgmr.msrb.gmra.mxu3 %v3688_v53  ;;  %2453 = vmatmul.msk.f32.gmra.mxu2 %vm1113_vm14, %v1100_v58  ;;  %v1390_v53 = vsel %vm801_vm5, %v1383_v4, %v3636_v2  ;;  %v1312_v19 = vsel %vm871_vm6, %v1305_v15, %v3781_v37  ;;  %v1299_v12 = vsel %vm801_vm5, 0.0, %v3830_v52  ;;  %v1424_v37 = vld [vmem:[%s4600_s9 + $0x10] sm:$0xff]  ;;  %v1292_v15 = vsel %vm801_vm5, %v3756_v0, %v3820_v21 }
 0x221   : > { %2538 = vmatpush.msk.msra.mxu3 %vm994_vm2, %v4713_v23  ;;  %1450 = vmatpush.msrb.mxu1 %v4714_v11 }
 0x223   : > { %2539 = vmatpush.msk.msra.mxu3 %vm994_vm2, %v4715_v51  ;;  %1451 = vmatpush.msrb.mxu1 %v4716_v3  ;;  %v1425_v51 = vld [vmem:[%s4600_s9 + $0x18] sm:$0xff] }
 0x225   : > { %2541 = vmatpush.msk.msra.mxu3 %vm3589_vm11, %v1391_v9  ;;  %2517 = vmatpush.msk.msrb.mxu1 %vm3279_vm4, %v1339_v6 }
 0x226   : > { %v1291_v60 = vpop.permute.xlu0 %1290 }
 0x227   : > { %2543 = vmatpush.msk.msra.mxu3 %vm3589_vm11, %v1390_v53  ;;  %v1309_v16 = vpop.permute.xlu1 %1308  ;;  %2519 = vmatpush.msk.msrb.mxu1 %vm3279_vm4, %v1338_v61  ;;  %v1409_v22 = vpop.permute.xlu2 %1408  ;;  %v1293_v46 = vsel %vm801_vm5, %v3830_v52, %v1291_v60 }
 0x228   : > { %1208 = vmatmul.f32.gmra.mxu3 %v3744_v40  ;;  %v1417_v2 = vsel %vm871_vm6, %v1409_v22, 0.0  ;;  %2506 = vmatmul.msk.f32.vlgmr.msra.gmra.mxu2 %vm1113_vm14, %v1097_v5  ;;  %v1313_v4 = vsel %vm871_vm6, %v1309_v16, %v3786_v26  ;;  %v4719_v40 = vld [vmem:[#allocation14_spill] sm:$0xff] }
 0x229   : > { %2545 = vmatpush.msk.msra.mxu3 %vm3640_vm13, %v1359_v31  ;;  %2521 = vmatpush.msk.msrb.mxu1 %vm3532_vm8, %v1313_v4  ;;  %v2725_v5 = vpack.i.bf16 %v4720_v63, %v4719_v40 }
 0x22a   : > { %2561 = vmatpush.msk.msra.mxu0 %vm3640_vm13, %v1417_v2 }
 0x22b   : > { %2547 = vmatpush.msk.msra.mxu3 %vm3640_vm13, %v1358_v7  ;;  %2523 = vmatpush.msk.msrb.mxu1 %vm3532_vm8, %v1312_v19 }
 0x22c   : > { %2726 = vrot.lane.b32.xlu1 %v2725_v5, %s2821_s27  ;;  %2716 = vrot.lane.b32.xlu2 %v2725_v5, %s2822_s28 }
 0x22d   : > { %1496 = vmatpush.msra.mxu3 %v4721_v35  ;;  %2525 = vmatpush.msk.msrb.mxu1 %vm3576_vm10, %v4722_v48 }
 0x22e   : > { %v1403_v56 = vpop.permute.xlu0 %1402 }
 0x22f   : > { %1497 = vmatpush.msra.mxu3 %v4723_v59  ;;  %v1407_v54 = vpop.permute.xlu1 %1406  ;;  %2527 = vmatpush.msk.msrb.mxu1 %vm3576_vm10, %v4724_v24  ;;  %v3893_v10 = vpop.permute.xlu2 %1105 }
 0x230   : > { %v1411_v38 = vsel %vm871_vm6, %v1407_v54, %v1409_v22  ;;  %2507 = vmatmul.msk.f32.gmra.mxu2 %vm1113_vm14, %v1100_v58  ;;  %v4729_v54 = vld [vmem:[#allocation4_spill] sm:$0xff] }
 0x231   : > { %2549 = vmatpush.msk.msra.mxu3 %vm3589_vm11, %v1333_v57  ;;  %2529 = vmatpush.msk.msrb.mxu1 %vm3279_vm4, %v1299_v12 }
 0x232   : > { %2533 = vmatpush.msk.msrb.mxu2 %vm3532_vm8, %v1411_v38 }
 0x233   : > { %2551 = vmatpush.msk.msra.mxu3 %vm3589_vm11, %v1332_v28  ;;  %2531 = vmatpush.msk.msrb.mxu1 %vm3279_vm4, %v1298_v25  ;;  %v4730_v25 = vld [vmem:[#allocation3_spill] sm:$0xff] }
 0x234   : > { %1460 = vmatmul.f32.vlgmr.msrb.gmra.mxu1 %v1422_v43 }
 0x235   : > { %2553 = vmatpush.msk.msra.mxu3 %vm3640_vm13, %v1319_v8 }
 0x236   : > { %v3927_v27 = vpop.permute.xlu0 %1110 }
 0x237   : > { %2555 = vmatpush.msk.msra.mxu3 %vm3640_vm13, %v1318_v1  ;;  %v1405_v34 = vpop.permute.xlu1 %1404  ;;  %v3931_v62 = vpop.permute.xlu2 %1435  ;;  %v4731_v1 = vld [vmem:[#allocation2_spill] sm:$0xff] }
 0x238   : > { %v1410_v26 = vsel %vm871_vm6, %v1403_v56, %v1405_v34  ;;  %v1416_v58 = vsel %vm871_vm6, %v1405_v34, 0.0 }
 0x239   : > { %1502 = vmatpush.msra.mxu3 %v4725_v45  ;;  %2535 = vmatpush.msk.msrb.mxu2 %vm3532_vm8, %v1410_v26  ;;  %v4732_v45 = vld [vmem:[#allocation5_spill] sm:$0xff] }
 0x23a   : > { %2563 = vmatpush.msk.msra.mxu0 %vm3640_vm13, %v1416_v58  ;;  %2536 = vmatmul.msk.f32.vlgmr.msrb.gmra.mxu2 %vm764_vm1, %v1423_v47 }
 0x23b   : > { %1503 = vmatpush.msra.mxu3 %v4726_v50  ;;  %2564 = vmatmul.msk.f32.vlgmr.msra.gmra.mxu0 %vm764_vm1, %v1423_v47 }
 0x23c   : > { %1463 = vmatmul.f32.gmra.mxu1 %v1424_v37 }
 0x23d   : > { %2557 = vmatpush.msk.msra.mxu3 %vm3589_vm11, %v1293_v46 }
 0x23e   : > { %v2662_v23 = vpop.permute.xlu0 %2661 }
 0x23f   : > { %2559 = vmatpush.msk.msra.mxu3 %vm3589_vm11, %v1292_v15  ;;  %v3958_v11 = vpop.permute.xlu1 %1430  ;;  %v2657_v3 = vpop.permute.xlu2 %2656  ;;  %v2664_v6 = vunpack.i.h.bf16 %v2662_v23  ;;  %v2663_v53 = vunpack.i.l.bf16 %v2662_v23 }
 0x240   : > { %1506 = vmatmul.f32.vlgmr.msra.gmra.mxu3 %v1422_v43  ;;  %v2659_v52 = vunpack.i.h.bf16 %v2657_v3  ;;  %v2658_v9 = vunpack.i.l.bf16 %v2657_v3 }
 0x241   : > { %v1969_v21 = vsel %vm801_vm5, %v2663_v53, %v2664_v6  ;;  %v1993_v60 = vsel %vm801_vm5, -inf, %v2663_v53 }
 0x242   : > { %2537 = vmatmul.msk.f32.gmra.mxu2 %vm764_vm1, %v1425_v51  ;;  %v1872_v0 = vsel %vm871_vm6, %v2658_v9, %v2659_v52  ;;  %v1896_v16 = vsel %vm871_vm6, %v2659_v52, -inf  ;;  %v2008_v35 = vsel %vm3273_vm3, -inf, %v1993_v60  ;;  %v2009_v48 = vsel %vm3562_vm9, -inf, %v1969_v21 }
 0x243   : > { %2565 = vmatmul.msk.f32.gmra.mxu0 %vm764_vm1, %v1425_v51  ;;  %v1910_v18 = vsel %vm3518_vm7, -inf, %v1872_v0  ;;  %v1911_v43 = vsel %vm3608_vm12, -inf, %v1896_v16  ;;  %v4733_v16 = vld [vmem:[#allocation7_spill] sm:$0xff] }
 0x244   : > { %v1926_v24 = vmax.f32 %v4729_v54, %v1910_v18 }
 0x247   : > { %v2652_v61 = vpop.permute.xlu1 %2651  ;;  %v2672_v31 = vpop.permute.xlu2 %2671 }
 0x248   : > { %1509 = vmatmul.f32.gmra.mxu3 %v1424_v37  ;;  %v2654_v2 = vunpack.i.h.bf16 %v2652_v61  ;;  %v2653_v4 = vunpack.i.l.bf16 %v2652_v61  ;;  %v2674_v7 = vunpack.i.h.bf16 %v2672_v31  ;;  %v2673_v19 = vunpack.i.l.bf16 %v2672_v31 }
 0x249   : > { %v1927_v37 = vmax.f32 %v4732_v45, %v1911_v43 }
 0x24a   : > { %v1897_v56 = vsel %vm871_vm6, %v2654_v2, -inf  ;;  %v1873_v59 = vsel %vm871_vm6, %v2653_v4, %v2654_v2  ;;  %v1992_v57 = vsel %vm801_vm5, -inf, %v2673_v19  ;;  %v1968_v47 = vsel %vm801_vm5, %v2673_v19, %v2674_v7  ;;  %v4734_v4 = vld [vmem:[#allocation6_spill] sm:$0xff] }
 0x24b   : > { %v1913_v38 = vsel %vm3608_vm12, -inf, %v1897_v56  ;;  %v1912_v12 = vsel %vm3518_vm7, -inf, %v1873_v59  ;;  %v2006_v28 = vsel %vm3273_vm3, -inf, %v1992_v57  ;;  %v2007_v15 = vsel %vm3562_vm9, -inf, %v1968_v47 }
 0x24c   : > { %v1929_v8 = vmax.f32 %v4730_v25, %v1913_v38  ;;  %v1928_v34 = vmax.f32 %v4731_v1, %v1912_v12  ;;  %v3996_v50 = vmax.f32 %v1926_v24, %v2006_v28  ;;  %v4006_v53 = vmax.f32 %v1927_v37, %v2007_v15 }
 0x24e   : > { %v3991_v26 = vmax.f32 %v1928_v34, %v2008_v35  ;;  %v3993_v58 = vmax.f32 %v1929_v8, %v2009_v48  ;;  %v2735_v60 = vpack.i.bf16 %v4006_v53, %v3996_v50 }
 0x24f   : > { %v2667_v46 = vpop.permute.xlu1 %2666 }
 0x250   : > { %v2669_v23 = vunpack.i.h.bf16 %v2667_v46  ;;  %v2668_v51 = vunpack.i.l.bf16 %v2667_v46  ;;  %v2730_v3 = vpack.i.bf16 %v3993_v58, %v3991_v26  ;;  %v2740_v52 = vpack.i.bf16 %v3996_v50, %v3991_v26 }
 0x252   : > { %v1895_v9 = vsel %vm871_vm6, %v2669_v23, -inf  ;;  %v1871_v6 = vsel %vm871_vm6, %v2668_v51, %v2669_v23  ;;  %2731 = vrot.lane.b32.xlu1 %v2730_v3, %s2820_s26  ;;  %2741 = vrot.lane.b32.xlu2 %v2740_v52, %s2819_s14 }
 0x253   : > { %v1909_v0 = vsel %vm3608_vm12, -inf, %v1895_v9  ;;  %v1908_v21 = vsel %vm3518_vm7, -inf, %v1871_v6 }
 0x254   : > { %v1925_v18 = vmax.f32 %v4733_v16, %v1909_v0  ;;  %v1924_v7 = vmax.f32 %v4734_v4, %v1908_v21 }
 0x257   : > { %v2682_v61 = vpop.permute.xlu1 %2681 }
 0x258   : > { %v2684_v31 = vunpack.i.h.bf16 %v2682_v61  ;;  %v2683_v2 = vunpack.i.l.bf16 %v2682_v61 }
 0x25a   : > { %v1967_v19 = vsel %vm801_vm5, %v2683_v2, %v2684_v31  ;;  %v1991_v35 = vsel %vm801_vm5, -inf, %v2683_v2  ;;  %2736 = vrot.lane.b32.xlu1 %v2735_v60, %s2820_s26 }
 0x25b   : > { %v2004_v48 = vsel %vm3273_vm3, -inf, %v1991_v35  ;;  %v2005_v56 = vsel %vm3562_vm9, -inf, %v1967_v19 }
 0x25c   : > { %v4025_v59 = vmax.f32 %v1924_v7, %v2004_v48  ;;  %v4027_v54 = vmax.f32 %v1925_v18, %v2005_v56 }
 0x25e   : > { %v2745_v24 = vpack.i.bf16 %v4027_v54, %v4025_v59 }
 0x260   : > { %2746 = vrot.lane.b32.xlu0 %v2745_v24, %s2820_s26 }
 0x26c   : > { %v2687_v38 = vpop.permute.xlu2 %2686 }
 0x26d   : > { %v2689_v12 = vunpack.i.h.bf16 %v2687_v38  ;;  %v2688_v43 = vunpack.i.l.bf16 %v2687_v38 }
 0x26f   : > { %v1893_v25 = vsel %vm871_vm6, %v2689_v12, -inf  ;;  %v1869_v8 = vsel %vm871_vm6, %v2688_v43, %v2689_v12 }
 0x270   : > { %v1905_v1 = vsel %vm3608_vm12, -inf, %v1893_v25  ;;  %v1904_v34 = vsel %vm3518_vm7, -inf, %v1869_v8 }
 0x271   : > { %v1921_v37 = vmax.f32 %v4718_v30, %v1905_v1  ;;  %v1920_v23 = vmax.f32 %v4717_v55, %v1904_v34 }
 0x274   : > { %v4032_v57 = vpop.permute.xlu0 %2676  ;;  %v2702_v45 = vpop.permute.xlu2 %2701 }
 0x275   : > { %v2704_v46 = vunpack.i.h.bf16 %v2702_v45  ;;  %v2703_v15 = vunpack.i.l.bf16 %v2702_v45 }
 0x277   : > { %v1965_v6 = vsel %vm801_vm5, %v2703_v15, %v2704_v46  ;;  %v1989_v0 = vsel %vm801_vm5, -inf, %v2703_v15 }
 0x278   : > { %v2000_v21 = vsel %vm3273_vm3, -inf, %v1989_v0  ;;  %v2001_v60 = vsel %vm3562_vm9, -inf, %v1965_v6 }
 0x279   : > { %v4052_v31 = vmax.f32 %v1920_v23, %v2000_v21  ;;  %v4054_v2 = vmax.f32 %v1921_v37, %v2001_v60 }
 0x27e   : > { %v4034_v28 = vpop.permute.xlu0 %2691 }
 0x283   : > { %v1160_v16 = vpop.f32.mrf.mxu3 }
 0x286   : > { %v2707_v51 = vpop.permute.xlu0 %2706  ;;  %v2697_v3 = vpop.permute.xlu1 %2696 }
 0x287   : > { %v2709_v52 = vunpack.i.h.bf16 %v2707_v51  ;;  %v2708_v9 = vunpack.i.l.bf16 %v2707_v51  ;;  %v2699_v61 = vunpack.i.h.bf16 %v2697_v3  ;;  %v2698_v30 = vunpack.i.l.bf16 %v2697_v3 }
 0x289   : > { %v1891_v18 = vsel %vm871_vm6, %v2709_v52, -inf  ;;  %v1867_v55 = vsel %vm871_vm6, %v2708_v9, %v2709_v52  ;;  %v1892_v4 = vsel %vm871_vm6, %v2699_v61, -inf  ;;  %v1868_v7 = vsel %vm871_vm6, %v2698_v30, %v2699_v61 }
 0x28a   : > { %v1901_v35 = vsel %vm3608_vm12, -inf, %v1891_v18  ;;  %v1900_v48 = vsel %vm3518_vm7, -inf, %v1867_v55  ;;  %v1903_v24 = vsel %vm3608_vm12, -inf, %v1892_v4  ;;  %v1902_v38 = vsel %vm3518_vm7, -inf, %v1868_v7 }
 0x28b   : > { %v1137_v47 = vpop.f32.mrf.mxu2  ;;  %v1917_v25 = vmax.f32 %v4705_v36, %v1901_v35  ;;  %v1916_v34 = vmax.f32 %v4704_v14, %v1900_v48  ;;  %v1919_v45 = vmax.f32 %v4707_v13, %v1903_v24  ;;  %v2717_v35 = vpop.permute.xlu2 %2716 }
 0x28c   : > { %v1138_v56 = vadd.f32 %v1137_v47, %v3893_v10  ;;  %v1918_v47 = vmax.f32 %v4706_v20, %v1902_v38  ;;  %v2719_v24 = vunpack.i.h.bf16 %v2717_v35  ;;  %v2718_v38 = vunpack.i.l.bf16 %v2717_v35 }
 0x28d   : > { %v1163_v13 = vpop.f32.mrf.mxu3 }
 0x28e   : > { %v2722_v12 = vpop.permute.xlu0 %2721  ;;  %v2712_v43 = vpop.permute.xlu1 %2711  ;;  %v1161_v15 = vadd.f32 %v1160_v16, %v1138_v56 }
 0x28f   : > { %v2724_v8 = vunpack.i.h.bf16 %v2722_v12  ;;  %v2723_v1 = vunpack.i.l.bf16 %v2722_v12  ;;  %v2714_v37 = vunpack.i.h.bf16 %v2712_v43  ;;  %v2713_v46 = vunpack.i.l.bf16 %v2712_v43 }
 0x291   : > { %v1963_v23 = vsel %vm801_vm5, %v2723_v1, %v2724_v8  ;;  %v1987_v51 = vsel %vm801_vm5, -inf, %v2723_v1  ;;  %v1964_v52 = vsel %vm801_vm5, %v2713_v46, %v2714_v37  ;;  %v1988_v14 = vsel %vm801_vm5, -inf, %v2713_v46 }
 0x292   : > { %v1996_v3 = vsel %vm3273_vm3, -inf, %v1987_v51  ;;  %v1997_v36 = vsel %vm3562_vm9, -inf, %v1963_v23  ;;  %v1998_v0 = vsel %vm3273_vm3, -inf, %v1988_v14  ;;  %v1999_v21 = vsel %vm3562_vm9, -inf, %v1964_v52 }
 0x293   : > { %v1140_v19 = vpop.f32.mrf.mxu2  ;;  %v4079_v6 = vmax.f32 %v1916_v34, %v1996_v3  ;;  %v4081_v20 = vmax.f32 %v1917_v25, %v1997_v36  ;;  %v4087_v61 = vmax.f32 %v1918_v47, %v1998_v0  ;;  %v4089_v30 = vmax.f32 %v1919_v45, %v1999_v21  ;;  %v1229_v47 = vpop.f32.mrf.mxu0 }
 0x294   : > { %v1141_v16 = vadd.f32 %v1140_v19, %v3927_v27  ;;  %v1890_v19 = vsel %vm871_vm6, %v2719_v24, -inf  ;;  %v1866_v1 = vsel %vm871_vm6, %v2718_v38, %v2719_v24 }
 0x295   : > { %v1899_v37 = vsel %vm3608_vm12, -inf, %v1890_v19  ;;  %v1898_v46 = vsel %vm3518_vm7, -inf, %v1866_v1 }
 0x296   : > { %v1164_v12 = vadd.f32 %v1163_v13, %v1141_v16  ;;  %v1914_v23 = vmax.f32 %v4719_v40, %v1898_v46 }
 0x29b   : > { %v1183_v9 = vpop.f32.mrf.mxu2  ;;  %v1232_v16 = vpop.f32.mrf.mxu0 }
 0x29c   : > { %v1184_v60 = vadd.f32 %v1183_v9, %v1161_v15  ;;  %v1915_v15 = vmax.f32 %v4720_v63, %v1899_v37 }
 0x29e   : > { %v1258_v18 = vmax.f32 %v1184_v60, 0.0  ;;  %v2727_v55 = vpop.permute.xlu1 %2726 }
 0x29f   : > { %v2729_v4 = vunpack.i.h.bf16 %v2727_v55  ;;  %v2728_v7 = vunpack.i.l.bf16 %v2727_v55 }
 0x2a0   : > { %2276 = vst [vmem:[%s3085_s24 + $0x20] sm:$0xff] %v1258_v18 }
 0x2a1   : > { %v1962_v48 = vsel %vm801_vm5, %v2728_v7, %v2729_v4  ;;  %v1986_v56 = vsel %vm801_vm5, -inf, %v2728_v7 }
 0x2a2   : > { %v1994_v8 = vsel %vm3273_vm3, -inf, %v1986_v56  ;;  %v1995_v45 = vsel %vm3562_vm9, -inf, %v1962_v48 }
 0x2a3   : > { %v1206_v43 = vpop.f32.mrf.mxu3  ;;  %v1186_v25 = vpop.f32.mrf.mxu2  ;;  %v4108_v36 = vmax.f32 %v1915_v15, %v1995_v45  ;;  %v4110_v52 = vmax.f32 %v1914_v23, %v1994_v8 }
 0x2a4   : > { %v1187_v34 = vadd.f32 %v1186_v25, %v1164_v12  ;;  %v1207_v51 = vadd.f32 %v1206_v43, %v3893_v10 }
 0x2a6   : > { %v1260_v3 = vmax.f32 %v1187_v34, 0.0  ;;  %v1230_v14 = vadd.f32 %v1229_v47, %v1207_v51 }
 0x2a8   : > { %2278 = vst [vmem:[%s3085_s24 + $0x30] sm:$0xff] %v1260_v3 }
 0x2ab   : > { %v1209_v13 = vpop.f32.mrf.mxu3  ;;  %v1252_v9 = vpop.f32.mrf.mxu2 }
 0x2ac   : > { %v1253_v0 = vadd.f32 %v1252_v9, %v1230_v14  ;;  %v1210_v21 = vadd.f32 %v1209_v13, %v3927_v27  ;;  %v4116_v55 = vpop.permute.xlu2 %2741 }
 0x2ad   : > { %v4645_v35 = vunpack.i.l.bf16 %v4116_v55  ;;  %v4644_v45 = vunpack.i.h.bf16 %v4116_v55 }
 0x2ae   : > { %v1259_v60 = vmax.f32 %v1253_v0, 0.0  ;;  %v1233_v63 = vadd.f32 %v1232_v16, %v1210_v21 }
 0x2af   : > { %v2185_v8 = vsel %vm764_vm1, -inf, %v4645_v35  ;;  %v2184_v14 = vsel %vm764_vm1, -inf, %v4644_v45 }
 0x2b0   : > { %2277 = vst [vmem:[%s3085_s24 + $0x28] sm:$0xff] %v1259_v60 }
 0x2b1   : > { %v1461_v24 = vpop.f32.mrf.mxu1 }
 0x2b3   : > { %v1255_v40 = vpop.f32.mrf.mxu2 }
 0x2b4   : > { %v1256_v18 = vadd.f32 %v1255_v40, %v1233_v63  ;;  %v1462_v63 = vadd.f32 %v1461_v24, %v3958_v11  ;;  %v2693_v24 = vunpack.i.l.bf16 %v4034_v28 }
 0x2b6   : > { %v1261_v10 = vmax.f32 %v1256_v18, 0.0 }
 0x2b8   : > { %2279 = vst [vmem:[%s3085_s24 + $0x38] sm:$0xff] %v1261_v10  ;;  %v1530_v4 = vpop.f32.mrf.mxu0  ;;  %v2678_v10 = vunpack.i.l.bf16 %v4032_v57 }
 0x2b9   : > { %v1464_v3 = vpop.f32.mrf.mxu1 }
 0x2ba   : > { %v1465_v60 = vadd.f32 %v1464_v3, %v3931_v62 }
 0x2bd   : > { %v1484_v43 = vpop.f32.mrf.mxu2 }
 0x2be   : > { %v1485_v18 = vadd.f32 %v1484_v43, %v1462_v63 }
 0x2c0   : > { %v1533_v46 = vpop.f32.mrf.mxu0 }
 0x2c3   : > { %v1507_v7 = vpop.f32.mrf.mxu3 }
 0x2c4   : > { %v1508_v48 = vadd.f32 %v1507_v7, %v3958_v11  ;;  %v4120_v56 = vpop.permute.xlu1 %2731  ;;  %v2694_v7 = vunpack.i.h.bf16 %v4034_v28 }
 0x2c5   : > { %v2734_v27 = vunpack.i.h.bf16 %v4120_v56  ;;  %v2733_v38 = vunpack.i.l.bf16 %v4120_v56  ;;  %v1487_v21 = vpop.f32.mrf.mxu2 }
 0x2c6   : > { %v1531_v12 = vadd.f32 %v1530_v4, %v1508_v48  ;;  %v1488_v40 = vadd.f32 %v1487_v21, %v1465_v60  ;;  %v4168_v48 = vmax.f32 %v1485_v18, 0.0 }
 0x2c7   : > { %v2081_v25 = vsel %vm994_vm2, %v2733_v38, %v2734_v27  ;;  %v1966_v38 = vsel %vm801_vm5, %v2693_v24, %v2694_v7 }
 0x2c8   : > { %v4130_v19 = vmax.f32 %v1531_v12, 0.0  ;;  %v2120_v1 = vmax.f32 %v3991_v26, %v2081_v25  ;;  %v1990_v25 = vsel %vm801_vm5, -inf, %v2693_v24 }
 0x2ca   : > { %v2200_v34 = vmax.f32 %v2120_v1, %v2185_v8  ;;  %1624 = vrot.lane.b32.xlu0 %v4130_v19, %s2822_s28  ;;  %1644 = vrot.lane.b32.xlu2 %v4130_v19, %s2820_s26  ;;  %v2003_v8 = vsel %vm3562_vm9, -inf, %v1966_v38  ;;  %v2002_v1 = vsel %vm3273_vm3, -inf, %v1990_v25  ;;  %v2780_v38 = vpack.i.bf16 %v4081_v20, %v4079_v6 }
 0x2cb   : > { %1546 = vrot.lane.b32.xlu1 %v4130_v19, %s2819_s14  ;;  %v1510_v37 = vpop.f32.mrf.mxu3  ;;  %v2775_v25 = vpack.i.bf16 %v4087_v61, %v4006_v53 }
 0x2cc   : > { %v1511_v47 = vadd.f32 %v1510_v37, %v3931_v62  ;;  %2230 = vmatpush.msrb.mxu3 %v2200_v34  ;;  %v4141_v15 = vpop.permute.xlu1 %2736  ;;  %v4164_v62 = vmax.f32 %v1488_v40, 0.0 }
 0x2cd   : > { %v4646_v26 = vunpack.i.h.bf16 %v4141_v15  ;;  %v2738_v23 = vunpack.i.l.bf16 %v4141_v15 }
 0x2ce   : > { %v1534_v51 = vadd.f32 %v1533_v46, %v1511_v47 }
 0x2cf   : > { %v2080_v13 = vsel %vm994_vm2, %v2738_v23, %v4646_v26 }
 0x2d0   : > { %v4151_v9 = vmax.f32 %v1534_v51, 0.0  ;;  %v2118_v0 = vmax.f32 %v3996_v50, %v2080_v13  ;;  %v2679_v50 = vunpack.i.h.bf16 %v4032_v57 }
 0x2d2   : > { %1550 = vrot.lane.b32.xlu0 %v4151_v9, %s2819_s14  ;;  %1628 = vrot.lane.b32.xlu2 %v4151_v9, %s2822_s28  ;;  %v2198_v16 = vmax.f32 %v2118_v0, %v2184_v14  ;;  %v1894_v4 = vsel %vm871_vm6, %v2679_v50, -inf  ;;  %v1870_v11 = vsel %vm871_vm6, %v2678_v10, %v2679_v50  ;;  %v4214_v5 = vpop.permute.xlu0 %2746 }
 0x2d3   : > { %1604 = vrot.lane.b32.xlu1 %v4130_v19, %s2821_s27  ;;  %v1907_v57 = vsel %vm3608_vm12, -inf, %v1894_v4  ;;  %v1906_v12 = vsel %vm3518_vm7, -inf, %v1870_v11 }
 0x2d4   : > { %2231 = vmatpush.msrb.mxu3 %v2198_v16  ;;  %v1923_v43 = vmax.f32 %v2977_v49, %v1907_v57  ;;  %v1922_v28 = vmax.f32 %v2971_v44, %v1906_v12  ;;  %v2765_v57 = vpack.i.bf16 %v4052_v31, %v3993_v58  ;;  %v2760_v12 = vpack.i.bf16 %v4054_v2, %v4052_v31 }
 0x2d6   : > { %v4194_v39 = vmax.f32 %v1923_v43, %v2003_v8  ;;  %v4198_v49 = vmax.f32 %v1922_v28, %v2002_v1  ;;  %v1704_v28 = vld [vmem:[%s4603_s12] sm:$0xff]  ;;  %v2790_v1 = vpack.i.bf16 %v4108_v36, %v4110_v52 }
 0x2d8   : > { %v2750_v17 = vpack.i.bf16 %v4194_v39, %v4198_v49  ;;  %v2795_v43 = vpack.i.bf16 %v4110_v52, %v4194_v39  ;;  %v2755_v8 = vpack.i.bf16 %v4198_v49, %v4025_v59 }
 0x2da   : > { %1608 = vrot.lane.b32.xlu0 %v4151_v9, %s2821_s27  ;;  %1548 = vrot.lane.b32.xlu2 %v4164_v62, %s2819_s14 }
 0x2db   : > { %1622 = vrot.lane.b32.xlu1 %v4168_v48, %s2822_s28 }
 0x2e2   : > { %1648 = vrot.lane.b32.xlu0 %v4151_v9, %s2820_s26  ;;  %1606 = vrot.lane.b32.xlu2 %v4164_v62, %s2821_s27 }
 0x2e3   : > { %1642 = vrot.lane.b32.xlu1 %v4168_v48, %s2820_s26 }
 0x2ea   : > { %1544 = vrot.lane.b32.xlu0 %v4168_v48, %s2819_s14  ;;  %1646 = vrot.lane.b32.xlu2 %v4164_v62, %s2820_s26 }
 0x2eb   : > { %2751 = vrot.lane.b32.xlu1 %v2750_v17, %s2820_s26  ;;  %v2770_v17 = vpack.i.bf16 %v4089_v30, %v4087_v61 }
 0x2f2   : > { %1602 = vrot.lane.b32.xlu0 %v4168_v48, %s2821_s27 }
 0x2f3   : > { %1626 = vrot.lane.b32.xlu1 %v4164_v62, %s2822_s28 }
 0x324   : > { %v1645_v44 = vpop.permute.xlu2 %1644 }
 0x325   : > { %v1656_v22 = vsel %vm994_vm2, %v1645_v44, 0.0 }
 0x326   : > { %1682 = vrot.lane.b32.xlu0 %v1656_v22, %s2822_s28  ;;  %1662 = vrot.lane.b32.xlu1 %v1656_v22, %s2821_s27  ;;  %v2805_v22 = vpack.i.bf16 %v4108_v36, %v4081_v20 }
 0x32c   : > { %v4216_v34 = vpop.permute.xlu2 %1628 }
 0x334   : > { %v4220_v47 = vpop.permute.xlu2 %1548 }
 0x335   : > { %v1559_v24 = vsel %vm764_vm1, 0.0, %v4220_v47 }
 0x33c   : > { %v4218_v37 = vpop.permute.xlu0 %1624  ;;  %v4224_v3 = vpop.permute.xlu2 %1606 }
 0x33d   : > { %v1547_v46 = vpop.permute.xlu1 %1546 }
 0x344   : > { %v1551_v23 = vpop.permute.xlu0 %1550  ;;  %v1647_v60 = vpop.permute.xlu2 %1646 }
 0x345   : > { %v4222_v51 = vpop.permute.xlu1 %1604  ;;  %v4254_v11 = vsel %vm764_vm1, %v4220_v47, %v1551_v23  ;;  %v2785_v23 = vpack.i.bf16 %v4079_v6, %v4027_v54 }
 0x34c   : > { %v1609_v14 = vpop.permute.xlu0 %1608 }
 0x34d   : > { %v4228_v13 = vsel %vm801_vm5, %v4224_v3, %v1609_v14  ;;  %v1623_v0 = vpop.permute.xlu1 %1622  ;;  %v2800_v14 = vpack.i.bf16 %v4089_v30, %v4054_v2 }
 0x34e   : > { %v4232_v21 = vsel %vm871_vm6, %v1623_v0, %v4218_v37  ;;  %v1705_v0 = vld [vmem:[%s4603_s12 + $0x8] sm:$0xff] }
 0x354   : > { %v1649_v16 = vpop.permute.xlu0 %1648 }
 0x355   : > { %v1643_v63 = vpop.permute.xlu1 %1642  ;;  %2596 = vmatpush.msk.msrb.mxu0 %vm994_vm2, %v1649_v16  ;;  %v1657_v40 = vsel %vm994_vm2, %v1649_v16, 0.0  ;;  %v1651_v18 = vsel %vm994_vm2, %v1647_v60, %v1649_v16 }
 0x356   : > { %1666 = vrot.lane.b32.xlu0 %v1657_v40, %s2821_s27  ;;  %1722 = vmatpush.msra.mxu1 %v1651_v18  ;;  %v1650_v50 = vsel %vm994_vm2, %v1643_v63, %v1645_v44 }
 0x357   : > { %2597 = vmatpush.msk.msrb.mxu0 %vm994_vm2, %v1645_v44  ;;  %v2205_v44 = vld [vmem:[%s4597_s6 + $0x8] sm:$0xff] }
 0x358   : > { %1723 = vmatpush.msra.mxu1 %v1650_v50 }
 0x35c   : > { %v4240_v10 = vpop.permute.xlu0 %1544 }
 0x35d   : > { %v1558_v4 = vsel %vm764_vm1, 0.0, %v4240_v10  ;;  %v4246_v7 = vsel %vm764_vm1, %v4240_v10, %v1547_v46  ;;  %v2204_v46 = vld [vmem:[%s4597_s6] sm:$0xff]  ;;  %v4316_v60 = vpop.permute.xlu1 %2751 }
 0x35e   : > { %1686 = vrot.lane.b32.xlu0 %v1657_v40, %s2822_s28  ;;  %1562 = vrot.lane.b32.xlu1 %v1558_v4, %s2821_s27 }
 0x35f   : > { %1564 = vrot.lane.b32.xlu2 %v4246_v7, %s2821_s27 }
 0x364   : > { %v1603_v16 = vpop.permute.xlu0 %1602 }
 0x365   : > { %v1627_v40 = vpop.permute.xlu1 %1626 }
 0x366   : > { %1568 = vrot.lane.b32.xlu1 %v4254_v11, %s2821_s27  ;;  %1584 = vrot.lane.b32.xlu0 %v4246_v7, %s2822_s28 }
 0x367   : > { %1582 = vrot.lane.b32.xlu2 %v1558_v4, %s2822_s28 }
 0x36e   : > { %1586 = vrot.lane.b32.xlu1 %v1559_v24, %s2822_s28  ;;  %1660 = vrot.lane.b32.xlu0 %v1650_v50, %s2821_s27 }
 0x36f   : > { %1680 = vrot.lane.b32.xlu2 %v1650_v50, %s2822_s28 }
 0x376   : > { %2766 = vrot.lane.b32.xlu1 %v2765_v57, %s2819_s14  ;;  %1566 = vrot.lane.b32.xlu0 %v1559_v24, %s2821_s27 }
 0x377   : > { %1588 = vrot.lane.b32.xlu2 %v4254_v11, %s2822_s28 }
 0x37e   : > { %2781 = vrot.lane.b32.xlu1 %v2780_v38, %s2820_s26  ;;  %2761 = vrot.lane.b32.xlu0 %v2760_v12, %s2820_s26 }
 0x37f   : > { %1664 = vrot.lane.b32.xlu2 %v1651_v18, %s2821_s27 }
 0x386   : > { %2796 = vrot.lane.b32.xlu1 %v2795_v43, %s2819_s14  ;;  %2776 = vrot.lane.b32.xlu0 %v2775_v25, %s2819_s14 }
 0x387   : > { %2756 = vrot.lane.b32.xlu2 %v2755_v8, %s2819_s14 }
 0x38e   : > { %1708 = vperm.xlu1 %2648, %v1704_v28   ;;  %2791 = vrot.lane.b32.xlu0 %v2790_v1, %s2820_s26 }
 0x38f   : > { %2771 = vrot.lane.b32.xlu2 %v2770_v17, %s2820_s26 }
 0x396   : > { %2213 = vperm.xlu1 %2648, %v2205_v44   ;;  %2806 = vrot.lane.b32.xlu0 %v2805_v22, %s2819_s14  ;;  %v2749_v44 = vunpack.i.h.bf16 %v4214_v5  ;;  %v2748_v22 = vunpack.i.l.bf16 %v4214_v5 }
 0x397   : > { %1684 = vrot.lane.b32.xlu2 %v1651_v18, %s2822_s28 }
 0x398   : > { %v4320_v18 = vpop.permute.xlu0 %1682  ;;  %v1663_v4 = vpop.permute.xlu1 %1662 }
 0x399   : > { %v1694_v33 = vsel %vm871_vm6, %v4320_v18, 0.0 }
 0x39e   : > { %2208 = vperm.xlu0 %2647, %v2204_v46   ;;  %v4647_v46 = vunpack.i.h.bf16 %v4316_v60 }
 0x39f   : > { %2786 = vrot.lane.b32.xlu2 %v2785_v23, %s2819_s14  ;;  %v2753_v23 = vunpack.i.l.bf16 %v4316_v60 }
 0x3a1   : > { %v2078_v45 = vsel %vm994_vm2, %v2753_v23, %v4647_v46 }
 0x3a7   : > { %2801 = vrot.lane.b32.xlu2 %v2800_v14, %s2819_s14  ;;  %v2079_v14 = vsel %vm994_vm2, %v2748_v22, %v2749_v44  ;;  %v1637_v22 = vsel %vm871_vm6, %v4216_v34, 0.0 }
 0x3af   : > { %1713 = vperm.xlu2 %2649, %v1705_v0  }
 0x3b9   : > { %v4318_v63 = vpop.permute.xlu2 %1564 }
 0x3c1   : > { %v1583_v50 = vpop.permute.xlu2 %1582 }
 0x3c8   : > { %v1667_v24 = vpop.permute.xlu0 %1666 }
 0x3c9   : > { %v4322_v57 = vpop.permute.xlu2 %1680 }
 0x3d0   : > { %v4324_v38 = vpop.permute.xlu0 %1686  ;;  %v4326_v12 = vpop.permute.xlu1 %1562 }
 0x3d1   : > { %v1589_v43 = vpop.permute.xlu2 %1588 }
 0x3d8   : > { %v1585_v25 = vpop.permute.xlu0 %1584  ;;  %v4328_v8 = vpop.permute.xlu1 %1568 }
 0x3d9   : > { %v1665_v28 = vpop.permute.xlu2 %1664 }
 0x3da   : > { %v1669_v1 = vsel %vm801_vm5, %v1665_v28, %v1667_v24  ;;  %v1675_v17 = vsel %vm801_vm5, 0.0, %v1665_v28 }
 0x3db   : > { %2567 = vmatpush.msk.msra.mxu1 %vm3279_vm4, %v1675_v17  ;;  %2599 = vmatpush.msk.msrb.mxu0 %vm3589_vm11, %v1669_v1 }
 0x3e0   : > { %v1661_v0 = vpop.permute.xlu0 %1660  ;;  %v1587_v24 = vpop.permute.xlu1 %1586 }
 0x3e1   : > { %v4343_v28 = vpop.permute.xlu2 %2756  ;;  %v1668_v17 = vsel %vm801_vm5, %v1661_v0, %v1663_v4  ;;  %v1674_v1 = vsel %vm801_vm5, 0.0, %v1661_v0  ;;  %v1631_v4 = vsel %vm871_vm6, %v1627_v40, %v4216_v34  ;;  %v2116_v0 = vmax.f32 %v4025_v59, %v2079_v14 }
 0x3e2   : > { %v2759_v35 = vunpack.i.h.bf16 %v4343_v28  ;;  %v2758_v26 = vunpack.i.l.bf16 %v4343_v28  ;;  %2569 = vmatpush.msk.msra.mxu1 %vm3279_vm4, %v1674_v1  ;;  %2601 = vmatpush.msk.msrb.mxu0 %vm3589_vm11, %v1668_v17  ;;  %v1636_v17 = vsel %vm871_vm6, %v4218_v37, 0.0  ;;  %v2114_v59 = vmax.f32 %v4198_v49, %v2078_v45 }
 0x3e3   : > { %v1617_v45 = vsel %vm801_vm5, 0.0, %v4224_v3  ;;  %v1590_v49 = vsel %vm871_vm6, %v1583_v50, %v1585_v25  ;;  %v2105_v50 = vsel %vm994_vm2, %v2734_v27, -inf }
 0x3e4   : > { %v2182_v23 = vsel %vm764_vm1, -inf, %v2759_v35  ;;  %v2183_v46 = vsel %vm764_vm1, -inf, %v2758_v26  ;;  %2571 = vmatpush.msk.msra.mxu1 %vm3532_vm8, %v1631_v4  ;;  %2603 = vmatpush.msk.msrb.mxu0 %vm3640_vm13, %v1637_v22 }
 0x3e5   : > { %v2196_v34 = vmax.f32 %v2116_v0, %v2183_v46  ;;  %v2194_v40 = vmax.f32 %v2114_v59, %v2182_v23  ;;  %v4439_v23 = vld [vmem:[%s4602_s11 + $0x8] sm:$0xff] }
 0x3e6   : > { %2573 = vmatpush.msk.msra.mxu1 %vm3532_vm8, %v4232_v21  ;;  %2605 = vmatpush.msk.msrb.mxu0 %vm3640_vm13, %v1636_v17 }
 0x3e7   : > { %2232 = vmatpush.msrb.mxu3 %v2196_v34 }
 0x3e8   : > { %v1567_v14 = vpop.permute.xlu0 %1566  ;;  %1728 = vmatpush.msra.mxu1 %v4164_v62  ;;  %1774 = vmatpush.msrb.mxu0 %v4151_v9  ;;  %v4381_v1 = vpop.permute.xlu1 %2766  ;;  %v1610_v9 = vsel %vm801_vm5, %v1603_v16, %v4222_v51  ;;  %v1616_v62 = vsel %vm801_vm5, 0.0, %v1603_v16 }
 0x3e9   : > { %v4383_v37 = vpop.permute.xlu2 %2771  ;;  %2233 = vmatpush.msrb.mxu3 %v2194_v40  ;;  %v2769_v21 = vunpack.i.h.bf16 %v4381_v1  ;;  %v1571_v5 = vsel %vm801_vm5, %v1567_v14, %v4328_v8 }
 0x3ea   : > { %1729 = vmatpush.msra.mxu1 %v4168_v48  ;;  %1775 = vmatpush.msrb.mxu0 %v4130_v19  ;;  %v1597_v19 = vsel %vm871_vm6, %v1589_v43, 0.0  ;;  %v1591_v48 = vsel %vm871_vm6, %v1587_v24, %v1589_v43  ;;  %v2768_v24 = vunpack.i.l.bf16 %v4381_v1  ;;  %v2774_v0 = vunpack.i.h.bf16 %v4383_v37 }
 0x3eb   : > { %v2773_v56 = vunpack.i.l.bf16 %v4383_v37  ;;  %v2181_v40 = vsel %vm764_vm1, -inf, %v2769_v21 }
 0x3ec   : > { %2575 = vmatpush.msk.msra.mxu1 %vm3279_vm4, %v1617_v45  ;;  %2607 = vmatpush.msk.msrb.mxu0 %vm3589_vm11, %v4228_v13  ;;  %v1596_v13 = vsel %vm871_vm6, %v1585_v25, 0.0  ;;  %v4735_v25 = vunpack.i.h.bf16 %v4141_v15  ;;  %v1688_v15 = vsel %vm871_vm6, %v4322_v57, %v4320_v18  ;;  %v2121_v57 = vmax.f32 %v3993_v58, %v2105_v50  ;;  %v1700_v18 = vld [vmem:[%s4602_s11] sm:$0xff]  ;;  %v1703_v50 = vld [vmem:[%s4602_s11 + $0x18] sm:$0xff] }
 0x3ed   : > { %v1695_v45 = vsel %vm871_vm6, %v4324_v38, 0.0  ;;  %v2103_v58 = vsel %vm994_vm2, %v2749_v44, -inf }
 0x3ee   : > { %2577 = vmatpush.msk.msra.mxu1 %vm3279_vm4, %v1616_v62  ;;  %2609 = vmatpush.msk.msrb.mxu0 %vm3589_vm11, %v1610_v9  ;;  %v2104_v4 = vsel %vm994_vm2, %v4735_v25, -inf  ;;  %v4736_v9 = vunpack.i.l.bf16 %v4116_v55 }
 0x3ef   : > { %v2119_v29 = vmax.f32 %v4006_v53, %v2104_v4  ;;  %v1570_v53 = vsel %vm801_vm5, %v4326_v12, %v4318_v63  ;;  %v1576_v63 = vsel %vm801_vm5, 0.0, %v4326_v12  ;;  %v4737_v12 = vunpack.i.h.bf16 %v4316_v60 }
 0x3f0   : > { %v4404_v3 = vpop.permute.xlu0 %2761  ;;  %2579 = vmatpush.msk.msra.mxu1 %vm3532_vm8, %v1591_v48  ;;  %2611 = vmatpush.msk.msrb.mxu0 %vm3640_vm13, %v1597_v19  ;;  %v4410_v51 = vpop.permute.xlu1 %2781  ;;  %v2117_v4 = vmax.f32 %v4027_v54, %v2103_v58  ;;  %v2202_v58 = vld [vmem:[%s4596_s5] sm:$0xff] }
 0x3f1   : > { %v1685_v16 = vpop.permute.xlu2 %1684  ;;  %v2764_v46 = vunpack.i.h.bf16 %v4404_v3  ;;  %v2763_v43 = vunpack.i.l.bf16 %v4404_v3  ;;  %v2784_v17 = vunpack.i.h.bf16 %v4410_v51  ;;  %v2783_v34 = vunpack.i.l.bf16 %v4410_v51 }
 0x3f2   : > { %v1689_v22 = vsel %vm871_vm6, %v1685_v16, %v4324_v38  ;;  %2581 = vmatpush.msk.msra.mxu1 %vm3532_vm8, %v1590_v49  ;;  %2613 = vmatpush.msk.msrb.mxu0 %vm3640_vm13, %v1596_v13  ;;  %v1577_v38 = vsel %vm801_vm5, 0.0, %v1567_v14  ;;  %v2102_v16 = vsel %vm994_vm2, %v4737_v12, -inf }
 0x3f3   : > { %v2077_v27 = vsel %vm994_vm2, %v2763_v43, %v2764_v46  ;;  %2591 = vmatpush.msk.msra.mxu2 %vm3532_vm8, %v1689_v22  ;;  %v2099_v1 = vsel %vm994_vm2, %v2784_v17, -inf }
 0x3f4   : > { %2583 = vmatpush.msk.msra.mxu1 %vm3576_vm10, %v4220_v47  ;;  %1780 = vmatpush.msrb.mxu0 %v4254_v11  ;;  %v2112_v59 = vmax.f32 %v4052_v31, %v2077_v27  ;;  %v2161_v47 = vsel %vm764_vm1, %v4736_v9, %v2768_v24  ;;  %v2076_v11 = vsel %vm994_vm2, %v2773_v56, %v2774_v0  ;;  %v4738_v24 = vunpack.i.h.bf16 %v4116_v55 }
 0x3f5   : > { %2593 = vmatpush.msk.msra.mxu2 %vm3532_vm8, %v1688_v15  ;;  %v2201_v8 = vmax.f32 %v2121_v57, %v2161_v47  ;;  %v2110_v32 = vmax.f32 %v4087_v61, %v2076_v11  ;;  %v2115_v56 = vmax.f32 %v4194_v39, %v2102_v16  ;;  %v2101_v15 = vsel %vm994_vm2, %v2764_v46, -inf }
 0x3f6   : > { %2594 = vmatmul.msk.f32.vlgmr.msra.gmra.mxu2 %vm764_vm1, %v4439_v23  ;;  %2585 = vmatpush.msk.msra.mxu1 %vm3576_vm10, %v4240_v10  ;;  %v2192_v31 = vmax.f32 %v2112_v59, %v2181_v40  ;;  %v2075_v10 = vsel %vm994_vm2, %v2783_v34, %v2784_v17  ;;  %v2100_v39 = vsel %vm994_vm2, %v2774_v0, -inf  ;;  %v2113_v46 = vmax.f32 %v4054_v2, %v2101_v15 }
 0x3f7   : > { %2619 = vmatpush.msk.msrb.mxu2 %vm3640_vm13, %v1695_v45  ;;  %1781 = vmatpush.msrb.mxu0 %v4246_v7  ;;  %v2108_v61 = vmax.f32 %v4079_v6, %v2075_v10  ;;  %v2203_v10 = vld [vmem:[%s4596_s5 + $0x8] sm:$0xff] }
 0x3f8   : > { %v4488_v44 = vpop.permute.xlu0 %2776  ;;  %2587 = vmatpush.msk.msra.mxu1 %vm3279_vm4, %v1577_v38  ;;  %v4492_v7 = vpop.permute.xlu1 %2796  ;;  %2234 = vmatpush.msrb.mxu3 %v2192_v31  ;;  %v2111_v31 = vmax.f32 %v4089_v30, %v2100_v39 }
 0x3f9   : > { %2621 = vmatpush.msk.msrb.mxu2 %vm3640_vm13, %v1694_v33  ;;  %v4501_v14 = vpop.permute.xlu2 %2786  ;;  %v2779_v62 = vunpack.i.h.bf16 %v4488_v44  ;;  %v2778_v19 = vunpack.i.l.bf16 %v4488_v44  ;;  %2615 = vmatpush.msk.msrb.mxu0 %vm3589_vm11, %v1571_v5  ;;  %v2798_v13 = vunpack.i.l.bf16 %v4492_v7  ;;  %v2799_v54 = vunpack.i.h.bf16 %v4492_v7 }
 0x3fa   : > { %v2789_v48 = vunpack.i.h.bf16 %v4501_v14  ;;  %v2788_v49 = vunpack.i.l.bf16 %v4501_v14  ;;  %2589 = vmatpush.msk.msra.mxu1 %vm3279_vm4, %v1576_v63 }
 0x3fb   : > { %v2180_v43 = vsel %vm764_vm1, -inf, %v2779_v62  ;;  %2617 = vmatpush.msk.msrb.mxu0 %vm3589_vm11, %v1570_v53  ;;  %1738 = vmatmul.f32.vlgmr.msra.gmra.mxu1 %v1700_v18  ;;  %v2160_v41 = vsel %vm764_vm1, %v4738_v24, %v2778_v19  ;;  %v2158_v6 = vsel %vm764_vm1, %v2759_v35, %v2798_v13  ;;  %v1702_v35 = vld [vmem:[%s4602_s11 + $0x10] sm:$0xff]  ;;  %v2178_v37 = vsel %vm764_vm1, -inf, %v2799_v54 }
 0x3fc   : > { %v2179_v60 = vsel %vm764_vm1, -inf, %v2789_v48  ;;  %1784 = vmatmul.f32.vlgmr.msrb.gmra.mxu0 %v1700_v18  ;;  %2253 = vmatpush.msrb.mxu1 %v2201_v8  ;;  %v2190_v22 = vmax.f32 %v2110_v32, %v2180_v43  ;;  %v2199_v42 = vmax.f32 %v2119_v29, %v2160_v41  ;;  %v2159_v25 = vsel %vm764_vm1, %v2758_v26, %v2788_v49 }
 0x3fd   : > { %v2188_v55 = vmax.f32 %v2108_v61, %v2179_v60  ;;  %v2197_v27 = vmax.f32 %v2117_v4, %v2159_v25  ;;  %v2195_v57 = vmax.f32 %v2115_v56, %v2158_v6 }
 0x3fe   : > { %2595 = vmatmul.msk.f32.gmra.mxu2 %vm764_vm1, %v1703_v50  ;;  %2235 = vmatpush.msrb.mxu3 %v2190_v22 }
 0x3ff   : > { %2254 = vmatpush.msrb.mxu1 %v2199_v42 }
 0x400   : > { %v2792_v34 = vpop.permute.xlu0 %2791  ;;  %2236 = vmatpush.msrb.mxu3 %v2188_v55 }
 0x401   : > { %v2802_v26 = vpop.permute.xlu2 %2801  ;;  %v2794_v59 = vunpack.i.h.bf16 %v2792_v34  ;;  %v2793_v40 = vunpack.i.l.bf16 %v2792_v34  ;;  %2255 = vmatpush.msrb.mxu1 %v2197_v27 }
 0x402   : > { %v2804_v28 = vunpack.i.h.bf16 %v2802_v26  ;;  %v2803_v3 = vunpack.i.l.bf16 %v2802_v26 }
 0x403   : > { %v2074_v45 = vsel %vm994_vm2, %v2793_v40, %v2794_v59  ;;  %2256 = vmatpush.msrb.mxu1 %v2195_v57 }
 0x404   : > { %1741 = vmatmul.f32.gmra.mxu1 %v1702_v35  ;;  %1787 = vmatmul.f32.gmra.mxu0 %v1702_v35  ;;  %v2157_v9 = vsel %vm764_vm1, %v2769_v21, %v2803_v3  ;;  %v2106_v47 = vmax.f32 %v4110_v52, %v2074_v45  ;;  %v2156_v29 = vsel %vm764_vm1, %v2779_v62, %v2804_v28  ;;  %v2098_v21 = vsel %vm994_vm2, %v2794_v59, -inf }
 0x405   : > { %v2193_v0 = vmax.f32 %v2113_v46, %v2157_v9  ;;  %v2191_v52 = vmax.f32 %v2111_v31, %v2156_v29  ;;  %v2107_v17 = vmax.f32 %v4108_v36, %v2098_v21 }
 0x406   : > { %2622 = vmatmul.msk.f32.vlgmr.msrb.gmra.mxu2 %vm764_vm1, %v4439_v23  ;;  %v2186_v2 = vmax.f32 %v2106_v47, %v2178_v37  ;;  %v2109_v23 = vmax.f32 %v4081_v20, %v2099_v1  ;;  %v1709_v20 = vpop.permute.xlu1 %1708 }
 0x407   : > { %2257 = vmatpush.msrb.mxu1 %v2193_v0 }
 0x408   : > { %v2807_v30 = vpop.permute.xlu0 %2806  ;;  %2237 = vmatpush.msrb.mxu3 %v2186_v2 }
 0x409   : > { %v2809_v11 = vunpack.i.h.bf16 %v2807_v30  ;;  %v2808_v38 = vunpack.i.l.bf16 %v2807_v30  ;;  %2258 = vmatpush.msrb.mxu1 %v2191_v52  ;;  %2624 = vmatmul.msk.f32.vlgmr.msrb.gmra.mxu3 %vm617_vm0, %v2202_v58  ;;  %v1714_v8 = vpop.permute.xlu2 %1713 }
 0x40b   : > { %v2155_v33 = vsel %vm764_vm1, %v2789_v48, %v2808_v38  ;;  %v2154_v51 = vsel %vm764_vm1, %v2799_v54, %v2809_v11 }
 0x40c   : > { %v2189_v53 = vmax.f32 %v2109_v23, %v2155_v33  ;;  %v2187_v5 = vmax.f32 %v2107_v17, %v2154_v51 }
 0x40e   : > { %2623 = vmatmul.msk.f32.gmra.mxu2 %vm764_vm1, %v1703_v50  ;;  %2259 = vmatpush.msrb.mxu1 %v2189_v53  ;;  %v2214_v56 = vpop.permute.xlu1 %2213 }
 0x410   : > { %2260 = vmatpush.msrb.mxu1 %v2187_v5  ;;  %v2209_v43 = vpop.permute.xlu0 %2208 }
 0x411   : > { %2625 = vmatmul.msk.f32.gmra.mxu3 %vm617_vm0, %v2203_v10  ;;  %2626 = vmatmul.msk.f32.vlgmr.msrb.gmra.mxu1 %vm617_vm0, %v2202_v58 }
 0x419   : > { %2627 = vmatmul.msk.f32.gmra.mxu1 %vm617_vm0, %v2203_v10 }
 0x478   : > { %v1739_v36 = vpop.f32.mrf.mxu1 }
 0x479   : > { %v1740_v44 = vadd.f32 %v1739_v36, %v1709_v20  ;;  %v1762_v7 = vpop.f32.mrf.mxu2  ;;  %v1785_v48 = vpop.f32.mrf.mxu0 }
 0x47a   : > { %v1786_v32 = vadd.f32 %v1785_v48, %v1709_v20 }
 0x47b   : > { %v1763_v18 = vadd.f32 %v1762_v7, %v1740_v44 }
 0x47d   : > { %v1814_v63 = vmax.f32 %v1763_v18, 0.0 }
 0x47f   : > { %2280 = vst [vmem:[%s3085_s24 + $0x40] sm:$0xff] %v1814_v63 }
 0x481   : > { %v1742_v14 = vpop.f32.mrf.mxu1  ;;  %v1765_v62 = vpop.f32.mrf.mxu2 }
 0x482   : > { %v1743_v19 = vadd.f32 %v1742_v14, %v1714_v8  ;;  %v1788_v41 = vpop.f32.mrf.mxu0 }
 0x483   : > { %v1789_v25 = vadd.f32 %v1788_v41, %v1714_v8 }
 0x484   : > { %v1766_v49 = vadd.f32 %v1765_v62, %v1743_v19 }
 0x486   : > { %v1816_v13 = vmax.f32 %v1766_v49, 0.0 }
 0x488   : > { %2282 = vst [vmem:[%s3085_s24 + $0x50] sm:$0xff] %v1816_v13 }
 0x489   : > { %v1808_v12 = vpop.f32.mrf.mxu2 }
 0x48a   : > { %v1809_v16 = vadd.f32 %v1808_v12, %v1786_v32 }
 0x48c   : > { %v1815_v50 = vmax.f32 %v1809_v16, 0.0  ;;  %v2239_v24 = vpop.f32.mrf.mxu3 }
 0x48d   : > { %v2240_v61 = vadd.f32 %v2239_v24, %v2209_v43 }
 0x48e   : > { %2281 = vst [vmem:[%s3085_s24 + $0x48] sm:$0xff] %v1815_v50  ;;  %v2262_v60 = vpop.f32.mrf.mxu1 }
 0x48f   : > { %v2268_v22 = vmax.f32 %v2240_v61, 0.0  ;;  %v2263_v42 = vadd.f32 %v2262_v60, %v2209_v43 }
 0x491   : > { %2284 = vst [vmem:[%s3085_s24 + $0x60] sm:$0xff] %v2268_v22  ;;  %v2269_v4 = vmax.f32 %v2263_v42, 0.0  ;;  %v1811_v55 = vpop.f32.mrf.mxu2 }
 0x492   : > { %v1812_v6 = vadd.f32 %v1811_v55, %v1789_v25 }
 0x493   : > { %2285 = vst [vmem:[%s3085_s24 + $0x68] sm:$0xff] %v2269_v4 }
 0x494   : > { %v1817_v27 = vmax.f32 %v1812_v6, 0.0  ;;  %v2242_v15 = vpop.f32.mrf.mxu3 }
 0x495   : > { %v2243_v34 = vadd.f32 %v2242_v15, %v2214_v56 }
 0x496   : > { %2283 = vst [vmem:[%s3085_s24 + $0x58] sm:$0xff] %v1817_v27  ;;  %v2265_v54 = vpop.f32.mrf.mxu1 }
 0x497   : > { %v2270_v26 = vmax.f32 %v2243_v34, 0.0  ;;  %v2266_v59 = vadd.f32 %v2265_v54, %v2214_v56 }
 0x499   : > { %2286 = vst [vmem:[%s3085_s24 + $0x70] sm:$0xff] %v2270_v26  ;;  %v2271_v40 = vmax.f32 %v2266_v59, 0.0 }
 0x49b   : > { %2287 = vst [vmem:[%s3085_s24 + $0x78] sm:$0xff] %v2271_v40 }
 0x49c PF: > { %s23_s25 = sadd.s32 1, %s2816_s25  }
 0x49d   : > { %p20_p4 = scmp.ge.s32.totalorder %s23_s25, 4  }
 0x49f   :  { %22 = sbr.rel (!%p20_p4) target bundleno = 1 (0x1), region = 108 }

</bundles_post_ra>
